<compile_context>
chip_gen: v5e
topology: v5e:2x2
jax: 0.10.0
libtpu: 0.0.40
codegen_flags: <defaults>
</compile_context>

<pallas_src>
import jax
import jax.numpy as jnp
from jax.experimental import pallas as pl
from jax.experimental.pallas import tpu as pltpu

IN_FEATS = 1433
OUT_FEATS = 16
PAD_OUT = 128  # lane-dense output width (real columns = first OUT_FEATS)


def gcn_linear_relu_kernel(x_ref, w_ref, o_ref):
    # x_ref: (tile_n, IN_FEATS) node-feature block in its HBM-resident dtype (VMEM)
    # w_ref: (IN_FEATS, PAD_OUT) bf16 transposed+zero-padded weight (resident every step)
    # o_ref: (tile_n, PAD_OUT) bf16 output block (lane-dense, unmasked stores)
    x = x_ref[...].astype(jnp.bfloat16)  # VPU cast, hidden under the feature DMA
    h = jnp.dot(x, w_ref[...], preferred_element_type=jnp.float32)
    o_ref[...] = jnp.maximum(h, 0.0).astype(o_ref.dtype)


def net1_forward(features, weight, *, tile_n=512, vmem_limit_bytes=None):
    """features: (N, IN_FEATS) f32 (or bf16 at rest); weight: (OUT_FEATS, IN_FEATS) as in nn.Linear.

    Returns relu(features @ weight.T) as (N, OUT_FEATS) bf16.
    """
    n, k = features.shape
    assert k == IN_FEATS and weight.shape == (OUT_FEATS, IN_FEATS)

    # Transposed, bf16, zero-padded to 128 lanes -> lane-dense output, unmasked stores.
    # Tiny (1433x128 bf16 ~ 0.37 MB); constant-folded per weight under jit.
    w_pad = (
        jnp.zeros((IN_FEATS, PAD_OUT), dtype=jnp.bfloat16)
        .at[:, :OUT_FEATS]
        .set(weight.T.astype(jnp.bfloat16))
    )

    cp_kwargs = dict(dimension_semantics=("parallel",))
    if vmem_limit_bytes is not None:
        cp_kwargs["vmem_limit_bytes"] = vmem_limit_bytes

    out = pl.pallas_call(
        gcn_linear_relu_kernel,
        out_shape=jax.ShapeDtypeStruct((n, PAD_OUT), jnp.bfloat16),
        grid_spec=pltpu.PrefetchScalarGridSpec(
            num_scalar_prefetch=0,
            # Ragged N handled by Pallas partial-last-block masking (no jnp.pad copy).
            grid=(pl.cdiv(n, tile_n),),
            in_specs=[
                # tile over nodes; feature dim untiled (block == full array dim,
                # so K=1433 not being a multiple of 128 is legal)
                pl.BlockSpec((tile_n, IN_FEATS), lambda i: (i, 0)),
                # whole padded transposed weight resident for every grid step
                pl.BlockSpec((IN_FEATS, PAD_OUT), lambda i: (0, 0)),
            ],
            out_specs=pl.BlockSpec((tile_n, PAD_OUT), lambda i: (i, 0)),
        ),
        compiler_params=pltpu.CompilerParams(**cp_kwargs),
    )(features, w_pad)

    # Strip the zero-padded output lanes; keep bf16 (cast downstream if f32 needed).
    return out[:, :OUT_FEATS]


if __name__ == "__main__":
    key = jax.random.PRNGKey(0)
    k_feat, k_w = jax.random.split(key)

    # N not a multiple of tile_n -> exercises the partial-last-block (ragged) path.
    num_nodes = 700
    features = jax.random.normal(k_feat, (num_nodes, IN_FEATS), dtype=jnp.float32)

    # Deterministic synthetic init mimicking nn.Linear's uniform(-1/sqrt(fan_in), 1/sqrt(fan_in))
    bound = 1.0 / jnp.sqrt(jnp.float32(IN_FEATS))
    weight = jax.random.uniform(
        k_w, (OUT_FEATS, IN_FEATS), dtype=jnp.float32, minval=-bound, maxval=bound
    )

    out = jax.block_until_ready(net1_forward(features, weight))
    assert out.shape == (num_nodes, OUT_FEATS)
    assert out.dtype == jnp.bfloat16
    out_f32 = out.astype(jnp.float32)

    # Reference at the kernel's precision (bf16 operands, f32 accumulate, bf16 store).
    f_bf = features.astype(jnp.bfloat16).astype(jnp.float32)
    w_bf = weight.astype(jnp.bfloat16).astype(jnp.float32)
    ref_bf16 = jnp.maximum(f_bf @ w_bf.T, 0.0)
    assert jnp.allclose(out_f32, ref_bf16, atol=2e-2, rtol=2e-2)

    # Loose sanity check against the full-f32 reference (bf16 quantization only).
    ref_f32 = jnp.maximum(features @ weight.T, 0.0)
    assert jnp.allclose(out_f32, ref_f32, atol=5e-2, rtol=5e-2)

    print("KERNEL_OK")
</pallas_src>

<mosaic_0001>
module attributes {stable_mosaic.version = 11 : i64} {
  func.func @gcn_linear_relu_kernel(%arg0: i32, %arg1: memref<512x1433xf32, #tpu.memory_space<vmem>>, %arg2: memref<1433x128xbf16, #tpu.memory_space<vmem>>, %arg3: memref<512x128xbf16, #tpu.memory_space<vmem>>) attributes {dimension_semantics = [#tpu.dimension_semantics<parallel>], iteration_bounds = array<i64: 2>, scalar_prefetch = 0 : i64, scratch_operands = 0 : i64, tpu.core_type = #tpu.core_type<tc>, window_params = [{transform_indices = @transform_0, window_bounds = array<i64: 512, 1433>}, {pipeline_mode = #tpu.pipeline_mode<synchronous>, transform_indices = @transform_1, window_bounds = array<i64: 1433, 128>}, {transform_indices = @transform_2, window_bounds = array<i64: 512, 128>}]} {
    %c0 = arith.constant 0 : index
    %c0_0 = arith.constant 0 : index
    %0 = vector.load %arg1[%c0, %c0_0] : memref<512x1433xf32, #tpu.memory_space<vmem>>, vector<512x1433xf32>
    %1 = arith.truncf %0 : vector<512x1433xf32> to vector<512x1433xbf16>
    %c0_1 = arith.constant 0 : index
    %c0_2 = arith.constant 0 : index
    %2 = vector.load %arg2[%c0_1, %c0_2] : memref<1433x128xbf16, #tpu.memory_space<vmem>>, vector<1433x128xbf16>
    %cst = arith.constant dense<0.000000e+00> : vector<512x128xf32>
    %3 = tpu.matmul %1, %2, %cst {dimension_numbers = #tpu.dot_dimension_numbers<[1], [0], [0], [1], [0, 0, 1, 1], [], []>} : vector<512x1433xbf16>, vector<1433x128xbf16>, vector<512x128xf32> -> vector<512x128xf32>
    %cst_3 = arith.constant 0.000000e+00 : f32
    %4 = vector.broadcast %cst_3 : f32 to vector<512x128xf32>
    %5 = arith.maximumf %3, %4 : vector<512x128xf32>
    %6 = arith.truncf %5 : vector<512x128xf32> to vector<512x128xbf16>
    %c0_4 = arith.constant 0 : index
    %c0_5 = arith.constant 0 : index
    %7 = vector.load %arg3[%c0_4, %c0_5] : memref<512x128xbf16, #tpu.memory_space<vmem>>, vector<512x128xbf16>
    tpu.vector_store %arg3[%c0_4, %c0_5], %6 {strides = array<i32>} : memref<512x128xbf16, #tpu.memory_space<vmem>>, vector<512x128xbf16>,
    return
  }
  func.func @transform_0(%arg0: i32) -> (i32, i32) {
    %c0_i32 = arith.constant 0 : i32
    %c0_i32_0 = arith.constant 0 : i32
    return %arg0, %c0_i32 : i32, i32
  }
  func.func @transform_1(%arg0: i32) -> (i32, i32) {
    %c0_i32 = arith.constant 0 : i32
    %c0_i32_0 = arith.constant 0 : i32
    %c0_i32_1 = arith.constant 0 : i32
    return %c0_i32, %c0_i32_0 : i32, i32
  }
  func.func @transform_2(%arg0: i32) -> (i32, i32) {
    %c0_i32 = arith.constant 0 : i32
    %c0_i32_0 = arith.constant 0 : i32
    return %arg0, %c0_i32 : i32, i32
  }
}

</mosaic_0001>

<bundles_post_ra>
// kernel: tpu_custom_call.1
= control target key start
LH: loop header
LB: loop body
LE: loop exit
PB: predicated region body
PF: predicated region fallthrough
CT: control target
= control target key end

     0   :  { %7 = vsyncpa [#allocation3], 0  ;;  %s6854_s0 = inlined_call_operand.hbm [shape: f32[700,1433], index: 0, kind: input, shape index: {}]   ;;  %s6855_s1 = inlined_call_operand.hbm [shape: bf16[1433,128], index: 1, kind: input, shape index: {}]   ;;  %s6856_s2 = inlined_call_operand.hbm [shape: bf16[700,128], index: 2, kind: output, shape index: {}]  }
   0x1   :  { %9 = vsyncpa [#allocation3 + $0x1], 0 }
   0x2   :  { %10 = vsyncpa [#allocation6], 0 }
   0x3   :  { %11 = vsyncpa [#allocation4], 0 }
   0x4   :  { %13 = vsyncpa [#allocation4 + $0x1], 0  ;;  %s5437_s9 = smov 0   ;;  %s5439_s10 = smov 0  }
   0x5   :  { %s5441_s11 = smov 0   ;;  %s5443_s12 = smov 0  }
   0x6 LB: > { %s5458_s13 = sadd.s32 4294967295, %s5410_s12   ;;  %s4503_s14 = sadd.s32 4294967294, %s5410_s12   ;;  %s5410_s12 = sphi %s5443_s12, %s6965_s12   ;;  %s5406_s11 = sphi %s5441_s11, %s6964_s11   ;;  %s5402_s10 = sphi %s5439_s10, %s6963_s10   ;;  %s5398_s9 = sphi %s5437_s9, %s6962_s9  }
   0x7   : > { %s5462_s15 = sadd.s32 1, %s5410_s12   ;;  %s26_s16 = sadd.s32 1, %s5406_s11 }
   0x8   : > { %s23_s17 = ssub.s32 %s5410_s12, %s5462_s15  ;;  %p33_p0 = scmp.ne.s32.totalorder %s5406_s11, %s5402_s10 }
   0x9   : > { %p24_p1 = scmp.eq.s32.totalorder %s23_s17, 0  ;;  %p34_p2 = scmp.eq.s32.totalorder %s5410_s12, 0 }
   0xa   : > { %p39_p3 = scmp.ne.s32.totalorder %s5402_s10, %s5398_s9  ;;  %p6858_p4 = scmp.eq.s32.totalorder %s5458_s13, 0 }
   0xb   : > { %s5474_s18 = scalar_select %p24_p1, %s5406_s11, %s26_s16  }
   0xc   : > { %p5476_p5 = por %p34_p2, %p33_p0  ;;  %p5482_p6 = por %p6858_p4, %p39_p3 }
   0xd   : > { %p84_p7 = scmp.eq.s32.totalorder %s5458_s13, 1  ;;  %p90_p8 = scmp.eq.s32.totalorder %s4503_s14, 1 }
   0xe   : > { %p4504_p9 = scmp.ge.s32.totalorder %s5410_s12, 1  ;;  %p97_p10 = scmp.lt.s32.totalorder %s5410_s12, 3 }
   0xf   : > { %p5489_p11 = por %p84_p7, %p33_p0  ;;  %p5493_p12 = por %p90_p8, %p39_p3 }
  0x10   : > { %p5497_p13 = pnand %p4504_p9, %p97_p10  ;;  %s108_s26 = sshll.u32 %s6855_s1, 4  ;;  %s109_s26 = int_to_ptr.hbm [resolvable:$true] %s108_s26 }
  0x11   : > { %s6862_s22 = scalar_select %p5493_p12, 1, 0 }
  0x12   : > { %p5209_p1 = pneg %p5497_p13  ;;  %s5412_s27 = smov [#allocation5]  }
  0x13   : > { %s110_s28 = sshll.u32 %s5412_s27, 4  ;;  %s5413_s29 = smov 64   ;;  %s111_s28 = int_to_ptr.vmem [resolvable:$true] %s110_s28 }
  0x14   : > { %p5210_p0 = pnand %p5209_p1, %p6858_p4  ;;  %s5414_s30 = smov 4  }
  0x15   : > { %p6857_p2 = scmp.ge.s32.totalorder %s5410_s12, 2 }
  0x16   : > { %5212 = dma.hbm_to_vmem [thread:$0]  (!%p5210_p0), %s109_s26, 11520, %s111_s28, [#allocation6], %s5413_s29, %s5413_s29, %s5414_s30  }
  0x17   : > { %120 = sbr.rel (%p6857_p2) target bundleno = 69 (0x45), region = 20 }
  0x1c   : > { %123 = sbr.rel (!%p5476_p5) target bundleno = 69 (0x45), region = 24  ;;  %s124_s3 = sand.u32 (%p5476_p5), 1, %s5406_s11  }
  0x1d   : > { %s4507_s4 = sshll.u32 (%p5476_p5), %s5410_s12, 6  ;;  %s5200_s5 = smul.u32 (%p5476_p5), 6144, %s124_s3 }
  0x1e   : > { %s130_s6 = ssub.s32 (%p5476_p5), 88, %s4507_s4  ;;  %s5515_s16 = scalar_lea.sflag (%p5476_p5), [#allocation3], %s124_s3 }
  0x1f   : > { %p131_p3 = scmp.lt.s32.totalorder (%p5476_p5), %s130_s6, 64  ;;  %s128_s17 = scalar_lea.vmem (%p5476_p5), [#allocation2], %s5200_s5 }
  0x21   : > { %s6967_s6 = smov (!%p131_p3, %s130_s6), 64 }
  0x22   : > { %s4509_s7 = smul.u32 96, %s6967_s6 }
  0x24   : > { %s135_s8 = ssub.s32 6144, %s4509_s7 }
  0x25   : > { %s136_s14 = sshll.u32 %s135_s8, 4 }
  0x26   : > { %137 = vsyncadd %s5515_s16, %s136_s14  ;;  %p5518_p7 = scmp.ne.s32.totalorder %s4509_s7, 0  ;;  %s5201_s24 = smul.u32 6144, %s5410_s12 }
  0x27   : > { %s5523_s25 = sshll.u32 %s128_s17, 4  ;;  %s5525_s26 = smul.u32 1536, %s6967_s6  ;;  %s146_s25 = int_to_ptr.vmem [resolvable:$true] %s5523_s25 }
  0x28   : > { %s141_s29 = scalar_lea.hbm %s6854_s0, %s5201_s24  ;;  %s5301_s17 = scalar_lea.hbm %s6854_s0, 8448 }
  0x29   : > { %s143_s30 = sshll.u32 %s141_s29, 4  ;;  %s5292_s4 = sshrl.u32 %s5525_s26, 4  ;;  %s5531_s30 = int_to_ptr.hbm [resolvable:$true] %s143_s30 }
  0x2a   : > { %s5290_s3 = sshra.s32 %s5531_s30, 4  ;;  %s5328_s5 = sshll.u32 %s5292_s4, 4  ;;  %s5291_s3 = int_to_ptr.hbm [resolvable:$true] %s5290_s3 }
  0x2b   : > { %p5294_p5 = scmp.ne.s32.totalorder %s5328_s5, %s5525_s26  ;;  %s5295_s7 = sadd.s32 1, %s5292_s4 }
  0x2c   : > { %p5302_p1 = scmp.lt.s32.totalorder %s5291_s3, %s6854_s0 }
  0x2d   : > { %s6969_s7 = smov (!%p5294_p5, %s5295_s7), %s5292_s4 }
  0x2e   : > { %s5297_s6 = scalar_lea.hbm %s5291_s3, %s6969_s7 }
  0x2f   : > { %p5298_p8 = scmp.ne.s32.totalorder %s5291_s3, %s5297_s6  ;;  %p5303_p0 = scmp.lt.s32.totalorder %s5301_s17, %s5297_s6 }
  0x31   : > { %p5299_p9 = pnand %p5298_p8, %p5518_p7  ;;  %p5304_p3 = por %p5303_p0, %p5302_p1 }
  0x33   : > { %p5300_p10 = pneg %p5299_p9 }
  0x35   : > { %p5305_p2 = pnand %p5304_p3, %p5300_p10 }
  0x37   : > { %5308 = shalt.err (!%p5305_p2)
}
  0x38   : > { %s5309_s28 = sshra.s32 %s146_s25, 4  ;;  %s5415_s4 = smov [#allocation2]   ;;  %s5310_s28 = int_to_ptr.vmem [resolvable:$true] %s5309_s28 }
  0x39   : > { %s5316_s29 = scalar_lea.vmem %s5310_s28, %s6969_s7  ;;  %s5320_s5 = scalar_lea.vmem %s5415_s4, 12288 }
  0x3a   : > { %p5317_p5 = scmp.ne.s32.totalorder %s5310_s28, %s5316_s29  ;;  %p5322_p4 = scmp.lt.s32.totalorder %s5320_s5, %s5316_s29 }
  0x3c   : > { %p5318_p8 = pnand %p5317_p5, %p5518_p7 }
  0x3e   : > { %p5319_p9 = pneg %p5318_p8 }
  0x40   : > { %p5324_p12 = pnand %p5322_p4, %p5319_p9 }
  0x42   : > { %5327 = shalt.err (!%p5324_p12)
}
  0x43   : > { %s5416_s3 = smov 1536   ;;  %s5417_s6 = smov 96  }
  0x44   : > { %151 = dma.hbm_to_vmem [thread:$0]  (%p5518_p7), %s5531_s30, %s5525_s26, %s146_s25, %s5515_s16, %s5416_s3, %s5416_s3, %s5417_s6  }
  0x45 PF: > { %157 = sbr.rel (%p5497_p13) target bundleno = 1816 (0x718), region = 28 }
  0x4a   : > { %s5558_s7 = sand.u32 1, %s5402_s10  }
  0x4b   : > { %s5202_s8 = smul.u32 6144, %s5558_s7  ;;  %s160_s14 = scalar_lea.sflag [#allocation3], %s5558_s7 }
  0x4d   : > { %s5562_s17 = scalar_lea.vmem [#allocation2], %s5202_s8 }
  0x4e   : > { %5385 = dma.done.wait (%p5482_p6), %s160_s14, 98304  }
  0x4f   : > { %5387 = vsyncadd (%p5482_p6), %s160_s14, 4294868992  ;;  %p6865_p4 = scmp.eq.s32.totalorder %s5458_s13, 0 }
  0x51   : > { %5389 = dma.done.wait (%p6865_p4), [#allocation6], 11520   ;;  %p6866_p12 = pmov %p6865_p4 }
  0x52   : > { %v4925_v0 = vld [vmem:[#allocation5 + $0x38] sm:$0xff]  ;;  %v4924_v4 = vld [vmem:[#allocation5 + $0x30] sm:$0xff]  ;;  %v4923_v8 = vld [vmem:[#allocation5 + $0x28] sm:$0xff]  ;;  %vm2170_vm0 = vcmask 1043456   ;;  %vm2171_vm1 = vcmask 1044480   ;;  %vm2073_vm2 = vcmask 203776  }
  0x53   : > { %5391 = vsyncadd (%p6866_p12), [#allocation6], 4294955776  ;;  %v4933_v1 = vld [vmem:[#allocation5 + $0x78] sm:$0xff]  ;;  %2177 = vmatpush.bf16.msra.mxu0 %v4925_v0  ;;  %v4932_v5 = vld [vmem:[#allocation5 + $0x70] sm:$0xff]  ;;  %s4516_s20 = sshll.u32 %s5558_s7, 8  ;;  %s4398_s16 = scalar_lea.sflag [#allocation4], %s5558_s7 }
  0x54   : > { %v4941_v2 = vld [vmem:[#allocation5 + $0xb8] sm:$0xff]  ;;  %2346 = vmatpush.bf16.msra.mxu1 %v4933_v1  ;;  %v4940_v6 = vld [vmem:[#allocation5 + $0xb0] sm:$0xff]  ;;  %v4931_v9 = vld [vmem:[#allocation5 + $0x68] sm:$0xff]  ;;  %s6498_s23 = scalar_lea.vmem [#allocation7], %s4516_s20  ;;  %s4910_s19 = sshll.u32 (%p5489_p11), %s5458_s13, 6 }
  0x55   : > { %v4949_v3 = vld [vmem:[#allocation5 + $0xf8] sm:$0xff]  ;;  %2515 = vmatpush.bf16.msra.mxu2 %v4941_v2  ;;  %v4948_v7 = vld [vmem:[#allocation5 + $0xf0] sm:$0xff]  ;;  %v4939_v10 = vld [vmem:[#allocation5 + $0xa8] sm:$0xff]  ;;  %s4406_s25 = ssub.s32 (%p5489_p11), 88, %s4910_s19 }
  0x56   : > { %2684 = vmatpush.bf16.msra.mxu3 %v4949_v3  ;;  %v4947_v11 = vld [vmem:[#allocation5 + $0xe8] sm:$0xff]  ;;  %v4922_v12 = vld [vmem:[#allocation5 + $0x20] sm:$0xff]  ;;  %v4921_v16 = vld [vmem:[#allocation5 + $0x18] sm:$0xff]  ;;  %p4407_p6 = scmp.lt.s32.totalorder (%p5489_p11), %s4406_s25, 64 }
  0x57   : > { %2178 = vmatpush.bf16.msra.mxu0 %v4924_v4  ;;  %v4930_v13 = vld [vmem:[#allocation5 + $0x60] sm:$0xff]  ;;  %v4929_v17 = vld [vmem:[#allocation5 + $0x58] sm:$0xff]  ;;  %v4920_v20 = vld [vmem:[#allocation5 + $0x10] sm:$0xff] }
  0x58   : > { %2347 = vmatpush.bf16.msra.mxu1 %v4932_v5  ;;  %v4938_v14 = vld [vmem:[#allocation5 + $0xa0] sm:$0xff]  ;;  %v4937_v18 = vld [vmem:[#allocation5 + $0x98] sm:$0xff]  ;;  %v4928_v21 = vld [vmem:[#allocation5 + $0x50] sm:$0xff] }
  0x59   : > { %2516 = vmatpush.bf16.msra.mxu2 %v4940_v6  ;;  %v4946_v15 = vld [vmem:[#allocation5 + $0xe0] sm:$0xff]  ;;  %v4945_v19 = vld [vmem:[#allocation5 + $0xd8] sm:$0xff]  ;;  %v4936_v22 = vld [vmem:[#allocation5 + $0x90] sm:$0xff] }
  0x5a   : > { %2685 = vmatpush.bf16.msra.mxu3 %v4948_v7  ;;  %v4944_v23 = vld [vmem:[#allocation5 + $0xd0] sm:$0xff]  ;;  %v4919_v24 = vld [vmem:[#allocation5 + $0x8] sm:$0xff]  ;;  %v4918_v28 = vld [vmem:[#allocation5] sm:$0xff] }
  0x5b   : > { %2179 = vmatpush.bf16.msra.mxu0 %v4923_v8  ;;  %v4927_v25 = vld [vmem:[#allocation5 + $0x48] sm:$0xff]  ;;  %v4926_v29 = vld [vmem:[#allocation5 + $0x40] sm:$0xff]  ;;  %v204_v36 = vld [vmem:[%s5562_s17 + $0x10] sm:$0xff] }
  0x5c   : > { %2348 = vmatpush.bf16.msra.mxu1 %v4931_v9  ;;  %v4935_v26 = vld [vmem:[#allocation5 + $0x88] sm:$0xff]  ;;  %v4934_v30 = vld [vmem:[#allocation5 + $0x80] sm:$0xff]  ;;  %v216_v37 = vld [vmem:[%s5562_s17 + $0x70] sm:$0xff] }
  0x5d   : > { %2517 = vmatpush.bf16.msra.mxu2 %v4939_v10  ;;  %v4943_v27 = vld [vmem:[#allocation5 + $0xc8] sm:$0xff]  ;;  %v4942_v31 = vld [vmem:[#allocation5 + $0xc0] sm:$0xff]  ;;  %v205_v38 = vld [vmem:[%s5562_s17 + $0x18] sm:$0xff]  ;;  %v972_v44 = vpack.c.bf16 %v216_v37, %v204_v36 }
  0x5e   : > { %2686 = vmatpush.bf16.msra.mxu3 %v4947_v11  ;;  %v202_v32 = vld [vmem:[%s5562_s17] sm:$0xff]  ;;  %v203_v34 = vld [vmem:[%s5562_s17 + $0x8] sm:$0xff]  ;;  %v217_v39 = vld [vmem:[%s5562_s17 + $0x78] sm:$0xff] }
  0x5f   : > { %2180 = vmatpush.bf16.msra.mxu0 %v4922_v12  ;;  %v214_v33 = vld [vmem:[%s5562_s17 + $0x60] sm:$0xff]  ;;  %v215_v35 = vld [vmem:[%s5562_s17 + $0x68] sm:$0xff]  ;;  %v4973_v40 = vld [vmem:[#allocation5 + $0x1b8] sm:$0xff]  ;;  %v973_v45 = vpack.c.bf16 %v217_v39, %v205_v38 }
  0x60   : > { %2349 = vmatpush.bf16.msra.mxu1 %v4930_v13  ;;  %v4957_v41 = vld [vmem:[#allocation5 + $0x138] sm:$0xff]  ;;  %v970_v42 = vpack.c.bf16 %v214_v33, %v202_v32  ;;  %v971_v43 = vpack.c.bf16 %v215_v35, %v203_v34  ;;  %v226_v48 = vld [vmem:[%s5562_s17 + $0xc0] sm:$0xff]  ;;  %v227_v50 = vld [vmem:[%s5562_s17 + $0xc8] sm:$0xff] }
  0x61   : > { %2518 = vmatpush.bf16.msra.mxu2 %v4938_v14  ;;  %v4981_v46 = vld [vmem:[#allocation5 + $0x1f8] sm:$0xff]  ;;  %v238_v49 = vld [vmem:[%s5562_s17 + $0x120] sm:$0xff]  ;;  %v239_v51 = vld [vmem:[%s5562_s17 + $0x128] sm:$0xff] }
  0x62   : > { %2687 = vmatpush.bf16.msra.mxu3 %v4946_v15  ;;  %v4965_v47 = vld [vmem:[#allocation5 + $0x178] sm:$0xff]  ;;  %v228_v52 = vld [vmem:[%s5562_s17 + $0xd0] sm:$0xff]  ;;  %v982_v56 = vpack.c.bf16 %v238_v49, %v226_v48  ;;  %v983_v57 = vpack.c.bf16 %v239_v51, %v227_v50  ;;  %v250_v60 = vld [vmem:[%s5562_s17 + $0x180] sm:$0xff] }
  0x63   : > { %2181 = vmatpush.bf16.msra.mxu0 %v4921_v16  ;;  %v240_v53 = vld [vmem:[%s5562_s17 + $0x130] sm:$0xff]  ;;  %v229_v54 = vld [vmem:[%s5562_s17 + $0xd8] sm:$0xff]  ;;  %v262_v61 = vld [vmem:[%s5562_s17 + $0x1e0] sm:$0xff] }
  0x64   : > { %2350 = vmatpush.bf16.msra.mxu1 %v4929_v17  ;;  %v241_v55 = vld [vmem:[%s5562_s17 + $0x138] sm:$0xff]  ;;  %v984_v58 = vpack.c.bf16 %v240_v53, %v228_v52  ;;  %v251_v62 = vld [vmem:[%s5562_s17 + $0x188] sm:$0xff]  ;;  %v252_v0 = vld [vmem:[%s5562_s17 + $0x190] sm:$0xff]  ;;  %v994_v4 = vpack.c.bf16 %v262_v61, %v250_v60 }
  0x65   : > { %2519 = vmatpush.bf16.msra.mxu2 %v4937_v18  ;;  %v985_v59 = vpack.c.bf16 %v241_v55, %v229_v54  ;;  %v263_v63 = vld [vmem:[%s5562_s17 + $0x1e8] sm:$0xff]  ;;  %v264_v1 = vld [vmem:[%s5562_s17 + $0x1f0] sm:$0xff]  ;;  %v253_v2 = vld [vmem:[%s5562_s17 + $0x198] sm:$0xff] }
  0x66   : > { %2688 = vmatpush.bf16.msra.mxu3 %v4945_v19  ;;  %v265_v3 = vld [vmem:[%s5562_s17 + $0x1f8] sm:$0xff]  ;;  %v995_v5 = vpack.c.bf16 %v263_v63, %v251_v62  ;;  %v996_v6 = vpack.c.bf16 %v264_v1, %v252_v0  ;;  %v4972_v8 = vld [vmem:[#allocation5 + $0x1b0] sm:$0xff]  ;;  %v274_v12 = vld [vmem:[%s5562_s17 + $0x240] sm:$0xff] }
  0x67   : > { %2182 = vmatpush.bf16.msra.mxu0 %v4920_v20  ;;  %v997_v7 = vpack.c.bf16 %v265_v3, %v253_v2  ;;  %v4956_v9 = vld [vmem:[#allocation5 + $0x130] sm:$0xff]  ;;  %v286_v13 = vld [vmem:[%s5562_s17 + $0x2a0] sm:$0xff]  ;;  %v275_v14 = vld [vmem:[%s5562_s17 + $0x248] sm:$0xff] }
  0x68   : > { %2351 = vmatpush.bf16.msra.mxu1 %v4928_v21  ;;  %v4980_v10 = vld [vmem:[#allocation5 + $0x1f0] sm:$0xff]  ;;  %v287_v15 = vld [vmem:[%s5562_s17 + $0x2a8] sm:$0xff]  ;;  %v277_v18 = vld [vmem:[%s5562_s17 + $0x258] sm:$0xff]  ;;  %v1006_v20 = vpack.c.bf16 %v286_v13, %v274_v12 }
  0x69   : > { %2520 = vmatpush.bf16.msra.mxu2 %v4936_v22  ;;  %v4964_v11 = vld [vmem:[#allocation5 + $0x170] sm:$0xff]  ;;  %v289_v19 = vld [vmem:[%s5562_s17 + $0x2b8] sm:$0xff]  ;;  %v1007_v21 = vpack.c.bf16 %v287_v15, %v275_v14  ;;  %v322_v36 = vld [vmem:[%s5562_s17 + $0x3c0] sm:$0xff] }
  0x6a   : > { %2689 = vmatpush.bf16.msra.mxu3 %v4944_v23  ;;  %v276_v16 = vld [vmem:[%s5562_s17 + $0x250] sm:$0xff]  ;;  %v1009_v23 = vpack.c.bf16 %v289_v19, %v277_v18  ;;  %v334_v37 = vld [vmem:[%s5562_s17 + $0x420] sm:$0xff]  ;;  %v323_v38 = vld [vmem:[%s5562_s17 + $0x3c8] sm:$0xff] }
  0x6b   : > { %2183 = vmatpush.bf16.msra.mxu0 %v4919_v24  ;;  %v288_v17 = vld [vmem:[%s5562_s17 + $0x2b0] sm:$0xff]  ;;  %v298_v24 = vld [vmem:[%s5562_s17 + $0x300] sm:$0xff]  ;;  %v335_v39 = vld [vmem:[%s5562_s17 + $0x428] sm:$0xff] }
  0x6c   : > { %2352 = vmatpush.bf16.msra.mxu1 %v4927_v25  ;;  %v1008_v22 = vpack.c.bf16 %v288_v17, %v276_v16  ;;  %v310_v25 = vld [vmem:[%s5562_s17 + $0x360] sm:$0xff]  ;;  %v347_v50 = vld [vmem:[%s5562_s17 + $0x488] sm:$0xff]  ;;  %v348_v52 = vld [vmem:[%s5562_s17 + $0x490] sm:$0xff] }
  0x6d   : > { %2521 = vmatpush.bf16.msra.mxu2 %v4935_v26  ;;  %v299_v26 = vld [vmem:[%s5562_s17 + $0x308] sm:$0xff]  ;;  %v1018_v32 = vpack.c.bf16 %v310_v25, %v298_v24  ;;  %v346_v48 = vld [vmem:[%s5562_s17 + $0x480] sm:$0xff]  ;;  %v360_v53 = vld [vmem:[%s5562_s17 + $0x4f0] sm:$0xff] }
  0x6e   : > { %2690 = vmatpush.bf16.msra.mxu3 %v4943_v27  ;;  %v311_v27 = vld [vmem:[%s5562_s17 + $0x368] sm:$0xff]  ;;  %v358_v49 = vld [vmem:[%s5562_s17 + $0x4e0] sm:$0xff]  ;;  %v349_v54 = vld [vmem:[%s5562_s17 + $0x498] sm:$0xff] }
  0x6f   : > { %2184 = vmatpush.bf16.msra.mxu0 %v4918_v28  ;;  %v300_v28 = vld [vmem:[%s5562_s17 + $0x310] sm:$0xff]  ;;  %v1019_v33 = vpack.c.bf16 %v311_v27, %v299_v26  ;;  %v359_v51 = vld [vmem:[%s5562_s17 + $0x4e8] sm:$0xff]  ;;  %v361_v55 = vld [vmem:[%s5562_s17 + $0x4f8] sm:$0xff] }
  0x70   : > { %2353 = vmatpush.bf16.msra.mxu1 %v4926_v29  ;;  %v312_v29 = vld [vmem:[%s5562_s17 + $0x370] sm:$0xff]  ;;  %v4971_v60 = vld [vmem:[#allocation5 + $0x1a8] sm:$0xff]  ;;  %v370_v0 = vld [vmem:[%s5562_s17 + $0x540] sm:$0xff] }
  0x71   : > { %2522 = vmatpush.bf16.msra.mxu2 %v4934_v30  ;;  %v301_v30 = vld [vmem:[%s5562_s17 + $0x318] sm:$0xff]  ;;  %v1020_v34 = vpack.c.bf16 %v312_v29, %v300_v28  ;;  %v4955_v61 = vld [vmem:[#allocation5 + $0x128] sm:$0xff]  ;;  %v382_v1 = vld [vmem:[%s5562_s17 + $0x5a0] sm:$0xff] }
  0x72   : > { %2691 = vmatpush.bf16.msra.mxu3 %v4942_v31  ;;  %2185 = vmatmul.bf16.vlgmr.msra.gmra.mxu0 %v970_v42  ;;  %v313_v31 = vld [vmem:[%s5562_s17 + $0x378] sm:$0xff]  ;;  %v4979_v62 = vld [vmem:[#allocation5 + $0x1e8] sm:$0xff]  ;;  %v394_v12 = vld [vmem:[%s5562_s17 + $0x600] sm:$0xff] }
  0x73   : > { %2853 = vmatpush.bf16.msrb.mxu0 %v4957_v41  ;;  %2354 = vmatmul.bf16.vlgmr.msra.gmra.mxu1 %v971_v43  ;;  %v1021_v35 = vpack.c.bf16 %v313_v31, %v301_v30  ;;  %v336_v41 = vld [vmem:[%s5562_s17 + $0x430] sm:$0xff]  ;;  %v325_v42 = vld [vmem:[%s5562_s17 + $0x3d8] sm:$0xff]  ;;  %v4963_v63 = vld [vmem:[#allocation5 + $0x168] sm:$0xff] }
  0x74   : > { %2523 = vmatmul.bf16.vlgmr.msra.gmra.mxu2 %v972_v44  ;;  %3022 = vmatpush.bf16.msrb.mxu1 %v4965_v47  ;;  %v337_v43 = vld [vmem:[%s5562_s17 + $0x438] sm:$0xff]  ;;  %v1030_v44 = vpack.c.bf16 %v334_v37, %v322_v36  ;;  %v371_v2 = vld [vmem:[%s5562_s17 + $0x548] sm:$0xff]  ;;  %v406_v13 = vld [vmem:[%s5562_s17 + $0x660] sm:$0xff] }
  0x75   : > { %3191 = vmatpush.bf16.msrb.mxu2 %v4973_v40  ;;  %2692 = vmatmul.bf16.vlgmr.msra.gmra.mxu3 %v973_v45  ;;  %v324_v40 = vld [vmem:[%s5562_s17 + $0x3d0] sm:$0xff]  ;;  %v1031_v45 = vpack.c.bf16 %v335_v39, %v323_v38  ;;  %v1033_v47 = vpack.c.bf16 %v337_v43, %v325_v42  ;;  %v383_v3 = vld [vmem:[%s5562_s17 + $0x5a8] sm:$0xff]  ;;  %v397_v18 = vld [vmem:[%s5562_s17 + $0x618] sm:$0xff] }
  0x76   : > { %3360 = vmatpush.bf16.msrb.mxu3 %v4981_v46  ;;  %v1032_v46 = vpack.c.bf16 %v336_v41, %v324_v40  ;;  %v395_v14 = vld [vmem:[%s5562_s17 + $0x608] sm:$0xff]  ;;  %v396_v16 = vld [vmem:[%s5562_s17 + $0x610] sm:$0xff]  ;;  %v409_v19 = vld [vmem:[%s5562_s17 + $0x678] sm:$0xff] }
  0x77   : > { %2854 = vmatpush.bf16.msrb.mxu0 %v4956_v9  ;;  %v1055_v9 = vpack.c.bf16 %v383_v3, %v371_v2  ;;  %v407_v15 = vld [vmem:[%s5562_s17 + $0x668] sm:$0xff]  ;;  %v408_v17 = vld [vmem:[%s5562_s17 + $0x670] sm:$0xff]  ;;  %v1069_v25 = vpack.c.bf16 %v409_v19, %v397_v18  ;;  %v421_v40 = vld [vmem:[%s5562_s17 + $0x6d8] sm:$0xff] }
  0x78   : > { %3023 = vmatpush.bf16.msrb.mxu1 %v4964_v11  ;;  %v1068_v24 = vpack.c.bf16 %v408_v17, %v396_v16  ;;  %v419_v36 = vld [vmem:[%s5562_s17 + $0x6c8] sm:$0xff]  ;;  %v420_v38 = vld [vmem:[%s5562_s17 + $0x6d0] sm:$0xff]  ;;  %v433_v41 = vld [vmem:[%s5562_s17 + $0x738] sm:$0xff] }
  0x79   : > { %3192 = vmatpush.bf16.msrb.mxu2 %v4972_v8  ;;  %v1054_v8 = vpack.c.bf16 %v382_v1, %v370_v0  ;;  %v431_v37 = vld [vmem:[%s5562_s17 + $0x728] sm:$0xff]  ;;  %v432_v39 = vld [vmem:[%s5562_s17 + $0x730] sm:$0xff]  ;;  %v445_v2 = vld [vmem:[%s5562_s17 + $0x798] sm:$0xff] }
  0x7a   : > { %3361 = vmatpush.bf16.msrb.mxu3 %v4980_v10  ;;  %v444_v0 = vld [vmem:[%s5562_s17 + $0x790] sm:$0xff]  ;;  %v457_v3 = vld [vmem:[%s5562_s17 + $0x7f8] sm:$0xff]  ;;  %v4954_v16 = vld [vmem:[#allocation5 + $0x120] sm:$0xff] }
  0x7b   : > { %2855 = vmatpush.bf16.msrb.mxu0 %v4955_v61  ;;  %v454_v61 = vld [vmem:[%s5562_s17 + $0x7e0] sm:$0xff]  ;;  %v456_v1 = vld [vmem:[%s5562_s17 + $0x7f0] sm:$0xff] }
  0x7c   : > { %3024 = vmatpush.bf16.msrb.mxu1 %v4963_v63  ;;  %v455_v63 = vld [vmem:[%s5562_s17 + $0x7e8] sm:$0xff]  ;;  %v4978_v17 = vld [vmem:[#allocation5 + $0x1e0] sm:$0xff] }
  0x7d   : > { %3193 = vmatpush.bf16.msrb.mxu2 %v4971_v60  ;;  %v442_v60 = vld [vmem:[%s5562_s17 + $0x780] sm:$0xff] }
  0x7e   : > { %3362 = vmatpush.bf16.msrb.mxu3 %v4979_v62  ;;  %v443_v62 = vld [vmem:[%s5562_s17 + $0x788] sm:$0xff] }
  0x7f   : > { %2856 = vmatpush.bf16.msrb.mxu0 %v4954_v16 }
  0x82   : > { %2190 = vmatmul.bf16.gmra.mxu0 %v982_v56  ;;  %v1042_v56 = vpack.c.bf16 %v358_v49, %v346_v48  ;;  %v1080_v49 = vpack.c.bf16 %v432_v39, %v420_v38  ;;  %3363 = vmatpush.bf16.msrb.mxu3 %v4978_v17 }
  0x83   : > { %2359 = vmatmul.bf16.gmra.mxu1 %v983_v57  ;;  %v1043_v57 = vpack.c.bf16 %v359_v51, %v347_v50  ;;  %v1081_v50 = vpack.c.bf16 %v433_v41, %v421_v40 }
  0x84   : > { %2528 = vmatmul.bf16.gmra.mxu2 %v984_v58  ;;  %v1044_v58 = vpack.c.bf16 %v360_v53, %v348_v52 }
  0x85   : > { %2697 = vmatmul.bf16.gmra.mxu3 %v985_v59  ;;  %v1045_v59 = vpack.c.bf16 %v361_v55, %v349_v54 }
  0x92   : > { %2195 = vmatmul.bf16.gmra.mxu0 %v994_v4  ;;  %v372_v4 = vld [vmem:[%s5562_s17 + $0x550] sm:$0xff] }
  0x93   : > { %2364 = vmatmul.bf16.gmra.mxu1 %v995_v5  ;;  %v384_v5 = vld [vmem:[%s5562_s17 + $0x5b0] sm:$0xff] }
  0x94   : > { %2533 = vmatmul.bf16.gmra.mxu2 %v996_v6  ;;  %v373_v6 = vld [vmem:[%s5562_s17 + $0x558] sm:$0xff]  ;;  %v1056_v10 = vpack.c.bf16 %v384_v5, %v372_v4 }
  0x95   : > { %2702 = vmatmul.bf16.gmra.mxu3 %v997_v7  ;;  %v385_v7 = vld [vmem:[%s5562_s17 + $0x5b8] sm:$0xff] }
  0x96   : > { %v1057_v11 = vpack.c.bf16 %v385_v7, %v373_v6  ;;  %v1090_v6 = vpack.c.bf16 %v454_v61, %v442_v60  ;;  %v1091_v7 = vpack.c.bf16 %v455_v63, %v443_v62  ;;  %v504_v60 = vld [vmem:[%s5562_s17 + $0x970] sm:$0xff]  ;;  %v493_v61 = vld [vmem:[%s5562_s17 + $0x918] sm:$0xff] }
  0x97   : > { %v505_v62 = vld [vmem:[%s5562_s17 + $0x978] sm:$0xff] }
  0xa2   : > { %2200 = vmatmul.bf16.gmra.mxu0 %v1006_v20  ;;  %v1066_v20 = vpack.c.bf16 %v406_v13, %v394_v12  ;;  %v1093_v12 = vpack.c.bf16 %v457_v3, %v445_v2 }
  0xa3   : > { %2369 = vmatmul.bf16.gmra.mxu1 %v1007_v21  ;;  %v1067_v21 = vpack.c.bf16 %v407_v15, %v395_v14  ;;  %v4970_v15 = vld [vmem:[#allocation5 + $0x1a0] sm:$0xff] }
  0xa4   : > { %2538 = vmatmul.bf16.gmra.mxu2 %v1008_v22 }
  0xa5   : > { %2707 = vmatmul.bf16.gmra.mxu3 %v1009_v23  ;;  %3194 = vmatpush.bf16.msrb.mxu2 %v4970_v15 }
  0xb2   : > { %2205 = vmatmul.bf16.gmra.mxu0 %v1018_v32 }
  0xb3   : > { %2374 = vmatmul.bf16.gmra.mxu1 %v1019_v33 }
  0xb4   : > { %2543 = vmatmul.bf16.gmra.mxu2 %v1020_v34  ;;  %v418_v34 = vld [vmem:[%s5562_s17 + $0x6c0] sm:$0xff] }
  0xb5   : > { %2712 = vmatmul.bf16.gmra.mxu3 %v1021_v35  ;;  %v430_v35 = vld [vmem:[%s5562_s17 + $0x720] sm:$0xff] }
  0xc2   : > { %2210 = vmatmul.bf16.gmra.mxu0 %v1030_v44  ;;  %v1078_v44 = vpack.c.bf16 %v430_v35, %v418_v34  ;;  %v481_v34 = vld [vmem:[%s5562_s17 + $0x8b8] sm:$0xff] }
  0xc3   : > { %2379 = vmatmul.bf16.gmra.mxu1 %v1031_v45  ;;  %v1079_v45 = vpack.c.bf16 %v431_v37, %v419_v36 }
  0xc4   : > { %2548 = vmatmul.bf16.gmra.mxu2 %v1032_v46 }
  0xc5   : > { %2717 = vmatmul.bf16.gmra.mxu3 %v1033_v47 }
  0xd2   : > { %2215 = vmatmul.bf16.gmra.mxu0 %v1042_v56 }
  0xd3   : > { %2384 = vmatmul.bf16.gmra.mxu1 %v1043_v57 }
  0xd4   : > { %2553 = vmatmul.bf16.gmra.mxu2 %v1044_v58 }
  0xd5   : > { %2722 = vmatmul.bf16.gmra.mxu3 %v1045_v59 }
  0xe2   : > { %2220 = vmatmul.bf16.gmra.mxu0 %v1054_v8 }
  0xe3   : > { %2389 = vmatmul.bf16.gmra.mxu1 %v1055_v9 }
  0xe4   : > { %2558 = vmatmul.bf16.gmra.mxu2 %v1056_v10 }
  0xe5   : > { %2727 = vmatmul.bf16.gmra.mxu3 %v1057_v11  ;;  %v1092_v11 = vpack.c.bf16 %v456_v1, %v444_v0 }
  0xef   : > { %v2186_v22 = vpop.f32.mrf.mxu0 }
  0xf0   : > { %v2355_v23 = vpop.f32.mrf.mxu1 }
  0xf1   : > { %v2356_v26 = vadd.f32 %v2355_v23, %v2186_v22 }
  0xf2   : > { %2225 = vmatmul.bf16.gmra.mxu0 %v1066_v20 }
  0xf3   : > { %2394 = vmatmul.bf16.gmra.mxu1 %v1067_v21 }
  0xf4   : > { %2563 = vmatmul.bf16.gmra.mxu2 %v1068_v24 }
  0xf5   : > { %2732 = vmatmul.bf16.gmra.mxu3 %v1069_v25  ;;  %v4962_v25 = vld [vmem:[#allocation5 + $0x160] sm:$0xff] }
  0xf6   : > { %3025 = vmatpush.bf16.msrb.mxu1 %v4962_v25  ;;  %v517_v25 = vld [vmem:[%s5562_s17 + $0x9d8] sm:$0xff] }
  0xf7   : > { %v2524_v27 = vpop.f32.mrf.mxu2  ;;  %v2188_v30 = vpop.f32.mrf.mxu0 }
  0xf8   : > { %v2693_v28 = vpop.f32.mrf.mxu3  ;;  %v2525_v29 = vadd.f32 %v2524_v27, %v2356_v26  ;;  %v2357_v31 = vpop.f32.mrf.mxu1  ;;  %v466_v26 = vld [vmem:[%s5562_s17 + $0x840] sm:$0xff] }
  0xf9   : > { %v2358_v32 = vadd.f32 %v2357_v31, %v2188_v30  ;;  %v478_v27 = vld [vmem:[%s5562_s17 + $0x8a0] sm:$0xff]  ;;  %v468_v30 = vld [vmem:[%s5562_s17 + $0x850] sm:$0xff] }
  0xfa   : > { %v5644_v33 = vadd.f32 %v2693_v28, %v2525_v29  ;;  %v467_v28 = vld [vmem:[%s5562_s17 + $0x848] sm:$0xff]  ;;  %v480_v31 = vld [vmem:[%s5562_s17 + $0x8b0] sm:$0xff]  ;;  %v1102_v37 = vpack.c.bf16 %v478_v27, %v466_v26  ;;  %v529_v26 = vld [vmem:[%s5562_s17 + $0xa38] sm:$0xff] }
  0xfb   : > { %v479_v29 = vld [vmem:[%s5562_s17 + $0x8a8] sm:$0xff] }
  0xfc   : > { %v1103_v38 = vpack.c.bf16 %v479_v29, %v467_v28 }
  0xff   : > { %v2526_v42 = vpop.f32.mrf.mxu2  ;;  %v2191_v47 = vpop.f32.mrf.mxu0 }
 0x100   : > { %v2695_v43 = vpop.f32.mrf.mxu3  ;;  %v2527_v46 = vadd.f32 %v2526_v42, %v2358_v32  ;;  %v2360_v48 = vpop.f32.mrf.mxu1  ;;  %v469_v32 = vld [vmem:[%s5562_s17 + $0x858] sm:$0xff]  ;;  %v1104_v42 = vpack.c.bf16 %v480_v31, %v468_v30 }
 0x101   : > { %v2361_v51 = vadd.f32 %v2360_v48, %v2191_v47 }
 0x102   : > { %v5654_v52 = vadd.f32 %v2695_v43, %v2527_v46  ;;  %2230 = vmatmul.bf16.gmra.mxu0 %v1078_v44  ;;  %v1105_v43 = vpack.c.bf16 %v481_v34, %v469_v32 }
 0x103   : > { %2399 = vmatmul.bf16.gmra.mxu1 %v1079_v45 }
 0x104   : > { %2568 = vmatmul.bf16.gmra.mxu2 %v1080_v49 }
 0x105   : > { %2737 = vmatmul.bf16.gmra.mxu3 %v1081_v50 }
 0x107   : > { %v2529_v53 = vpop.f32.mrf.mxu2  ;;  %v2193_v56 = vpop.f32.mrf.mxu0 }
 0x108   : > { %v2698_v54 = vpop.f32.mrf.mxu3  ;;  %v2530_v55 = vadd.f32 %v2529_v53, %v2361_v51  ;;  %v2362_v57 = vpop.f32.mrf.mxu1 }
 0x109   : > { %v2363_v58 = vadd.f32 %v2362_v57, %v2193_v56  ;;  %v491_v56 = vld [vmem:[%s5562_s17 + $0x908] sm:$0xff] }
 0x10a   : > { %v5656_v59 = vadd.f32 %v2698_v54, %v2530_v55  ;;  %v490_v54 = vld [vmem:[%s5562_s17 + $0x900] sm:$0xff]  ;;  %v503_v57 = vld [vmem:[%s5562_s17 + $0x968] sm:$0xff] }
 0x10b   : > { %v502_v55 = vld [vmem:[%s5562_s17 + $0x960] sm:$0xff]  ;;  %v1115_v2 = vpack.c.bf16 %v503_v57, %v491_v56  ;;  %v553_v56 = vld [vmem:[%s5562_s17 + $0xaf8] sm:$0xff] }
 0x10c   : > { %v1114_v1 = vpack.c.bf16 %v502_v55, %v490_v54  ;;  %v552_v54 = vld [vmem:[%s5562_s17 + $0xaf0] sm:$0xff]  ;;  %v541_v55 = vld [vmem:[%s5562_s17 + $0xa98] sm:$0xff] }
 0x10f   : > { %v2531_v4 = vpop.f32.mrf.mxu2  ;;  %v2196_v9 = vpop.f32.mrf.mxu0 }
 0x110   : > { %v2700_v5 = vpop.f32.mrf.mxu3  ;;  %v2532_v8 = vadd.f32 %v2531_v4, %v2363_v58  ;;  %v2365_v10 = vpop.f32.mrf.mxu1  ;;  %v492_v58 = vld [vmem:[%s5562_s17 + $0x910] sm:$0xff] }
 0x111   : > { %v2366_v13 = vadd.f32 %v2365_v10, %v2196_v9 }
 0x112   : > { %v5666_v14 = vadd.f32 %v2700_v5, %v2532_v8  ;;  %2235 = vmatmul.bf16.gmra.mxu0 %v1090_v6  ;;  %v1116_v6 = vpack.c.bf16 %v504_v60, %v492_v58 }
 0x113   : > { %2404 = vmatmul.bf16.gmra.mxu1 %v1091_v7  ;;  %v1117_v7 = vpack.c.bf16 %v505_v62, %v493_v61 }
 0x114   : > { %2573 = vmatmul.bf16.gmra.mxu2 %v1092_v11 }
 0x115   : > { %2742 = vmatmul.bf16.gmra.mxu3 %v1093_v12 }
 0x117   : > { %v2534_v18 = vpop.f32.mrf.mxu2  ;;  %v2198_v21 = vpop.f32.mrf.mxu0 }
 0x118   : > { %v2703_v19 = vpop.f32.mrf.mxu3  ;;  %v2535_v20 = vadd.f32 %v2534_v18, %v2366_v13  ;;  %v2367_v22 = vpop.f32.mrf.mxu1  ;;  %v514_v18 = vld [vmem:[%s5562_s17 + $0x9c0] sm:$0xff] }
 0x119   : > { %v2368_v23 = vadd.f32 %v2367_v22, %v2198_v21  ;;  %v527_v21 = vld [vmem:[%s5562_s17 + $0xa28] sm:$0xff]  ;;  %v516_v22 = vld [vmem:[%s5562_s17 + $0x9d0] sm:$0xff] }
 0x11a   : > { %v5668_v24 = vadd.f32 %v2703_v19, %v2535_v20  ;;  %v526_v19 = vld [vmem:[%s5562_s17 + $0xa20] sm:$0xff]  ;;  %v515_v20 = vld [vmem:[%s5562_s17 + $0x9c8] sm:$0xff] }
 0x11b   : > { %v1126_v29 = vpack.c.bf16 %v526_v19, %v514_v18  ;;  %v1127_v30 = vpack.c.bf16 %v527_v21, %v515_v20  ;;  %v4961_v18 = vld [vmem:[#allocation5 + $0x158] sm:$0xff]  ;;  %v562_v19 = vld [vmem:[%s5562_s17 + $0xb40] sm:$0xff]  ;;  %v563_v21 = vld [vmem:[%s5562_s17 + $0xb48] sm:$0xff] }
 0x11c   : > { %v574_v20 = vld [vmem:[%s5562_s17 + $0xba0] sm:$0xff]  ;;  %3026 = vmatpush.bf16.msrb.mxu1 %v4961_v18 }
 0x11f   : > { %v2536_v35 = vpop.f32.mrf.mxu2  ;;  %v2201_v40 = vpop.f32.mrf.mxu0 }
 0x120   : > { %v2705_v36 = vpop.f32.mrf.mxu3  ;;  %v2537_v39 = vadd.f32 %v2536_v35, %v2368_v23  ;;  %v2370_v41 = vpop.f32.mrf.mxu1  ;;  %v528_v23 = vld [vmem:[%s5562_s17 + $0xa30] sm:$0xff] }
 0x121   : > { %v2371_v44 = vadd.f32 %v2370_v41, %v2201_v40  ;;  %v1128_v35 = vpack.c.bf16 %v528_v23, %v516_v22  ;;  %v575_v22 = vld [vmem:[%s5562_s17 + $0xba8] sm:$0xff]  ;;  %v564_v23 = vld [vmem:[%s5562_s17 + $0xb50] sm:$0xff] }
 0x122   : > { %v5678_v45 = vadd.f32 %v2705_v36, %v2537_v39  ;;  %2240 = vmatmul.bf16.gmra.mxu0 %v1102_v37  ;;  %v1129_v36 = vpack.c.bf16 %v529_v26, %v517_v25  ;;  %v576_v25 = vld [vmem:[%s5562_s17 + $0xbb0] sm:$0xff]  ;;  %v565_v26 = vld [vmem:[%s5562_s17 + $0xb58] sm:$0xff] }
 0x123   : > { %2409 = vmatmul.bf16.gmra.mxu1 %v1103_v38 }
 0x124   : > { %2578 = vmatmul.bf16.gmra.mxu2 %v1104_v42 }
 0x125   : > { %2747 = vmatmul.bf16.gmra.mxu3 %v1105_v43 }
 0x127   : > { %v2539_v46 = vpop.f32.mrf.mxu2  ;;  %v2203_v49 = vpop.f32.mrf.mxu0 }
 0x128   : > { %v2708_v47 = vpop.f32.mrf.mxu3  ;;  %v2540_v48 = vadd.f32 %v2539_v46, %v2371_v44  ;;  %v2372_v50 = vpop.f32.mrf.mxu1 }
 0x129   : > { %v2373_v51 = vadd.f32 %v2372_v50, %v2203_v49  ;;  %v539_v49 = vld [vmem:[%s5562_s17 + $0xa88] sm:$0xff] }
 0x12a   : > { %v5680_v53 = vadd.f32 %v2708_v47, %v2540_v48  ;;  %v538_v47 = vld [vmem:[%s5562_s17 + $0xa80] sm:$0xff]  ;;  %v551_v50 = vld [vmem:[%s5562_s17 + $0xae8] sm:$0xff] }
 0x12b   : > { %v550_v48 = vld [vmem:[%s5562_s17 + $0xae0] sm:$0xff]  ;;  %v1139_v61 = vpack.c.bf16 %v551_v50, %v539_v49 }
 0x12c   : > { %v1138_v60 = vpack.c.bf16 %v550_v48, %v538_v47  ;;  %v586_v50 = vld [vmem:[%s5562_s17 + $0xc00] sm:$0xff] }
 0x12f   : > { %v2541_v63 = vpop.f32.mrf.mxu2  ;;  %v2206_v4 = vpop.f32.mrf.mxu0 }
 0x130   : > { %v2710_v0 = vpop.f32.mrf.mxu3  ;;  %v2542_v3 = vadd.f32 %v2541_v63, %v2373_v51  ;;  %v2375_v5 = vpop.f32.mrf.mxu1  ;;  %v540_v51 = vld [vmem:[%s5562_s17 + $0xa90] sm:$0xff] }
 0x131   : > { %v2376_v8 = vadd.f32 %v2375_v5, %v2206_v4  ;;  %v4969_v5 = vld [vmem:[#allocation5 + $0x198] sm:$0xff] }
 0x132   : > { %v5690_v9 = vadd.f32 %v2710_v0, %v2542_v3  ;;  %2245 = vmatmul.bf16.gmra.mxu0 %v1114_v1  ;;  %v1140_v1 = vpack.c.bf16 %v552_v54, %v540_v51  ;;  %3195 = vmatpush.bf16.msrb.mxu2 %v4969_v5  ;;  %v598_v51 = vld [vmem:[%s5562_s17 + $0xc60] sm:$0xff]  ;;  %v587_v54 = vld [vmem:[%s5562_s17 + $0xc08] sm:$0xff] }
 0x133   : > { %2414 = vmatmul.bf16.gmra.mxu1 %v1115_v2  ;;  %v1141_v2 = vpack.c.bf16 %v553_v56, %v541_v55  ;;  %v599_v55 = vld [vmem:[%s5562_s17 + $0xc68] sm:$0xff]  ;;  %v588_v56 = vld [vmem:[%s5562_s17 + $0xc10] sm:$0xff] }
 0x134   : > { %2583 = vmatmul.bf16.gmra.mxu2 %v1116_v6  ;;  %v4953_v6 = vld [vmem:[#allocation5 + $0x118] sm:$0xff] }
 0x135   : > { %2752 = vmatmul.bf16.gmra.mxu3 %v1117_v7  ;;  %v4977_v7 = vld [vmem:[#allocation5 + $0x1d8] sm:$0xff]  ;;  %2857 = vmatpush.bf16.msrb.mxu0 %v4953_v6 }
 0x136   : > { %3364 = vmatpush.bf16.msrb.mxu3 %v4977_v7 }
 0x137   : > { %v2544_v10 = vpop.f32.mrf.mxu2  ;;  %v2208_v13 = vpop.f32.mrf.mxu0 }
 0x138   : > { %v2713_v11 = vpop.f32.mrf.mxu3  ;;  %v2545_v12 = vadd.f32 %v2544_v10, %v2376_v8  ;;  %v2377_v15 = vpop.f32.mrf.mxu1 }
 0x139   : > { %v2378_v16 = vadd.f32 %v2377_v15, %v2208_v13 }
 0x13a   : > { %v5692_v17 = vadd.f32 %v2713_v11, %v2545_v12 }
 0x13f   : > { %v2546_v27 = vpop.f32.mrf.mxu2  ;;  %v2211_v32 = vpop.f32.mrf.mxu0 }
 0x140   : > { %v2715_v28 = vpop.f32.mrf.mxu3  ;;  %v2547_v31 = vadd.f32 %v2546_v27, %v2378_v16  ;;  %v2380_v34 = vpop.f32.mrf.mxu1  ;;  %v577_v27 = vld [vmem:[%s5562_s17 + $0xbb8] sm:$0xff] }
 0x141   : > { %v2381_v37 = vadd.f32 %v2380_v34, %v2211_v32 }
 0x142   : > { %v5702_v38 = vadd.f32 %v2715_v28, %v2547_v31  ;;  %2250 = vmatmul.bf16.gmra.mxu0 %v1126_v29  ;;  %v1151_v31 = vpack.c.bf16 %v575_v22, %v563_v21  ;;  %v622_v21 = vld [vmem:[%s5562_s17 + $0xd20] sm:$0xff]  ;;  %v611_v22 = vld [vmem:[%s5562_s17 + $0xcc8] sm:$0xff] }
 0x143   : > { %2419 = vmatmul.bf16.gmra.mxu1 %v1127_v30  ;;  %v1150_v30 = vpack.c.bf16 %v574_v20, %v562_v19  ;;  %v610_v20 = vld [vmem:[%s5562_s17 + $0xcc0] sm:$0xff] }
 0x144   : > { %2588 = vmatmul.bf16.gmra.mxu2 %v1128_v35 }
 0x145   : > { %2757 = vmatmul.bf16.gmra.mxu3 %v1129_v36  ;;  %v1152_v36 = vpack.c.bf16 %v576_v25, %v564_v23  ;;  %v623_v23 = vld [vmem:[%s5562_s17 + $0xd28] sm:$0xff]  ;;  %v612_v25 = vld [vmem:[%s5562_s17 + $0xcd0] sm:$0xff] }
 0x147   : > { %v2549_v39 = vpop.f32.mrf.mxu2  ;;  %v2213_v42 = vpop.f32.mrf.mxu0 }
 0x148   : > { %v2718_v40 = vpop.f32.mrf.mxu3  ;;  %v2550_v41 = vadd.f32 %v2549_v39, %v2381_v37  ;;  %v2382_v43 = vpop.f32.mrf.mxu1  ;;  %v1153_v37 = vpack.c.bf16 %v577_v27, %v565_v26  ;;  %v624_v26 = vld [vmem:[%s5562_s17 + $0xd30] sm:$0xff]  ;;  %v613_v27 = vld [vmem:[%s5562_s17 + $0xcd8] sm:$0xff] }
 0x149   : > { %v2383_v44 = vadd.f32 %v2382_v43, %v2213_v42 }
 0x14a   : > { %v5704_v46 = vadd.f32 %v2718_v40, %v2550_v41 }
 0x14f   : > { %v2551_v57 = vpop.f32.mrf.mxu2  ;;  %v2216_v63 = vpop.f32.mrf.mxu0 }
 0x150   : > { %v2720_v58 = vpop.f32.mrf.mxu3  ;;  %v2552_v62 = vadd.f32 %v2551_v57, %v2383_v44  ;;  %v2385_v0 = vpop.f32.mrf.mxu1  ;;  %v600_v57 = vld [vmem:[%s5562_s17 + $0xc70] sm:$0xff] }
 0x151   : > { %v2386_v3 = vadd.f32 %v2385_v0, %v2216_v63  ;;  %v1162_v63 = vpack.c.bf16 %v598_v51, %v586_v50  ;;  %v1163_v0 = vpack.c.bf16 %v599_v55, %v587_v54  ;;  %v1164_v5 = vpack.c.bf16 %v600_v57, %v588_v56  ;;  %v634_v55 = vld [vmem:[%s5562_s17 + $0xd80] sm:$0xff]  ;;  %v635_v57 = vld [vmem:[%s5562_s17 + $0xd88] sm:$0xff] }
 0x152   : > { %v5714_v4 = vadd.f32 %v2720_v58, %v2552_v62  ;;  %2255 = vmatmul.bf16.gmra.mxu0 %v1138_v60  ;;  %v589_v58 = vld [vmem:[%s5562_s17 + $0xc18] sm:$0xff]  ;;  %v646_v56 = vld [vmem:[%s5562_s17 + $0xde0] sm:$0xff] }
 0x153   : > { %2424 = vmatmul.bf16.gmra.mxu1 %v1139_v61  ;;  %v601_v60 = vld [vmem:[%s5562_s17 + $0xc78] sm:$0xff] }
 0x154   : > { %2593 = vmatmul.bf16.gmra.mxu2 %v1140_v1  ;;  %v1165_v6 = vpack.c.bf16 %v601_v60, %v589_v58  ;;  %v647_v58 = vld [vmem:[%s5562_s17 + $0xde8] sm:$0xff]  ;;  %v636_v60 = vld [vmem:[%s5562_s17 + $0xd90] sm:$0xff] }
 0x155   : > { %2762 = vmatmul.bf16.gmra.mxu3 %v1141_v2 }
 0x157   : > { %v2554_v8 = vpop.f32.mrf.mxu2  ;;  %v2218_v12 = vpop.f32.mrf.mxu0 }
 0x158   : > { %v2723_v10 = vpop.f32.mrf.mxu3  ;;  %v2555_v11 = vadd.f32 %v2554_v8, %v2386_v3  ;;  %v2387_v13 = vpop.f32.mrf.mxu1 }
 0x159   : > { %v2388_v15 = vadd.f32 %v2387_v13, %v2218_v12 }
 0x15a   : > { %v5716_v16 = vadd.f32 %v2723_v10, %v2555_v11 }
 0x15f   : > { %v2556_v28 = vpop.f32.mrf.mxu2  ;;  %v2221_v34 = vpop.f32.mrf.mxu0 }
 0x160   : > { %v2725_v29 = vpop.f32.mrf.mxu3  ;;  %v2557_v32 = vadd.f32 %v2556_v28, %v2388_v15  ;;  %v2390_v35 = vpop.f32.mrf.mxu1  ;;  %v625_v28 = vld [vmem:[%s5562_s17 + $0xd38] sm:$0xff] }
 0x161   : > { %v2391_v39 = vadd.f32 %v2390_v35, %v2221_v34 }
 0x162   : > { %v5726_v40 = vadd.f32 %v2725_v29, %v2557_v32  ;;  %2260 = vmatmul.bf16.gmra.mxu0 %v1150_v30  ;;  %v1175_v32 = vpack.c.bf16 %v623_v23, %v611_v22 }
 0x163   : > { %2429 = vmatmul.bf16.gmra.mxu1 %v1151_v31  ;;  %v1174_v31 = vpack.c.bf16 %v622_v21, %v610_v20  ;;  %v4976_v20 = vld [vmem:[#allocation5 + $0x1d0] sm:$0xff] }
 0x164   : > { %2598 = vmatmul.bf16.gmra.mxu2 %v1152_v36  ;;  %3365 = vmatpush.bf16.msrb.mxu3 %v4976_v20 }
 0x165   : > { %2767 = vmatmul.bf16.gmra.mxu3 %v1153_v37  ;;  %v1176_v37 = vpack.c.bf16 %v624_v26, %v612_v25 }
 0x167   : > { %v2559_v41 = vpop.f32.mrf.mxu2  ;;  %v2223_v44 = vpop.f32.mrf.mxu0 }
 0x168   : > { %v2728_v42 = vpop.f32.mrf.mxu3  ;;  %v2560_v43 = vadd.f32 %v2559_v41, %v2391_v39  ;;  %v2392_v47 = vpop.f32.mrf.mxu1  ;;  %v1177_v39 = vpack.c.bf16 %v625_v28, %v613_v27 }
 0x169   : > { %v2393_v48 = vadd.f32 %v2392_v47, %v2223_v44 }
 0x16a   : > { %v5728_v49 = vadd.f32 %v2728_v42, %v2560_v43 }
 0x16f   : > { %v2561_v61 = vpop.f32.mrf.mxu2  ;;  %v2226_v2 = vpop.f32.mrf.mxu0 }
 0x170   : > { %v2730_v62 = vpop.f32.mrf.mxu3  ;;  %v2562_v1 = vadd.f32 %v2561_v61, %v2393_v48  ;;  %v2395_v3 = vpop.f32.mrf.mxu1  ;;  %v648_v61 = vld [vmem:[%s5562_s17 + $0xdf0] sm:$0xff] }
 0x171   : > { %v2396_v7 = vadd.f32 %v2395_v3, %v2226_v2  ;;  %v1186_v2 = vpack.c.bf16 %v646_v56, %v634_v55  ;;  %v1187_v3 = vpack.c.bf16 %v647_v58, %v635_v57 }
 0x172   : > { %v5738_v8 = vadd.f32 %v2730_v62, %v2562_v1  ;;  %2265 = vmatmul.bf16.gmra.mxu0 %v1162_v63  ;;  %v637_v62 = vld [vmem:[%s5562_s17 + $0xd98] sm:$0xff] }
 0x173   : > { %2434 = vmatmul.bf16.gmra.mxu1 %v1163_v0  ;;  %v649_v63 = vld [vmem:[%s5562_s17 + $0xdf8] sm:$0xff] }
 0x174   : > { %2603 = vmatmul.bf16.gmra.mxu2 %v1164_v5 }
 0x175   : > { %2772 = vmatmul.bf16.gmra.mxu3 %v1165_v6 }
 0x177   : > { %v2564_v10 = vpop.f32.mrf.mxu2  ;;  %v2228_v13 = vpop.f32.mrf.mxu0 }
 0x178   : > { %v2733_v11 = vpop.f32.mrf.mxu3  ;;  %v2565_v12 = vadd.f32 %v2564_v10, %v2396_v7  ;;  %v2397_v15 = vpop.f32.mrf.mxu1  ;;  %v1188_v10 = vpack.c.bf16 %v648_v61, %v636_v60 }
 0x179   : > { %v2398_v18 = vadd.f32 %v2397_v15, %v2228_v13  ;;  %v4968_v15 = vld [vmem:[#allocation5 + $0x190] sm:$0xff] }
 0x17a   : > { %v5740_v19 = vadd.f32 %v2733_v11, %v2565_v12  ;;  %v1189_v11 = vpack.c.bf16 %v649_v63, %v637_v62  ;;  %3196 = vmatpush.bf16.msrb.mxu2 %v4968_v15  ;;  %v697_v15 = vld [vmem:[%s5562_s17 + $0xf78] sm:$0xff] }
 0x17f   : > { %v2566_v29 = vpop.f32.mrf.mxu2  ;;  %v2231_v35 = vpop.f32.mrf.mxu0 }
 0x180   : > { %v2735_v30 = vpop.f32.mrf.mxu3  ;;  %v2567_v34 = vadd.f32 %v2566_v29, %v2398_v18  ;;  %v2400_v36 = vpop.f32.mrf.mxu1  ;;  %v4952_v18 = vld [vmem:[#allocation5 + $0x110] sm:$0xff] }
 0x181   : > { %v2401_v41 = vadd.f32 %v2400_v36, %v2231_v35  ;;  %2858 = vmatpush.bf16.msrb.mxu0 %v4952_v18  ;;  %v4960_v29 = vld [vmem:[#allocation5 + $0x150] sm:$0xff] }
 0x182   : > { %v5750_v42 = vadd.f32 %v2735_v30, %v2567_v34  ;;  %2270 = vmatmul.bf16.gmra.mxu0 %v1174_v31  ;;  %v658_v30 = vld [vmem:[%s5562_s17 + $0xe40] sm:$0xff]  ;;  %v671_v34 = vld [vmem:[%s5562_s17 + $0xea8] sm:$0xff]  ;;  %v660_v35 = vld [vmem:[%s5562_s17 + $0xe50] sm:$0xff]  ;;  %3027 = vmatpush.bf16.msrb.mxu1 %v4960_v29 }
 0x183   : > { %2439 = vmatmul.bf16.gmra.mxu1 %v1175_v32  ;;  %v670_v31 = vld [vmem:[%s5562_s17 + $0xea0] sm:$0xff]  ;;  %v659_v32 = vld [vmem:[%s5562_s17 + $0xe48] sm:$0xff]  ;;  %v672_v36 = vld [vmem:[%s5562_s17 + $0xeb0] sm:$0xff] }
 0x184   : > { %2608 = vmatmul.bf16.gmra.mxu2 %v1176_v37  ;;  %v661_v37 = vld [vmem:[%s5562_s17 + $0xe58] sm:$0xff]  ;;  %v1200_v55 = vpack.c.bf16 %v672_v36, %v660_v35 }
 0x185   : > { %2777 = vmatmul.bf16.gmra.mxu3 %v1177_v39  ;;  %v673_v39 = vld [vmem:[%s5562_s17 + $0xeb8] sm:$0xff] }
 0x186   : > { %v1201_v56 = vpack.c.bf16 %v673_v39, %v661_v37 }
 0x187   : > { %v2569_v43 = vpop.f32.mrf.mxu2  ;;  %v2233_v48 = vpop.f32.mrf.mxu0 }
 0x188   : > { %v2738_v44 = vpop.f32.mrf.mxu3  ;;  %v2570_v47 = vadd.f32 %v2569_v43, %v2401_v41  ;;  %v2402_v50 = vpop.f32.mrf.mxu1 }
 0x189   : > { %v2403_v51 = vadd.f32 %v2402_v50, %v2233_v48 }
 0x18a   : > { %v5752_v54 = vadd.f32 %v2738_v44, %v2570_v47  ;;  %v1198_v44 = vpack.c.bf16 %v670_v31, %v658_v30  ;;  %v1199_v47 = vpack.c.bf16 %v671_v34, %v659_v32 }
 0x18f   : > { %v2571_v0 = vpop.f32.mrf.mxu2  ;;  %v2236_v6 = vpop.f32.mrf.mxu0 }
 0x190   : > { %v2740_v1 = vpop.f32.mrf.mxu3  ;;  %v2572_v5 = vadd.f32 %v2571_v0, %v2403_v51  ;;  %v2405_v7 = vpop.f32.mrf.mxu1 }
 0x191   : > { %v2406_v12 = vadd.f32 %v2405_v7, %v2236_v6  ;;  %v683_v6 = vld [vmem:[%s5562_s17 + $0xf08] sm:$0xff] }
 0x192   : > { %v5762_v13 = vadd.f32 %v2740_v1, %v2572_v5  ;;  %2275 = vmatmul.bf16.gmra.mxu0 %v1186_v2  ;;  %v694_v5 = vld [vmem:[%s5562_s17 + $0xf60] sm:$0xff]  ;;  %v695_v7 = vld [vmem:[%s5562_s17 + $0xf68] sm:$0xff] }
 0x193   : > { %2444 = vmatmul.bf16.gmra.mxu1 %v1187_v3  ;;  %v682_v3 = vld [vmem:[%s5562_s17 + $0xf00] sm:$0xff] }
 0x194   : > { %2613 = vmatmul.bf16.gmra.mxu2 %v1188_v10  ;;  %v684_v10 = vld [vmem:[%s5562_s17 + $0xf10] sm:$0xff] }
 0x195   : > { %2782 = vmatmul.bf16.gmra.mxu3 %v1189_v11  ;;  %v696_v11 = vld [vmem:[%s5562_s17 + $0xf70] sm:$0xff] }
 0x197   : > { %v2574_v21 = vpop.f32.mrf.mxu2  ;;  %v2238_v25 = vpop.f32.mrf.mxu0 }
 0x198   : > { %v2743_v22 = vpop.f32.mrf.mxu3  ;;  %v2575_v23 = vadd.f32 %v2574_v21, %v2406_v12  ;;  %v2407_v26 = vpop.f32.mrf.mxu1  ;;  %v685_v12 = vld [vmem:[%s5562_s17 + $0xf18] sm:$0xff]  ;;  %v1210_v21 = vpack.c.bf16 %v694_v5, %v682_v3 }
 0x199   : > { %v2408_v27 = vadd.f32 %v2407_v26, %v2238_v25  ;;  %v1213_v29 = vpack.c.bf16 %v697_v15, %v685_v12 }
 0x19a   : > { %v5764_v28 = vadd.f32 %v2743_v22, %v2575_v23  ;;  %v1211_v22 = vpack.c.bf16 %v695_v7, %v683_v6 }
 0x19f   : > { %v2576_v41 = vpop.f32.mrf.mxu2  ;;  %v2241_v50 = vpop.f32.mrf.mxu0 }
 0x1a0   : > { %v2745_v43 = vpop.f32.mrf.mxu3  ;;  %v2577_v48 = vadd.f32 %v2576_v41, %v2408_v27  ;;  %v2410_v51 = vpop.f32.mrf.mxu1  ;;  %v1212_v27 = vpack.c.bf16 %v696_v11, %v684_v10 }
 0x1a1   : > { %v2411_v57 = vadd.f32 %v2410_v51, %v2241_v50  ;;  %v708_v50 = vld [vmem:[%s5562_s17 + $0xfd0] sm:$0xff] }
 0x1a2   : > { %v5774_v58 = vadd.f32 %v2745_v43, %v2577_v48  ;;  %2280 = vmatmul.bf16.gmra.mxu0 %v1198_v44  ;;  %v706_v43 = vld [vmem:[%s5562_s17 + $0xfc0] sm:$0xff]  ;;  %v719_v48 = vld [vmem:[%s5562_s17 + $0x1028] sm:$0xff]  ;;  %v720_v51 = vld [vmem:[%s5562_s17 + $0x1030] sm:$0xff] }
 0x1a3   : > { %2449 = vmatmul.bf16.gmra.mxu1 %v1199_v47  ;;  %v718_v44 = vld [vmem:[%s5562_s17 + $0x1020] sm:$0xff]  ;;  %v707_v47 = vld [vmem:[%s5562_s17 + $0xfc8] sm:$0xff]  ;;  %v1224_v3 = vpack.c.bf16 %v720_v51, %v708_v50 }
 0x1a4   : > { %2618 = vmatmul.bf16.gmra.mxu2 %v1200_v55  ;;  %v709_v55 = vld [vmem:[%s5562_s17 + $0xfd8] sm:$0xff] }
 0x1a5   : > { %2787 = vmatmul.bf16.gmra.mxu3 %v1201_v56  ;;  %v721_v56 = vld [vmem:[%s5562_s17 + $0x1038] sm:$0xff] }
 0x1a6   : > { %v1225_v5 = vpack.c.bf16 %v721_v56, %v709_v55  ;;  %v4967_v55 = vld [vmem:[#allocation5 + $0x188] sm:$0xff] }
 0x1a7   : > { %v2579_v60 = vpop.f32.mrf.mxu2  ;;  %v2243_v63 = vpop.f32.mrf.mxu0  ;;  %v4951_v56 = vld [vmem:[#allocation5 + $0x108] sm:$0xff]  ;;  %3197 = vmatpush.bf16.msrb.mxu2 %v4967_v55 }
 0x1a8   : > { %v2748_v61 = vpop.f32.mrf.mxu3  ;;  %v2580_v62 = vadd.f32 %v2579_v60, %v2411_v57  ;;  %v2412_v0 = vpop.f32.mrf.mxu1  ;;  %2859 = vmatpush.bf16.msrb.mxu0 %v4951_v56  ;;  %v778_v56 = vld [vmem:[%s5562_s17 + $0x1200] sm:$0xff] }
 0x1a9   : > { %v2413_v1 = vadd.f32 %v2412_v0, %v2243_v63 }
 0x1aa   : > { %v5776_v2 = vadd.f32 %v2748_v61, %v2580_v62  ;;  %v1222_v61 = vpack.c.bf16 %v718_v44, %v706_v43  ;;  %v1223_v62 = vpack.c.bf16 %v719_v48, %v707_v47 }
 0x1af   : > { %v2581_v18 = vpop.f32.mrf.mxu2  ;;  %v2246_v25 = vpop.f32.mrf.mxu0 }
 0x1b0   : > { %v2750_v20 = vpop.f32.mrf.mxu3  ;;  %v2582_v23 = vadd.f32 %v2581_v18, %v2413_v1  ;;  %v2415_v26 = vpop.f32.mrf.mxu1 }
 0x1b1   : > { %v2416_v30 = vadd.f32 %v2415_v26, %v2246_v25  ;;  %v731_v25 = vld [vmem:[%s5562_s17 + $0x1088] sm:$0xff] }
 0x1b2   : > { %v5786_v31 = vadd.f32 %v2750_v20, %v2582_v23  ;;  %2285 = vmatmul.bf16.gmra.mxu0 %v1210_v21  ;;  %v742_v23 = vld [vmem:[%s5562_s17 + $0x10e0] sm:$0xff]  ;;  %v743_v26 = vld [vmem:[%s5562_s17 + $0x10e8] sm:$0xff] }
 0x1b3   : > { %2454 = vmatmul.bf16.gmra.mxu1 %v1211_v22  ;;  %v730_v22 = vld [vmem:[%s5562_s17 + $0x1080] sm:$0xff] }
 0x1b4   : > { %2623 = vmatmul.bf16.gmra.mxu2 %v1212_v27  ;;  %v732_v27 = vld [vmem:[%s5562_s17 + $0x1090] sm:$0xff] }
 0x1b5   : > { %2792 = vmatmul.bf16.gmra.mxu3 %v1213_v29  ;;  %v744_v29 = vld [vmem:[%s5562_s17 + $0x10f0] sm:$0xff] }
 0x1b6   : > { %v1236_v47 = vpack.c.bf16 %v744_v29, %v732_v27 }
 0x1b7   : > { %v2584_v32 = vpop.f32.mrf.mxu2  ;;  %v2248_v36 = vpop.f32.mrf.mxu0 }
 0x1b8   : > { %v2753_v34 = vpop.f32.mrf.mxu3  ;;  %v2585_v35 = vadd.f32 %v2584_v32, %v2416_v30  ;;  %v2417_v37 = vpop.f32.mrf.mxu1  ;;  %v733_v30 = vld [vmem:[%s5562_s17 + $0x1098] sm:$0xff] }
 0x1b9   : > { %v2418_v39 = vadd.f32 %v2417_v37, %v2248_v36  ;;  %v745_v32 = vld [vmem:[%s5562_s17 + $0x10f8] sm:$0xff]  ;;  %v1234_v36 = vpack.c.bf16 %v742_v23, %v730_v22  ;;  %v1235_v37 = vpack.c.bf16 %v743_v26, %v731_v25 }
 0x1ba   : > { %v5788_v41 = vadd.f32 %v2753_v34, %v2585_v35  ;;  %v1237_v48 = vpack.c.bf16 %v745_v32, %v733_v30  ;;  %v769_v22 = vld [vmem:[%s5562_s17 + $0x11b8] sm:$0xff] }
 0x1bf   : > { %v2586_v57 = vpop.f32.mrf.mxu2  ;;  %v2251_v0 = vpop.f32.mrf.mxu0 }
 0x1c0   : > { %v2755_v60 = vpop.f32.mrf.mxu3  ;;  %v2587_v63 = vadd.f32 %v2586_v57, %v2418_v39  ;;  %v2420_v1 = vpop.f32.mrf.mxu1  ;;  %v4975_v57 = vld [vmem:[#allocation5 + $0x1c8] sm:$0xff] }
 0x1c1   : > { %v2421_v6 = vadd.f32 %v2420_v1, %v2251_v0  ;;  %3366 = vmatpush.bf16.msrb.mxu3 %v4975_v57  ;;  %v790_v57 = vld [vmem:[%s5562_s17 + $0x1260] sm:$0xff] }
 0x1c2   : > { %v5798_v7 = vadd.f32 %v2755_v60, %v2587_v63  ;;  %2290 = vmatmul.bf16.gmra.mxu0 %v1222_v61 }
 0x1c3   : > { %2459 = vmatmul.bf16.gmra.mxu1 %v1223_v62 }
 0x1c4   : > { %2628 = vmatmul.bf16.gmra.mxu2 %v1224_v3 }
 0x1c5   : > { %2797 = vmatmul.bf16.gmra.mxu3 %v1225_v5  ;;  %v4959_v5 = vld [vmem:[#allocation5 + $0x148] sm:$0xff] }
 0x1c6   : > { %3028 = vmatpush.bf16.msrb.mxu1 %v4959_v5 }
 0x1c7   : > { %v2589_v10 = vpop.f32.mrf.mxu2  ;;  %v2253_v15 = vpop.f32.mrf.mxu0 }
 0x1c8   : > { %v2758_v11 = vpop.f32.mrf.mxu3  ;;  %v2590_v12 = vadd.f32 %v2589_v10, %v2421_v6  ;;  %v2422_v18 = vpop.f32.mrf.mxu1  ;;  %v754_v6 = vld [vmem:[%s5562_s17 + $0x1140] sm:$0xff] }
 0x1c9   : > { %v2423_v20 = vadd.f32 %v2422_v18, %v2253_v15  ;;  %v766_v10 = vld [vmem:[%s5562_s17 + $0x11a0] sm:$0xff]  ;;  %v756_v15 = vld [vmem:[%s5562_s17 + $0x1150] sm:$0xff] }
 0x1ca   : > { %v5800_v21 = vadd.f32 %v2758_v11, %v2590_v12  ;;  %v755_v11 = vld [vmem:[%s5562_s17 + $0x1148] sm:$0xff]  ;;  %v768_v18 = vld [vmem:[%s5562_s17 + $0x11b0] sm:$0xff]  ;;  %v1246_v26 = vpack.c.bf16 %v766_v10, %v754_v6  ;;  %v1258_v10 = vpack.c.bf16 %v790_v57, %v778_v56  ;;  %v817_v56 = vld [vmem:[%s5562_s17 + $0x1338] sm:$0xff] }
 0x1cb   : > { %v767_v12 = vld [vmem:[%s5562_s17 + $0x11a8] sm:$0xff] }
 0x1cc   : > { %v1247_v27 = vpack.c.bf16 %v767_v12, %v755_v11 }
 0x1cf   : > { %v2591_v34 = vpop.f32.mrf.mxu2  ;;  %v2256_v43 = vpop.f32.mrf.mxu0 }
 0x1d0   : > { %v2760_v35 = vpop.f32.mrf.mxu3  ;;  %v2592_v39 = vadd.f32 %v2591_v34, %v2423_v20  ;;  %v2425_v44 = vpop.f32.mrf.mxu1  ;;  %v757_v20 = vld [vmem:[%s5562_s17 + $0x1158] sm:$0xff]  ;;  %v1248_v34 = vpack.c.bf16 %v768_v18, %v756_v15 }
 0x1d1   : > { %v2426_v50 = vadd.f32 %v2425_v44, %v2256_v43 }
 0x1d2   : > { %v5810_v51 = vadd.f32 %v2760_v35, %v2592_v39  ;;  %2295 = vmatmul.bf16.gmra.mxu0 %v1234_v36  ;;  %v1249_v35 = vpack.c.bf16 %v769_v22, %v757_v20 }
 0x1d3   : > { %2464 = vmatmul.bf16.gmra.mxu1 %v1235_v37 }
 0x1d4   : > { %2633 = vmatmul.bf16.gmra.mxu2 %v1236_v47 }
 0x1d5   : > { %2802 = vmatmul.bf16.gmra.mxu3 %v1237_v48 }
 0x1d7   : > { %v2594_v60 = vpop.f32.mrf.mxu2  ;;  %v2258_v63 = vpop.f32.mrf.mxu0 }
 0x1d8   : > { %v2763_v61 = vpop.f32.mrf.mxu3  ;;  %v2595_v62 = vadd.f32 %v2594_v60, %v2426_v50  ;;  %v2427_v0 = vpop.f32.mrf.mxu1  ;;  %v779_v60 = vld [vmem:[%s5562_s17 + $0x1208] sm:$0xff] }
 0x1d9   : > { %v2428_v1 = vadd.f32 %v2427_v0, %v2258_v63  ;;  %v792_v63 = vld [vmem:[%s5562_s17 + $0x1270] sm:$0xff]  ;;  %v781_v0 = vld [vmem:[%s5562_s17 + $0x1218] sm:$0xff] }
 0x1da   : > { %v5812_v3 = vadd.f32 %v2763_v61, %v2595_v62  ;;  %v791_v61 = vld [vmem:[%s5562_s17 + $0x1268] sm:$0xff]  ;;  %v780_v62 = vld [vmem:[%s5562_s17 + $0x1210] sm:$0xff] }
 0x1db   : > { %v1259_v11 = vpack.c.bf16 %v791_v61, %v779_v60  ;;  %v1260_v20 = vpack.c.bf16 %v792_v63, %v780_v62 }
 0x1df   : > { %v2596_v23 = vpop.f32.mrf.mxu2  ;;  %v2261_v30 = vpop.f32.mrf.mxu0 }
 0x1e0   : > { %v2765_v25 = vpop.f32.mrf.mxu3  ;;  %v2597_v29 = vadd.f32 %v2596_v23, %v2428_v1  ;;  %v2430_v32 = vpop.f32.mrf.mxu1  ;;  %v793_v1 = vld [vmem:[%s5562_s17 + $0x1278] sm:$0xff] }
 0x1e1   : > { %v2431_v36 = vadd.f32 %v2430_v32, %v2261_v30  ;;  %v1261_v22 = vpack.c.bf16 %v793_v1, %v781_v0 }
 0x1e2   : > { %v5822_v37 = vadd.f32 %v2765_v25, %v2597_v29  ;;  %2300 = vmatmul.bf16.gmra.mxu0 %v1246_v26 }
 0x1e3   : > { %2469 = vmatmul.bf16.gmra.mxu1 %v1247_v27 }
 0x1e4   : > { %2638 = vmatmul.bf16.gmra.mxu2 %v1248_v34 }
 0x1e5   : > { %2807 = vmatmul.bf16.gmra.mxu3 %v1249_v35 }
 0x1e7   : > { %v2599_v39 = vpop.f32.mrf.mxu2  ;;  %v2263_v47 = vpop.f32.mrf.mxu0 }
 0x1e8   : > { %v2768_v43 = vpop.f32.mrf.mxu3  ;;  %v2600_v44 = vadd.f32 %v2599_v39, %v2431_v36  ;;  %v2432_v48 = vpop.f32.mrf.mxu1  ;;  %v802_v36 = vld [vmem:[%s5562_s17 + $0x12c0] sm:$0xff] }
 0x1e9   : > { %v2433_v50 = vadd.f32 %v2432_v48, %v2263_v47  ;;  %v814_v39 = vld [vmem:[%s5562_s17 + $0x1320] sm:$0xff]  ;;  %v804_v47 = vld [vmem:[%s5562_s17 + $0x12d0] sm:$0xff] }
 0x1ea   : > { %v5824_v55 = vadd.f32 %v2768_v43, %v2600_v44  ;;  %v803_v43 = vld [vmem:[%s5562_s17 + $0x12c8] sm:$0xff]  ;;  %v816_v48 = vld [vmem:[%s5562_s17 + $0x1330] sm:$0xff]  ;;  %v1270_v61 = vpack.c.bf16 %v814_v39, %v802_v36  ;;  %v829_v39 = vld [vmem:[%s5562_s17 + $0x1398] sm:$0xff] }
 0x1eb   : > { %v815_v44 = vld [vmem:[%s5562_s17 + $0x1328] sm:$0xff]  ;;  %v840_v36 = vld [vmem:[%s5562_s17 + $0x13f0] sm:$0xff] }
 0x1ec   : > { %v1271_v62 = vpack.c.bf16 %v815_v44, %v803_v43  ;;  %v841_v43 = vld [vmem:[%s5562_s17 + $0x13f8] sm:$0xff] }
 0x1ef   : > { %v2601_v5 = vpop.f32.mrf.mxu2  ;;  %v2266_v15 = vpop.f32.mrf.mxu0 }
 0x1f0   : > { %v2770_v6 = vpop.f32.mrf.mxu3  ;;  %v2602_v12 = vadd.f32 %v2601_v5, %v2433_v50  ;;  %v2435_v18 = vpop.f32.mrf.mxu1  ;;  %v805_v50 = vld [vmem:[%s5562_s17 + $0x12d8] sm:$0xff]  ;;  %v1272_v5 = vpack.c.bf16 %v816_v48, %v804_v47 }
 0x1f1   : > { %v2436_v23 = vadd.f32 %v2435_v18, %v2266_v15 }
 0x1f2   : > { %v5834_v25 = vadd.f32 %v2770_v6, %v2602_v12  ;;  %2305 = vmatmul.bf16.gmra.mxu0 %v1258_v10  ;;  %v1273_v6 = vpack.c.bf16 %v817_v56, %v805_v50 }
 0x1f3   : > { %2474 = vmatmul.bf16.gmra.mxu1 %v1259_v11 }
 0x1f4   : > { %2643 = vmatmul.bf16.gmra.mxu2 %v1260_v20 }
 0x1f5   : > { %2812 = vmatmul.bf16.gmra.mxu3 %v1261_v22 }
 0x1f7   : > { %v2604_v26 = vpop.f32.mrf.mxu2  ;;  %v2268_v30 = vpop.f32.mrf.mxu0 }
 0x1f8   : > { %v2773_v27 = vpop.f32.mrf.mxu3  ;;  %v2605_v29 = vadd.f32 %v2604_v26, %v2436_v23  ;;  %v2437_v32 = vpop.f32.mrf.mxu1 }
 0x1f9   : > { %v2438_v34 = vadd.f32 %v2437_v32, %v2268_v30  ;;  %v827_v30 = vld [vmem:[%s5562_s17 + $0x1388] sm:$0xff] }
 0x1fa   : > { %v5836_v35 = vadd.f32 %v2773_v27, %v2605_v29  ;;  %v826_v27 = vld [vmem:[%s5562_s17 + $0x1380] sm:$0xff]  ;;  %v839_v32 = vld [vmem:[%s5562_s17 + $0x13e8] sm:$0xff] }
 0x1fb   : > { %v838_v29 = vld [vmem:[%s5562_s17 + $0x13e0] sm:$0xff]  ;;  %v1283_v50 = vpack.c.bf16 %v839_v32, %v827_v30  ;;  %v851_v32 = vld [vmem:[%s5562_s17 + $0x1448] sm:$0xff] }
 0x1fc   : > { %v1282_v48 = vpack.c.bf16 %v838_v29, %v826_v27  ;;  %v4958_v27 = vld [vmem:[#allocation5 + $0x140] sm:$0xff] }
 0x1fd   : > { %v850_v29 = vld [vmem:[%s5562_s17 + $0x1440] sm:$0xff]  ;;  %3029 = vmatpush.bf16.msrb.mxu1 %v4958_v27 }
 0x1fe   : > { %v862_v30 = vld [vmem:[%s5562_s17 + $0x14a0] sm:$0xff] }
 0x1ff   : > { %v2606_v57 = vpop.f32.mrf.mxu2  ;;  %v2271_v0 = vpop.f32.mrf.mxu0  ;;  %v874_v27 = vld [vmem:[%s5562_s17 + $0x1500] sm:$0xff] }
 0x200   : > { %v2775_v60 = vpop.f32.mrf.mxu3  ;;  %v2607_v63 = vadd.f32 %v2606_v57, %v2438_v34  ;;  %v2440_v1 = vpop.f32.mrf.mxu1  ;;  %v828_v34 = vld [vmem:[%s5562_s17 + $0x1390] sm:$0xff] }
 0x201   : > { %v2441_v10 = vadd.f32 %v2440_v1, %v2271_v0  ;;  %v4966_v1 = vld [vmem:[#allocation5 + $0x180] sm:$0xff] }
 0x202   : > { %v5846_v11 = vadd.f32 %v2775_v60, %v2607_v63  ;;  %2310 = vmatmul.bf16.gmra.mxu0 %v1270_v61  ;;  %v1284_v61 = vpack.c.bf16 %v840_v36, %v828_v34  ;;  %3198 = vmatpush.bf16.msrb.mxu2 %v4966_v1  ;;  %v863_v34 = vld [vmem:[%s5562_s17 + $0x14a8] sm:$0xff]  ;;  %v852_v36 = vld [vmem:[%s5562_s17 + $0x1450] sm:$0xff] }
 0x203   : > { %2479 = vmatmul.bf16.gmra.mxu1 %v1271_v62  ;;  %v1285_v62 = vpack.c.bf16 %v841_v43, %v829_v39  ;;  %v864_v39 = vld [vmem:[%s5562_s17 + $0x14b0] sm:$0xff]  ;;  %v853_v43 = vld [vmem:[%s5562_s17 + $0x1458] sm:$0xff] }
 0x204   : > { %2648 = vmatmul.bf16.gmra.mxu2 %v1272_v5  ;;  %v4950_v5 = vld [vmem:[#allocation5 + $0x100] sm:$0xff] }
 0x205   : > { %2817 = vmatmul.bf16.gmra.mxu3 %v1273_v6  ;;  %v4974_v6 = vld [vmem:[#allocation5 + $0x1c0] sm:$0xff]  ;;  %2860 = vmatpush.bf16.msrb.mxu0 %v4950_v5 }
 0x206   : > { %3367 = vmatpush.bf16.msrb.mxu3 %v4974_v6 }
 0x207   : > { %v2609_v12 = vpop.f32.mrf.mxu2  ;;  %v2273_v20 = vpop.f32.mrf.mxu0 }
 0x208   : > { %v2778_v15 = vpop.f32.mrf.mxu3  ;;  %v2610_v18 = vadd.f32 %v2609_v12, %v2441_v10  ;;  %v2442_v22 = vpop.f32.mrf.mxu1 }
 0x209   : > { %v2443_v23 = vadd.f32 %v2442_v22, %v2273_v20 }
 0x20a   : > { %v5848_v26 = vadd.f32 %v2778_v15, %v2610_v18 }
 0x20f   : > { %v2611_v44 = vpop.f32.mrf.mxu2  ;;  %v2276_v57 = vpop.f32.mrf.mxu0 }
 0x210   : > { %v2780_v47 = vpop.f32.mrf.mxu3  ;;  %v2612_v56 = vadd.f32 %v2611_v44, %v2443_v23  ;;  %v2445_v60 = vpop.f32.mrf.mxu1  ;;  %v865_v44 = vld [vmem:[%s5562_s17 + $0x14b8] sm:$0xff] }
 0x211   : > { %v2446_v63 = vadd.f32 %v2445_v60, %v2276_v57 }
 0x212   : > { %v5858_v0 = vadd.f32 %v2780_v47, %v2612_v56  ;;  %2315 = vmatmul.bf16.gmra.mxu0 %v1282_v48  ;;  %v1295_v56 = vpack.c.bf16 %v863_v34, %v851_v32  ;;  %v887_v32 = vld [vmem:[%s5562_s17 + $0x1568] sm:$0xff]  ;;  %v876_v34 = vld [vmem:[%s5562_s17 + $0x1510] sm:$0xff] }
 0x213   : > { %2484 = vmatmul.bf16.gmra.mxu1 %v1283_v50  ;;  %v1294_v50 = vpack.c.bf16 %v862_v30, %v850_v29  ;;  %v886_v29 = vld [vmem:[%s5562_s17 + $0x1560] sm:$0xff]  ;;  %v875_v30 = vld [vmem:[%s5562_s17 + $0x1508] sm:$0xff] }
 0x214   : > { %2653 = vmatmul.bf16.gmra.mxu2 %v1284_v61 }
 0x215   : > { %2822 = vmatmul.bf16.gmra.mxu3 %v1285_v62  ;;  %v1296_v62 = vpack.c.bf16 %v864_v39, %v852_v36  ;;  %v888_v36 = vld [vmem:[%s5562_s17 + $0x1570] sm:$0xff]  ;;  %v877_v39 = vld [vmem:[%s5562_s17 + $0x1518] sm:$0xff] }
 0x217   : > { %v2614_v10 = vpop.f32.mrf.mxu2  ;;  %v2278_v18 = vpop.f32.mrf.mxu0 }
 0x218   : > { %v2783_v12 = vpop.f32.mrf.mxu3  ;;  %v2615_v15 = vadd.f32 %v2614_v10, %v2446_v63  ;;  %v2447_v20 = vpop.f32.mrf.mxu1  ;;  %v1297_v63 = vpack.c.bf16 %v865_v44, %v853_v43  ;;  %v889_v43 = vld [vmem:[%s5562_s17 + $0x1578] sm:$0xff] }
 0x219   : > { %v2448_v22 = vadd.f32 %v2447_v20, %v2278_v18 }
 0x21a   : > { %v5860_v23 = vadd.f32 %v2783_v12, %v2615_v15 }
 0x21f   : > { %v2616_v47 = vpop.f32.mrf.mxu2  ;;  %v2281_v60 = vpop.f32.mrf.mxu0 }
 0x220   : > { %v2785_v48 = vpop.f32.mrf.mxu3  ;;  %v2617_v57 = vadd.f32 %v2616_v47, %v2448_v22  ;;  %v2450_v61 = vpop.f32.mrf.mxu1 }
 0x221   : > { %v2451_v1 = vadd.f32 %v2450_v61, %v2281_v60  ;;  %v1308_v61 = vpack.c.bf16 %v888_v36, %v876_v34  ;;  %v911_v34 = vld [vmem:[%s5562_s17 + $0x1628] sm:$0xff]  ;;  %v900_v36 = vld [vmem:[%s5562_s17 + $0x15d0] sm:$0xff] }
 0x222   : > { %v5870_v5 = vadd.f32 %v2785_v48, %v2617_v57  ;;  %2320 = vmatmul.bf16.gmra.mxu0 %v1294_v50  ;;  %v1306_v48 = vpack.c.bf16 %v886_v29, %v874_v27  ;;  %v1307_v50 = vpack.c.bf16 %v887_v32, %v875_v30  ;;  %v898_v29 = vld [vmem:[%s5562_s17 + $0x15c0] sm:$0xff]  ;;  %v899_v32 = vld [vmem:[%s5562_s17 + $0x15c8] sm:$0xff] }
 0x223   : > { %2489 = vmatmul.bf16.gmra.mxu1 %v1295_v56  ;;  %v910_v30 = vld [vmem:[%s5562_s17 + $0x1620] sm:$0xff] }
 0x224   : > { %2658 = vmatmul.bf16.gmra.mxu2 %v1296_v62  ;;  %v1309_v62 = vpack.c.bf16 %v889_v43, %v877_v39  ;;  %v912_v39 = vld [vmem:[%s5562_s17 + $0x1630] sm:$0xff]  ;;  %v901_v43 = vld [vmem:[%s5562_s17 + $0x15d8] sm:$0xff] }
 0x225   : > { %2827 = vmatmul.bf16.gmra.mxu3 %v1297_v63 }
 0x227   : > { %v2619_v6 = vpop.f32.mrf.mxu2  ;;  %v2283_v15 = vpop.f32.mrf.mxu0 }
 0x228   : > { %v2788_v10 = vpop.f32.mrf.mxu3  ;;  %v2620_v12 = vadd.f32 %v2619_v6, %v2451_v1  ;;  %v2452_v18 = vpop.f32.mrf.mxu1 }
 0x229   : > { %v2453_v20 = vadd.f32 %v2452_v18, %v2283_v15 }
 0x22a   : > { %v5872_v22 = vadd.f32 %v2788_v10, %v2620_v12 }
 0x22f   : > { %v2621_v44 = vpop.f32.mrf.mxu2  ;;  %v2286_v57 = vpop.f32.mrf.mxu0 }
 0x230   : > { %v2790_v47 = vpop.f32.mrf.mxu3  ;;  %v2622_v56 = vadd.f32 %v2621_v44, %v2453_v20  ;;  %v2455_v60 = vpop.f32.mrf.mxu1  ;;  %v913_v44 = vld [vmem:[%s5562_s17 + $0x1638] sm:$0xff] }
 0x231   : > { %v2456_v63 = vadd.f32 %v2455_v60, %v2286_v57 }
 0x232   : > { %v5882_v1 = vadd.f32 %v2790_v47, %v2622_v56  ;;  %2325 = vmatmul.bf16.gmra.mxu0 %v1306_v48  ;;  %v1319_v56 = vpack.c.bf16 %v911_v34, %v899_v32  ;;  %v922_v34 = vld [vmem:[%s5562_s17 + $0x1680] sm:$0xff] }
 0x233   : > { %2494 = vmatmul.bf16.gmra.mxu1 %v1307_v50  ;;  %v1318_v50 = vpack.c.bf16 %v910_v30, %v898_v29 }
 0x234   : > { %2663 = vmatmul.bf16.gmra.mxu2 %v1308_v61 }
 0x235   : > { %2832 = vmatmul.bf16.gmra.mxu3 %v1309_v62  ;;  %v1320_v62 = vpack.c.bf16 %v912_v39, %v900_v36  ;;  %v934_v36 = vld [vmem:[%s5562_s17 + $0x16e0] sm:$0xff]  ;;  %v923_v39 = vld [vmem:[%s5562_s17 + $0x1688] sm:$0xff] }
 0x237   : > { %v2624_v6 = vpop.f32.mrf.mxu2  ;;  %v2288_v15 = vpop.f32.mrf.mxu0 }
 0x238   : > { %v2793_v10 = vpop.f32.mrf.mxu3  ;;  %v2625_v12 = vadd.f32 %v2624_v6, %v2456_v63  ;;  %v2457_v18 = vpop.f32.mrf.mxu1  ;;  %v1321_v63 = vpack.c.bf16 %v913_v44, %v901_v43  ;;  %v935_v43 = vld [vmem:[%s5562_s17 + $0x16e8] sm:$0xff]  ;;  %v924_v44 = vld [vmem:[%s5562_s17 + $0x1690] sm:$0xff] }
 0x239   : > { %v2458_v20 = vadd.f32 %v2457_v18, %v2288_v15 }
 0x23a   : > { %v5884_v27 = vadd.f32 %v2793_v10, %v2625_v12 }
 0x23c   : > { %6867 = vst [vmem:[#allocation11_spill] sm:$0xff] %v5884_v27  ;;  %v5007_v27 = vld [vmem:[#allocation5 + $0x2c8] sm:$0x10] }
 0x23f   : > { %v2626_v47 = vpop.f32.mrf.mxu2  ;;  %v2291_v60 = vpop.f32.mrf.mxu0 }
 0x240   : > { %v2795_v48 = vpop.f32.mrf.mxu3  ;;  %v2627_v57 = vadd.f32 %v2626_v47, %v2458_v20  ;;  %v2460_v61 = vpop.f32.mrf.mxu1  ;;  %v936_v47 = vld [vmem:[%s5562_s17 + $0x16f0] sm:$0xff] }
 0x241   : > { %v2461_v6 = vadd.f32 %v2460_v61, %v2291_v60  ;;  %v1330_v60 = vpack.c.bf16 %v934_v36, %v922_v34  ;;  %v1331_v61 = vpack.c.bf16 %v935_v43, %v923_v39  ;;  %v5418_v34 = vmov 65535  }
 0x242   : > { %v5894_v10 = vadd.f32 %v2795_v48, %v2627_v57  ;;  %2330 = vmatmul.bf16.gmra.mxu0 %v1318_v50  ;;  %v925_v48 = vld [vmem:[%s5562_s17 + $0x1698] sm:$0xff]  ;;  %v2172_v36 = vsel %vm2170_vm0, 4294967295, %v5418_v34 }
 0x243   : > { %2499 = vmatmul.bf16.gmra.mxu1 %v1319_v56  ;;  %v937_v50 = vld [vmem:[%s5562_s17 + $0x16f8] sm:$0xff] }
 0x244   : > { %6868 = vst [vmem:[#allocation12_spill] sm:$0xff] %v5894_v10  ;;  %2668 = vmatmul.bf16.gmra.mxu2 %v1320_v62  ;;  %v1333_v10 = vpack.c.bf16 %v937_v50, %v925_v48 }
 0x245   : > { %2837 = vmatmul.bf16.gmra.mxu3 %v1321_v63 }
 0x247   : > { %v2629_v12 = vpop.f32.mrf.mxu2  ;;  %v2293_v20 = vpop.f32.mrf.mxu0 }
 0x248   : > { %v2798_v15 = vpop.f32.mrf.mxu3  ;;  %v2630_v18 = vadd.f32 %v2629_v12, %v2461_v6  ;;  %v2462_v29 = vpop.f32.mrf.mxu1  ;;  %v1332_v12 = vpack.c.bf16 %v936_v47, %v924_v44 }
 0x249   : > { %v2463_v30 = vadd.f32 %v2462_v29, %v2293_v20  ;;  %v4989_v29 = vld [vmem:[#allocation5 + $0x238] sm:$0xff] }
 0x24a   : > { %v5896_v32 = vadd.f32 %v2798_v15, %v2630_v18  ;;  %v5005_v18 = vld [vmem:[#allocation5 + $0x2b8] sm:$0xff]  ;;  %3529 = vmatpush.bf16.msra.mxu0 %v4989_v29 }
 0x24b   : > { %3867 = vmatpush.bf16.msra.mxu2 %v5005_v18  ;;  %v961_v18 = vld [vmem:[%s5562_s17 + $0x17b8] sm:$0xff] }
 0x24c   : > { %6869 = vst [vmem:[#allocation13_spill] sm:$0xff] %v5896_v32  ;;  %v4875_v32 = vld [vmem:[#allocation5 + $0x2c8] sm:$0xf] }
 0x24f   : > { %v2631_v56 = vpop.f32.mrf.mxu2  ;;  %v2296_v63 = vpop.f32.mrf.mxu0 }
 0x250   : > { %v2800_v57 = vpop.f32.mrf.mxu3  ;;  %v2632_v62 = vadd.f32 %v2631_v56, %v2463_v30  ;;  %v2465_v6 = vpop.f32.mrf.mxu1  ;;  %v4876_v30 = vor.u32 %v5007_v27, %v4875_v32  ;;  %v4997_v27 = vld [vmem:[#allocation5 + $0x278] sm:$0xff]  ;;  %v946_v32 = vld [vmem:[%s5562_s17 + $0x1740] sm:$0xff] }
 0x251   : > { %v2466_v20 = vadd.f32 %v2465_v6, %v2296_v63  ;;  %v948_v63 = vld [vmem:[%s5562_s17 + $0x1750] sm:$0xff]  ;;  %3698 = vmatpush.bf16.msra.mxu1 %v4997_v27 }
 0x252   : > { %v5906_v15 = vadd.f32 %v2800_v57, %v2632_v62  ;;  %2335 = vmatmul.bf16.gmra.mxu0 %v1330_v60  ;;  %v958_v60 = vld [vmem:[%s5562_s17 + $0x17a0] sm:$0xff]  ;;  %v959_v62 = vld [vmem:[%s5562_s17 + $0x17a8] sm:$0xff]  ;;  %v960_v6 = vld [vmem:[%s5562_s17 + $0x17b0] sm:$0xff] }
 0x253   : > { %2504 = vmatmul.bf16.gmra.mxu1 %v1331_v61  ;;  %v947_v61 = vld [vmem:[%s5562_s17 + $0x1748] sm:$0xff]  ;;  %v1342_v34 = vpack.c.bf16 %v958_v60, %v946_v32 }
 0x254   : > { %2673 = vmatmul.bf16.gmra.mxu2 %v1332_v12  ;;  %v949_v12 = vld [vmem:[%s5562_s17 + $0x1758] sm:$0xff] }
 0x255   : > { %2842 = vmatmul.bf16.gmra.mxu3 %v1333_v10  ;;  %v2173_v10 = vsel %vm2171_vm1, %v2172_v36, 0  ;;  %v1343_v36 = vpack.c.bf16 %v959_v62, %v947_v61 }
 0x256   : > { %v2175_v50 = vand.u32 %v4876_v30, %v2173_v10 }
 0x257   : > { %v2634_v39 = vpop.f32.mrf.mxu2  ;;  %v2298_v47 = vpop.f32.mrf.mxu0 }
 0x258   : > { %v2803_v43 = vpop.f32.mrf.mxu3  ;;  %v2635_v44 = vadd.f32 %v2634_v39, %v2466_v20  ;;  %v2467_v48 = vpop.f32.mrf.mxu1  ;;  %4042 = vmatpush.bf16.msra.mxu3 %v2175_v50 }
 0x259   : > { %v2468_v56 = vadd.f32 %v2467_v48, %v2298_v47 }
 0x25a   : > { %v5908_v57 = vadd.f32 %v2803_v43, %v2635_v44  ;;  %v1344_v43 = vpack.c.bf16 %v960_v6, %v948_v63  ;;  %v1345_v44 = vpack.c.bf16 %v961_v18, %v949_v12  ;;  %v206_v63 = vld [vmem:[%s5562_s17 + $0x20] sm:$0xff]  ;;  %v207_v12 = vld [vmem:[%s5562_s17 + $0x28] sm:$0xff] }
 0x25b   : > { %v218_v6 = vld [vmem:[%s5562_s17 + $0x80] sm:$0xff]  ;;  %v219_v18 = vld [vmem:[%s5562_s17 + $0x88] sm:$0xff] }
 0x25c   : > { %6870 = vst [vmem:[#allocation14_spill] sm:$0xff] %v5908_v57 }
 0x25f   : > { %v2636_v29 = vpop.f32.mrf.mxu2  ;;  %v2301_v30 = vpop.f32.mrf.mxu0 }
 0x260   : > { %v2805_v20 = vpop.f32.mrf.mxu3  ;;  %v2637_v39 = vadd.f32 %v2636_v29, %v2468_v56  ;;  %v2470_v10 = vpop.f32.mrf.mxu1  ;;  %v208_v29 = vld [vmem:[%s5562_s17 + $0x30] sm:$0xff] }
 0x261   : > { %v2471_v47 = vadd.f32 %v2470_v10, %v2301_v30  ;;  %v974_v10 = vpack.c.bf16 %v218_v6, %v206_v63 }
 0x262   : > { %v5918_v48 = vadd.f32 %v2805_v20, %v2637_v39  ;;  %2340 = vmatmul.bf16.gmra.mxu0 %v1342_v34  ;;  %v220_v20 = vld [vmem:[%s5562_s17 + $0x90] sm:$0xff]  ;;  %v209_v34 = vld [vmem:[%s5562_s17 + $0x38] sm:$0xff] }
 0x263   : > { %2509 = vmatmul.bf16.gmra.mxu1 %v1343_v36  ;;  %v221_v36 = vld [vmem:[%s5562_s17 + $0x98] sm:$0xff] }
 0x264   : > { %6871 = vst [vmem:[#allocation15_spill] sm:$0xff] %v5918_v48  ;;  %2678 = vmatmul.bf16.gmra.mxu2 %v1344_v43  ;;  %v975_v43 = vpack.c.bf16 %v219_v18, %v207_v12 }
 0x265   : > { %2847 = vmatmul.bf16.gmra.mxu3 %v1345_v44 }
 0x267   : > { %v2639_v50 = vpop.f32.mrf.mxu2  ;;  %v2303_v32 = vpop.f32.mrf.mxu0 }
 0x268   : > { %v2808_v56 = vpop.f32.mrf.mxu3  ;;  %v2640_v27 = vadd.f32 %v2639_v50, %v2471_v47  ;;  %v2472_v60 = vpop.f32.mrf.mxu1  ;;  %v976_v50 = vpack.c.bf16 %v220_v20, %v208_v29  ;;  %v242_v20 = vld [vmem:[%s5562_s17 + $0x140] sm:$0xff] }
 0x269   : > { %v2473_v61 = vadd.f32 %v2472_v60, %v2303_v32 }
 0x26a   : > { %v5920_v62 = vadd.f32 %v2808_v56, %v2640_v27  ;;  %v977_v56 = vpack.c.bf16 %v221_v36, %v209_v34  ;;  %v231_v34 = vld [vmem:[%s5562_s17 + $0xe8] sm:$0xff] }
 0x26b   : > { %v243_v36 = vld [vmem:[%s5562_s17 + $0x148] sm:$0xff] }
 0x26c   : > { %6872 = vst [vmem:[#allocation16_spill] sm:$0xff] %v5920_v62 }
 0x26f   : > { %v2641_v39 = vpop.f32.mrf.mxu2  ;;  %v2306_v48 = vpop.f32.mrf.mxu0 }
 0x270   : > { %v2810_v30 = vpop.f32.mrf.mxu3  ;;  %v2642_v44 = vadd.f32 %v2641_v39, %v2473_v61  ;;  %v2475_v47 = vpop.f32.mrf.mxu1  ;;  %v232_v39 = vld [vmem:[%s5562_s17 + $0xf0] sm:$0xff] }
 0x271   : > { %v2476_v27 = vadd.f32 %v2475_v47, %v2306_v48  ;;  %v230_v48 = vld [vmem:[%s5562_s17 + $0xe0] sm:$0xff] }
 0x272   : > { %v5930_v32 = vadd.f32 %v2810_v30, %v2642_v44  ;;  %2861 = vmatmul.bf16.vlgmr.msrb.gmra.mxu0 %v974_v10  ;;  %v244_v30 = vld [vmem:[%s5562_s17 + $0x150] sm:$0xff]  ;;  %v233_v10 = vld [vmem:[%s5562_s17 + $0xf8] sm:$0xff] }
 0x273   : > { %3030 = vmatmul.bf16.vlgmr.msrb.gmra.mxu1 %v975_v43  ;;  %v245_v43 = vld [vmem:[%s5562_s17 + $0x158] sm:$0xff] }
 0x274   : > { %6873 = vst [vmem:[#allocation17_spill] sm:$0xff] %v5930_v32  ;;  %3199 = vmatmul.bf16.vlgmr.msrb.gmra.mxu2 %v976_v50  ;;  %v986_v50 = vpack.c.bf16 %v242_v20, %v230_v48 }
 0x275   : > { %3368 = vmatmul.bf16.vlgmr.msrb.gmra.mxu3 %v977_v56  ;;  %v987_v56 = vpack.c.bf16 %v243_v36, %v231_v34 }
 0x277   : > { %v2644_v60 = vpop.f32.mrf.mxu2  ;;  %v2308_v6 = vpop.f32.mrf.mxu0 }
 0x278   : > { %v2813_v61 = vpop.f32.mrf.mxu3  ;;  %v2645_v63 = vadd.f32 %v2644_v60, %v2476_v27  ;;  %v2477_v12 = vpop.f32.mrf.mxu1  ;;  %v988_v60 = vpack.c.bf16 %v244_v30, %v232_v39  ;;  %v266_v30 = vld [vmem:[%s5562_s17 + $0x200] sm:$0xff] }
 0x279   : > { %v2478_v18 = vadd.f32 %v2477_v12, %v2308_v6 }
 0x27a   : > { %v5932_v29 = vadd.f32 %v2813_v61, %v2645_v63  ;;  %v989_v61 = vpack.c.bf16 %v245_v43, %v233_v10  ;;  %v267_v10 = vld [vmem:[%s5562_s17 + $0x208] sm:$0xff]  ;;  %v256_v43 = vld [vmem:[%s5562_s17 + $0x1b0] sm:$0xff] }
 0x27c   : > { %6874 = vst [vmem:[#allocation18_spill] sm:$0xff] %v5932_v29 }
 0x27f   : > { %v2646_v44 = vpop.f32.mrf.mxu2  ;;  %v2311_v62 = vpop.f32.mrf.mxu0 }
 0x280   : > { %v2815_v47 = vpop.f32.mrf.mxu3  ;;  %v2647_v32 = vadd.f32 %v2646_v44, %v2478_v18  ;;  %v2480_v27 = vpop.f32.mrf.mxu1  ;;  %v268_v44 = vld [vmem:[%s5562_s17 + $0x210] sm:$0xff] }
 0x281   : > { %v2481_v63 = vadd.f32 %v2480_v27, %v2311_v62  ;;  %v254_v62 = vld [vmem:[%s5562_s17 + $0x1a0] sm:$0xff] }
 0x282   : > { %v5942_v6 = vadd.f32 %v2815_v47, %v2647_v32  ;;  %2866 = vmatmul.bf16.gmra.mxu0 %v986_v50  ;;  %v255_v32 = vld [vmem:[%s5562_s17 + $0x1a8] sm:$0xff]  ;;  %v257_v47 = vld [vmem:[%s5562_s17 + $0x1b8] sm:$0xff] }
 0x283   : > { %3035 = vmatmul.bf16.gmra.mxu1 %v987_v56  ;;  %v269_v50 = vld [vmem:[%s5562_s17 + $0x218] sm:$0xff] }
 0x284   : > { %6875 = vst [vmem:[#allocation19_spill] sm:$0xff] %v5942_v6  ;;  %3204 = vmatmul.bf16.gmra.mxu2 %v988_v60  ;;  %v998_v60 = vpack.c.bf16 %v266_v30, %v254_v62  ;;  %v1001_v57 = vpack.c.bf16 %v269_v50, %v257_v47  ;;  %v279_v47 = vld [vmem:[%s5562_s17 + $0x268] sm:$0xff] }
 0x285   : > { %3373 = vmatmul.bf16.gmra.mxu3 %v989_v61  ;;  %v999_v61 = vpack.c.bf16 %v267_v10, %v255_v32  ;;  %v291_v50 = vld [vmem:[%s5562_s17 + $0x2c8] sm:$0xff] }
 0x287   : > { %v2649_v12 = vpop.f32.mrf.mxu2  ;;  %v2313_v20 = vpop.f32.mrf.mxu0 }
 0x288   : > { %v2818_v18 = vpop.f32.mrf.mxu3  ;;  %v2650_v48 = vadd.f32 %v2649_v12, %v2481_v63  ;;  %v2482_v34 = vpop.f32.mrf.mxu1  ;;  %v1000_v12 = vpack.c.bf16 %v268_v44, %v256_v43  ;;  %v4996_v43 = vld [vmem:[#allocation5 + $0x270] sm:$0xff]  ;;  %v278_v44 = vld [vmem:[%s5562_s17 + $0x260] sm:$0xff] }
 0x289   : > { %v2483_v36 = vadd.f32 %v2482_v34, %v2313_v20  ;;  %v4988_v34 = vld [vmem:[#allocation5 + $0x230] sm:$0xff]  ;;  %3699 = vmatpush.bf16.msra.mxu1 %v4996_v43 }
 0x28a   : > { %v5944_v39 = vadd.f32 %v2818_v18, %v2650_v48  ;;  %v5004_v48 = vld [vmem:[#allocation5 + $0x2b0] sm:$0xff]  ;;  %3530 = vmatpush.bf16.msra.mxu0 %v4988_v34  ;;  %v1011_v34 = vpack.c.bf16 %v291_v50, %v279_v47 }
 0x28b   : > { %3868 = vmatpush.bf16.msra.mxu2 %v5004_v48 }
 0x28c   : > { %6876 = vst [vmem:[#allocation20_spill] sm:$0xff] %v5944_v39 }
 0x28f   : > { %v2651_v56 = vpop.f32.mrf.mxu2  ;;  %v2316_v29 = vpop.f32.mrf.mxu0 }
 0x290   : > { %v2820_v27 = vpop.f32.mrf.mxu3  ;;  %v2652_v6 = vadd.f32 %v2651_v56, %v2483_v36  ;;  %v2485_v63 = vpop.f32.mrf.mxu1  ;;  %v280_v56 = vld [vmem:[%s5562_s17 + $0x270] sm:$0xff] }
 0x291   : > { %v2486_v20 = vadd.f32 %v2485_v63, %v2316_v29 }
 0x292   : > { %v5954_v18 = vadd.f32 %v2820_v27, %v2652_v6  ;;  %2871 = vmatmul.bf16.gmra.mxu0 %v998_v60  ;;  %v292_v27 = vld [vmem:[%s5562_s17 + $0x2d0] sm:$0xff]  ;;  %v281_v60 = vld [vmem:[%s5562_s17 + $0x278] sm:$0xff] }
 0x293   : > { %3040 = vmatmul.bf16.gmra.mxu1 %v999_v61  ;;  %v293_v61 = vld [vmem:[%s5562_s17 + $0x2d8] sm:$0xff] }
 0x294   : > { %6877 = vst [vmem:[#allocation21_spill] sm:$0xff] %v5954_v18  ;;  %3209 = vmatmul.bf16.gmra.mxu2 %v1000_v12 }
 0x295   : > { %3378 = vmatmul.bf16.gmra.mxu3 %v1001_v57  ;;  %v290_v57 = vld [vmem:[%s5562_s17 + $0x2c0] sm:$0xff] }
 0x296   : > { %v1010_v48 = vpack.c.bf16 %v290_v57, %v278_v44 }
 0x297   : > { %v2654_v36 = vpop.f32.mrf.mxu2  ;;  %v2318_v62 = vpop.f32.mrf.mxu0 }
 0x298   : > { %v2823_v29 = vpop.f32.mrf.mxu3  ;;  %v2655_v6 = vadd.f32 %v2654_v36, %v2486_v20  ;;  %v2487_v30 = vpop.f32.mrf.mxu1 }
 0x299   : > { %v2488_v32 = vadd.f32 %v2487_v30, %v2318_v62 }
 0x29a   : > { %v5956_v10 = vadd.f32 %v2823_v29, %v2655_v6  ;;  %v1012_v29 = vpack.c.bf16 %v292_v27, %v280_v56  ;;  %v1013_v6 = vpack.c.bf16 %v293_v61, %v281_v60  ;;  %v314_v27 = vld [vmem:[%s5562_s17 + $0x380] sm:$0xff]  ;;  %v303_v60 = vld [vmem:[%s5562_s17 + $0x328] sm:$0xff] }
 0x29b   : > { %v315_v61 = vld [vmem:[%s5562_s17 + $0x388] sm:$0xff] }
 0x29c   : > { %6878 = vst [vmem:[#allocation22_spill] sm:$0xff] %v5956_v10 }
 0x29f   : > { %v2656_v63 = vpop.f32.mrf.mxu2  ;;  %v2321_v36 = vpop.f32.mrf.mxu0 }
 0x2a0   : > { %v2825_v12 = vpop.f32.mrf.mxu3  ;;  %v2657_v20 = vadd.f32 %v2656_v63, %v2488_v32  ;;  %v2490_v18 = vpop.f32.mrf.mxu1  ;;  %v304_v63 = vld [vmem:[%s5562_s17 + $0x330] sm:$0xff] }
 0x2a1   : > { %v2491_v62 = vadd.f32 %v2490_v18, %v2321_v36  ;;  %v302_v18 = vld [vmem:[%s5562_s17 + $0x320] sm:$0xff] }
 0x2a2   : > { %v5966_v30 = vadd.f32 %v2825_v12, %v2657_v20  ;;  %2876 = vmatmul.bf16.gmra.mxu0 %v1010_v48  ;;  %v316_v12 = vld [vmem:[%s5562_s17 + $0x390] sm:$0xff]  ;;  %v305_v48 = vld [vmem:[%s5562_s17 + $0x338] sm:$0xff] }
 0x2a3   : > { %3045 = vmatmul.bf16.gmra.mxu1 %v1011_v34  ;;  %v317_v34 = vld [vmem:[%s5562_s17 + $0x398] sm:$0xff] }
 0x2a4   : > { %6879 = vst [vmem:[#allocation23_spill] sm:$0xff] %v5966_v30  ;;  %3214 = vmatmul.bf16.gmra.mxu2 %v1012_v29  ;;  %v1022_v29 = vpack.c.bf16 %v314_v27, %v302_v18 }
 0x2a5   : > { %3383 = vmatmul.bf16.gmra.mxu3 %v1013_v6  ;;  %v1023_v6 = vpack.c.bf16 %v315_v61, %v303_v60 }
 0x2a7   : > { %v2659_v32 = vpop.f32.mrf.mxu2  ;;  %v2323_v57 = vpop.f32.mrf.mxu0 }
 0x2a8   : > { %v2828_v43 = vpop.f32.mrf.mxu3  ;;  %v2660_v44 = vadd.f32 %v2659_v32, %v2491_v62  ;;  %v2492_v47 = vpop.f32.mrf.mxu1  ;;  %v1024_v32 = vpack.c.bf16 %v316_v12, %v304_v63  ;;  %v338_v12 = vld [vmem:[%s5562_s17 + $0x440] sm:$0xff] }
 0x2a9   : > { %v2493_v50 = vadd.f32 %v2492_v47, %v2323_v57 }
 0x2aa   : > { %v5968_v56 = vadd.f32 %v2828_v43, %v2660_v44  ;;  %v1025_v43 = vpack.c.bf16 %v317_v34, %v305_v48  ;;  %v339_v48 = vld [vmem:[%s5562_s17 + $0x448] sm:$0xff]  ;;  %v328_v34 = vld [vmem:[%s5562_s17 + $0x3f0] sm:$0xff] }
 0x2ac   : > { %6880 = vst [vmem:[#allocation24_spill] sm:$0xff] %v5968_v56 }
 0x2af   : > { %v2661_v20 = vpop.f32.mrf.mxu2  ;;  %v2326_v10 = vpop.f32.mrf.mxu0 }
 0x2b0   : > { %v2830_v36 = vpop.f32.mrf.mxu3  ;;  %v2662_v30 = vadd.f32 %v2661_v20, %v2493_v50  ;;  %v2495_v62 = vpop.f32.mrf.mxu1  ;;  %v340_v20 = vld [vmem:[%s5562_s17 + $0x450] sm:$0xff] }
 0x2b1   : > { %v2496_v44 = vadd.f32 %v2495_v62, %v2326_v10  ;;  %v326_v10 = vld [vmem:[%s5562_s17 + $0x3e0] sm:$0xff] }
 0x2b2   : > { %v5978_v57 = vadd.f32 %v2830_v36, %v2662_v30  ;;  %2881 = vmatmul.bf16.gmra.mxu0 %v1022_v29  ;;  %v327_v30 = vld [vmem:[%s5562_s17 + $0x3e8] sm:$0xff]  ;;  %v329_v36 = vld [vmem:[%s5562_s17 + $0x3f8] sm:$0xff] }
 0x2b3   : > { %3050 = vmatmul.bf16.gmra.mxu1 %v1023_v6  ;;  %v341_v29 = vld [vmem:[%s5562_s17 + $0x458] sm:$0xff] }
 0x2b4   : > { %6881 = vst [vmem:[#allocation25_spill] sm:$0xff] %v5978_v57  ;;  %3219 = vmatmul.bf16.gmra.mxu2 %v1024_v32  ;;  %v1034_v32 = vpack.c.bf16 %v338_v12, %v326_v10 }
 0x2b5   : > { %3388 = vmatmul.bf16.gmra.mxu3 %v1025_v43  ;;  %v1035_v43 = vpack.c.bf16 %v339_v48, %v327_v30 }
 0x2b7   : > { %v2664_v47 = vpop.f32.mrf.mxu2  ;;  %v2328_v27 = vpop.f32.mrf.mxu0 }
 0x2b8   : > { %v2833_v50 = vpop.f32.mrf.mxu3  ;;  %v2665_v18 = vadd.f32 %v2664_v47, %v2496_v44  ;;  %v2497_v60 = vpop.f32.mrf.mxu1  ;;  %v1036_v47 = vpack.c.bf16 %v340_v20, %v328_v34  ;;  %v362_v20 = vld [vmem:[%s5562_s17 + $0x500] sm:$0xff] }
 0x2b9   : > { %v2498_v61 = vadd.f32 %v2497_v60, %v2328_v27 }
 0x2ba   : > { %v5980_v63 = vadd.f32 %v2833_v50, %v2665_v18  ;;  %v1037_v50 = vpack.c.bf16 %v341_v29, %v329_v36  ;;  %v363_v36 = vld [vmem:[%s5562_s17 + $0x508] sm:$0xff]  ;;  %v352_v29 = vld [vmem:[%s5562_s17 + $0x4b0] sm:$0xff] }
 0x2bc   : > { %6882 = vst [vmem:[#allocation26_spill] sm:$0xff] %v5980_v63 }
 0x2bf   : > { %v2666_v6 = vpop.f32.mrf.mxu2  ;;  %v2331_v56 = vpop.f32.mrf.mxu0 }
 0x2c0   : > { %v2835_v62 = vpop.f32.mrf.mxu3  ;;  %v2667_v57 = vadd.f32 %v2666_v6, %v2498_v61  ;;  %v2500_v44 = vpop.f32.mrf.mxu1  ;;  %v364_v6 = vld [vmem:[%s5562_s17 + $0x510] sm:$0xff] }
 0x2c1   : > { %v2501_v18 = vadd.f32 %v2500_v44, %v2331_v56  ;;  %v350_v56 = vld [vmem:[%s5562_s17 + $0x4a0] sm:$0xff] }
 0x2c2   : > { %v5990_v27 = vadd.f32 %v2835_v62, %v2667_v57  ;;  %2886 = vmatmul.bf16.gmra.mxu0 %v1034_v32  ;;  %v351_v57 = vld [vmem:[%s5562_s17 + $0x4a8] sm:$0xff]  ;;  %v353_v62 = vld [vmem:[%s5562_s17 + $0x4b8] sm:$0xff] }
 0x2c3   : > { %3055 = vmatmul.bf16.gmra.mxu1 %v1035_v43  ;;  %v365_v32 = vld [vmem:[%s5562_s17 + $0x518] sm:$0xff] }
 0x2c4   : > { %6883 = vst [vmem:[#allocation27_spill] sm:$0xff] %v5990_v27  ;;  %3224 = vmatmul.bf16.gmra.mxu2 %v1036_v47  ;;  %v1046_v47 = vpack.c.bf16 %v362_v20, %v350_v56  ;;  %v1049_v39 = vpack.c.bf16 %v365_v32, %v353_v62  ;;  %v375_v62 = vld [vmem:[%s5562_s17 + $0x568] sm:$0xff] }
 0x2c5   : > { %3393 = vmatmul.bf16.gmra.mxu3 %v1037_v50  ;;  %v1047_v50 = vpack.c.bf16 %v363_v36, %v351_v57  ;;  %v387_v32 = vld [vmem:[%s5562_s17 + $0x5c8] sm:$0xff] }
 0x2c7   : > { %v2669_v60 = vpop.f32.mrf.mxu2  ;;  %v2333_v12 = vpop.f32.mrf.mxu0 }
 0x2c8   : > { %v2838_v61 = vpop.f32.mrf.mxu3  ;;  %v2670_v10 = vadd.f32 %v2669_v60, %v2501_v18  ;;  %v2502_v30 = vpop.f32.mrf.mxu1  ;;  %v1048_v60 = vpack.c.bf16 %v364_v6, %v352_v29  ;;  %v4995_v29 = vld [vmem:[#allocation5 + $0x268] sm:$0xff]  ;;  %v374_v6 = vld [vmem:[%s5562_s17 + $0x560] sm:$0xff] }
 0x2c9   : > { %v2503_v48 = vadd.f32 %v2502_v30, %v2333_v12  ;;  %v4987_v30 = vld [vmem:[#allocation5 + $0x228] sm:$0xff]  ;;  %3700 = vmatpush.bf16.msra.mxu1 %v4995_v29 }
 0x2ca   : > { %v5992_v34 = vadd.f32 %v2838_v61, %v2670_v10  ;;  %v5003_v10 = vld [vmem:[#allocation5 + $0x2a8] sm:$0xff]  ;;  %3531 = vmatpush.bf16.msra.mxu0 %v4987_v30  ;;  %v1059_v30 = vpack.c.bf16 %v387_v32, %v375_v62 }
 0x2cb   : > { %3869 = vmatpush.bf16.msra.mxu2 %v5003_v10 }
 0x2cc   : > { %6884 = vst [vmem:[#allocation28_spill] sm:$0xff] %v5992_v34 }
 0x2cf   : > { %v2671_v43 = vpop.f32.mrf.mxu2  ;;  %v2336_v63 = vpop.f32.mrf.mxu0 }
 0x2d0   : > { %v2840_v44 = vpop.f32.mrf.mxu3  ;;  %v2672_v27 = vadd.f32 %v2671_v43, %v2503_v48  ;;  %v2505_v18 = vpop.f32.mrf.mxu1  ;;  %v376_v43 = vld [vmem:[%s5562_s17 + $0x570] sm:$0xff] }
 0x2d1   : > { %v2506_v12 = vadd.f32 %v2505_v18, %v2336_v63 }
 0x2d2   : > { %v6002_v61 = vadd.f32 %v2840_v44, %v2672_v27  ;;  %2891 = vmatmul.bf16.gmra.mxu0 %v1046_v47  ;;  %v388_v44 = vld [vmem:[%s5562_s17 + $0x5d0] sm:$0xff]  ;;  %v377_v47 = vld [vmem:[%s5562_s17 + $0x578] sm:$0xff] }
 0x2d3   : > { %3060 = vmatmul.bf16.gmra.mxu1 %v1047_v50  ;;  %v389_v50 = vld [vmem:[%s5562_s17 + $0x5d8] sm:$0xff] }
 0x2d4   : > { %6885 = vst [vmem:[#allocation29_spill] sm:$0xff] %v6002_v61  ;;  %3229 = vmatmul.bf16.gmra.mxu2 %v1048_v60 }
 0x2d5   : > { %3398 = vmatmul.bf16.gmra.mxu3 %v1049_v39  ;;  %v386_v39 = vld [vmem:[%s5562_s17 + $0x5c0] sm:$0xff] }
 0x2d6   : > { %v1058_v10 = vpack.c.bf16 %v386_v39, %v374_v6 }
 0x2d7   : > { %v2674_v48 = vpop.f32.mrf.mxu2  ;;  %v2338_v56 = vpop.f32.mrf.mxu0 }
 0x2d8   : > { %v2843_v63 = vpop.f32.mrf.mxu3  ;;  %v2675_v27 = vadd.f32 %v2674_v48, %v2506_v12  ;;  %v2507_v20 = vpop.f32.mrf.mxu1 }
 0x2d9   : > { %v2508_v57 = vadd.f32 %v2507_v20, %v2338_v56 }
 0x2da   : > { %v6004_v36 = vadd.f32 %v2843_v63, %v2675_v27  ;;  %v1060_v63 = vpack.c.bf16 %v388_v44, %v376_v43  ;;  %v1061_v27 = vpack.c.bf16 %v389_v50, %v377_v47  ;;  %v410_v44 = vld [vmem:[%s5562_s17 + $0x680] sm:$0xff]  ;;  %v399_v47 = vld [vmem:[%s5562_s17 + $0x628] sm:$0xff] }
 0x2db   : > { %v411_v50 = vld [vmem:[%s5562_s17 + $0x688] sm:$0xff] }
 0x2dc   : > { %6886 = vst [vmem:[#allocation30_spill] sm:$0xff] %v6004_v36 }
 0x2df   : > { %v2676_v18 = vpop.f32.mrf.mxu2  ;;  %v2341_v48 = vpop.f32.mrf.mxu0 }
 0x2e0   : > { %v2845_v60 = vpop.f32.mrf.mxu3  ;;  %v2677_v12 = vadd.f32 %v2676_v18, %v2508_v57  ;;  %v2510_v61 = vpop.f32.mrf.mxu1  ;;  %v400_v18 = vld [vmem:[%s5562_s17 + $0x630] sm:$0xff] }
 0x2e1   : > { %v2511_v56 = vadd.f32 %v2510_v61, %v2341_v48  ;;  %v398_v61 = vld [vmem:[%s5562_s17 + $0x620] sm:$0xff] }
 0x2e2   : > { %v6014_v20 = vadd.f32 %v2845_v60, %v2677_v12  ;;  %2896 = vmatmul.bf16.gmra.mxu0 %v1058_v10  ;;  %v412_v60 = vld [vmem:[%s5562_s17 + $0x690] sm:$0xff]  ;;  %v401_v10 = vld [vmem:[%s5562_s17 + $0x638] sm:$0xff] }
 0x2e3   : > { %3065 = vmatmul.bf16.gmra.mxu1 %v1059_v30  ;;  %v413_v30 = vld [vmem:[%s5562_s17 + $0x698] sm:$0xff] }
 0x2e4   : > { %6887 = vst [vmem:[#allocation31_spill] sm:$0xff] %v6014_v20  ;;  %3234 = vmatmul.bf16.gmra.mxu2 %v1060_v63  ;;  %v1070_v63 = vpack.c.bf16 %v410_v44, %v398_v61  ;;  %v1073_v34 = vpack.c.bf16 %v413_v30, %v401_v10  ;;  %v435_v10 = vld [vmem:[%s5562_s17 + $0x748] sm:$0xff]  ;;  %v424_v30 = vld [vmem:[%s5562_s17 + $0x6f0] sm:$0xff] }
 0x2e5   : > { %3403 = vmatmul.bf16.gmra.mxu3 %v1061_v27  ;;  %v1071_v27 = vpack.c.bf16 %v411_v50, %v399_v47  ;;  %v422_v50 = vld [vmem:[%s5562_s17 + $0x6e0] sm:$0xff] }
 0x2e7   : > { %v2679_v57 = vpop.f32.mrf.mxu2  ;;  %v2343_v39 = vpop.f32.mrf.mxu0 }
 0x2e8   : > { %v2848_v29 = vpop.f32.mrf.mxu3  ;;  %v2680_v6 = vadd.f32 %v2679_v57, %v2511_v56  ;;  %v2512_v62 = vpop.f32.mrf.mxu1  ;;  %v1072_v57 = vpack.c.bf16 %v412_v60, %v400_v18  ;;  %v434_v18 = vld [vmem:[%s5562_s17 + $0x740] sm:$0xff]  ;;  %v423_v60 = vld [vmem:[%s5562_s17 + $0x6e8] sm:$0xff] }
 0x2e9   : > { %v2513_v32 = vadd.f32 %v2512_v62, %v2343_v39 }
 0x2ea   : > { %v6016_v43 = vadd.f32 %v2848_v29, %v2680_v6 }
 0x2ef   : > { %v2681_v12 = vpop.f32.mrf.mxu2  ;;  %v2862_v36 = vpop.f32.mrf.mxu0 }
 0x2f0   : > { %v2850_v48 = vpop.f32.mrf.mxu3  ;;  %v2682_v20 = vadd.f32 %v2681_v12, %v2513_v32  ;;  %v3031_v56 = vpop.f32.mrf.mxu1  ;;  %v2863_v29 = vadd.f32 %v2862_v36, %v5644_v33  ;;  %v436_v12 = vld [vmem:[%s5562_s17 + $0x750] sm:$0xff] }
 0x2f2   : > { %v6027_v6 = vadd.f32 %v2850_v48, %v2682_v20  ;;  %v3032_v39 = vadd.f32 %v3031_v56, %v2863_v29  ;;  %2901 = vmatmul.bf16.gmra.mxu0 %v1070_v63  ;;  %v425_v48 = vld [vmem:[%s5562_s17 + $0x6f8] sm:$0xff]  ;;  %v1082_v56 = vpack.c.bf16 %v434_v18, %v422_v50 }
 0x2f3   : > { %3070 = vmatmul.bf16.gmra.mxu1 %v1071_v27  ;;  %v437_v63 = vld [vmem:[%s5562_s17 + $0x758] sm:$0xff] }
 0x2f4   : > { %6888 = vst [vmem:[#allocation32_spill] sm:$0xff] %v6027_v6  ;;  %3239 = vmatmul.bf16.gmra.mxu2 %v1072_v57  ;;  %v1083_v57 = vpack.c.bf16 %v435_v10, %v423_v60  ;;  %v1084_v6 = vpack.c.bf16 %v436_v12, %v424_v30  ;;  %v446_v30 = vld [vmem:[%s5562_s17 + $0x7a0] sm:$0xff] }
 0x2f5   : > { %3408 = vmatmul.bf16.gmra.mxu3 %v1073_v34  ;;  %v458_v12 = vld [vmem:[%s5562_s17 + $0x800] sm:$0xff] }
 0x2f7   : > { %v3200_v62 = vpop.f32.mrf.mxu2  ;;  %v2864_v44 = vpop.f32.mrf.mxu0 }
 0x2f8   : > { %v3369_v32 = vpop.f32.mrf.mxu3  ;;  %v3201_v61 = vadd.f32 %v3200_v62, %v3032_v39  ;;  %v3033_v47 = vpop.f32.mrf.mxu1  ;;  %v2865_v33 = vadd.f32 %v2864_v44, %v5654_v52  ;;  %v1085_v52 = vpack.c.bf16 %v437_v63, %v425_v48  ;;  %v447_v48 = vld [vmem:[%s5562_s17 + $0x7a8] sm:$0xff] }
 0x2f9   : > { %v459_v63 = vld [vmem:[%s5562_s17 + $0x808] sm:$0xff] }
 0x2fa   : > { %v6030_v36 = vadd.f32 %v3369_v32, %v3201_v61  ;;  %v3034_v20 = vadd.f32 %v3033_v47, %v2865_v33 }
 0x2ff   : > { %v3202_v34 = vpop.f32.mrf.mxu2  ;;  %v2867_v39 = vpop.f32.mrf.mxu0 }
 0x300   : > { %v3371_v27 = vpop.f32.mrf.mxu3  ;;  %v3203_v29 = vadd.f32 %v3202_v34, %v3034_v20  ;;  %v3036_v62 = vpop.f32.mrf.mxu1  ;;  %v2868_v32 = vadd.f32 %v2867_v39, %v5656_v59  ;;  %v448_v34 = vld [vmem:[%s5562_s17 + $0x7b0] sm:$0xff]  ;;  %v1094_v39 = vpack.c.bf16 %v458_v12, %v446_v30 }
 0x302   : > { %v6041_v61 = vadd.f32 %v3371_v27, %v3203_v29  ;;  %v3037_v44 = vadd.f32 %v3036_v62, %v2868_v32  ;;  %2906 = vmatmul.bf16.gmra.mxu0 %v1082_v56  ;;  %v460_v27 = vld [vmem:[%s5562_s17 + $0x810] sm:$0xff]  ;;  %v461_v56 = vld [vmem:[%s5562_s17 + $0x818] sm:$0xff]  ;;  %v1095_v62 = vpack.c.bf16 %v459_v63, %v447_v48 }
 0x303   : > { %3075 = vmatmul.bf16.gmra.mxu1 %v1083_v57 }
 0x304   : > { %3244 = vmatmul.bf16.gmra.mxu2 %v1084_v6  ;;  %v449_v6 = vld [vmem:[%s5562_s17 + $0x7b8] sm:$0xff] }
 0x305   : > { %3413 = vmatmul.bf16.gmra.mxu3 %v1085_v52 }
 0x307   : > { %v3205_v47 = vpop.f32.mrf.mxu2  ;;  %v2869_v50 = vpop.f32.mrf.mxu0 }
 0x308   : > { %v3374_v33 = vpop.f32.mrf.mxu3  ;;  %v3206_v20 = vadd.f32 %v3205_v47, %v3037_v44  ;;  %v3038_v18 = vpop.f32.mrf.mxu1  ;;  %v2870_v59 = vadd.f32 %v2869_v50, %v5666_v14  ;;  %v1096_v47 = vpack.c.bf16 %v460_v27, %v448_v34  ;;  %v1097_v14 = vpack.c.bf16 %v461_v56, %v449_v6  ;;  %v4994_v27 = vld [vmem:[#allocation5 + $0x260] sm:$0xff] }
 0x309   : > { %v470_v56 = vld [vmem:[%s5562_s17 + $0x860] sm:$0xff]  ;;  %3701 = vmatpush.bf16.msra.mxu1 %v4994_v27 }
 0x30a   : > { %v6044_v60 = vadd.f32 %v3374_v33, %v3206_v20  ;;  %v3039_v10 = vadd.f32 %v3038_v18, %v2870_v59  ;;  %v5002_v18 = vld [vmem:[#allocation5 + $0x2a0] sm:$0xff] }
 0x30b   : > { %v4986_v59 = vld [vmem:[#allocation5 + $0x220] sm:$0xff]  ;;  %3870 = vmatpush.bf16.msra.mxu2 %v5002_v18 }
 0x30c   : > { %3532 = vmatpush.bf16.msra.mxu0 %v4986_v59 }
 0x30f   : > { %v3207_v57 = vpop.f32.mrf.mxu2  ;;  %v2872_v32 = vpop.f32.mrf.mxu0 }
 0x310   : > { %v3376_v29 = vpop.f32.mrf.mxu3  ;;  %v3208_v52 = vadd.f32 %v3207_v57, %v3039_v10  ;;  %v3041_v44 = vpop.f32.mrf.mxu1  ;;  %v2873_v33 = vadd.f32 %v2872_v32, %v5668_v24  ;;  %v482_v57 = vld [vmem:[%s5562_s17 + $0x8c0] sm:$0xff]  ;;  %v473_v32 = vld [vmem:[%s5562_s17 + $0x878] sm:$0xff] }
 0x312   : > { %v6055_v20 = vadd.f32 %v3376_v29, %v3208_v52  ;;  %v3042_v50 = vadd.f32 %v3041_v44, %v2873_v33  ;;  %2911 = vmatmul.bf16.gmra.mxu0 %v1094_v39  ;;  %v471_v29 = vld [vmem:[%s5562_s17 + $0x868] sm:$0xff]  ;;  %v484_v52 = vld [vmem:[%s5562_s17 + $0x8d0] sm:$0xff]  ;;  %v485_v44 = vld [vmem:[%s5562_s17 + $0x8d8] sm:$0xff]  ;;  %v1106_v33 = vpack.c.bf16 %v482_v57, %v470_v56 }
 0x313   : > { %3080 = vmatmul.bf16.gmra.mxu1 %v1095_v62  ;;  %v483_v39 = vld [vmem:[%s5562_s17 + $0x8c8] sm:$0xff]  ;;  %v472_v62 = vld [vmem:[%s5562_s17 + $0x870] sm:$0xff] }
 0x314   : > { %3249 = vmatmul.bf16.gmra.mxu2 %v1096_v47 }
 0x315   : > { %3418 = vmatmul.bf16.gmra.mxu3 %v1097_v14 }
 0x317   : > { %v3210_v10 = vpop.f32.mrf.mxu2  ;;  %v2874_v12 = vpop.f32.mrf.mxu0 }
 0x318   : > { %v3379_v24 = vpop.f32.mrf.mxu3  ;;  %v3211_v30 = vadd.f32 %v3210_v10, %v3042_v50  ;;  %v3043_v48 = vpop.f32.mrf.mxu1  ;;  %v2875_v63 = vadd.f32 %v2874_v12, %v5678_v45  ;;  %v1107_v50 = vpack.c.bf16 %v483_v39, %v471_v29  ;;  %v1108_v10 = vpack.c.bf16 %v484_v52, %v472_v62  ;;  %v494_v62 = vld [vmem:[%s5562_s17 + $0x920] sm:$0xff] }
 0x319   : > { %v506_v52 = vld [vmem:[%s5562_s17 + $0x980] sm:$0xff] }
 0x31a   : > { %v6058_v34 = vadd.f32 %v3379_v24, %v3211_v30  ;;  %v3044_v6 = vadd.f32 %v3043_v48, %v2875_v63  ;;  %v1109_v24 = vpack.c.bf16 %v485_v44, %v473_v32  ;;  %v495_v32 = vld [vmem:[%s5562_s17 + $0x928] sm:$0xff] }
 0x31b   : > { %v507_v44 = vld [vmem:[%s5562_s17 + $0x988] sm:$0xff] }
 0x31f   : > { %v3212_v47 = vpop.f32.mrf.mxu2  ;;  %v2877_v59 = vpop.f32.mrf.mxu0 }
 0x320   : > { %v3381_v14 = vpop.f32.mrf.mxu3  ;;  %v3213_v18 = vadd.f32 %v3212_v47, %v3044_v6  ;;  %v3046_v45 = vpop.f32.mrf.mxu1  ;;  %v2878_v30 = vadd.f32 %v2877_v59, %v5680_v53  ;;  %v496_v47 = vld [vmem:[%s5562_s17 + $0x930] sm:$0xff] }
 0x322   : > { %v6069_v12 = vadd.f32 %v3381_v14, %v3213_v18  ;;  %v3047_v48 = vadd.f32 %v3046_v45, %v2878_v30  ;;  %2916 = vmatmul.bf16.gmra.mxu0 %v1106_v33  ;;  %v508_v14 = vld [vmem:[%s5562_s17 + $0x990] sm:$0xff]  ;;  %v497_v33 = vld [vmem:[%s5562_s17 + $0x938] sm:$0xff]  ;;  %v1118_v45 = vpack.c.bf16 %v506_v52, %v494_v62 }
 0x323   : > { %3085 = vmatmul.bf16.gmra.mxu1 %v1107_v50  ;;  %v509_v50 = vld [vmem:[%s5562_s17 + $0x998] sm:$0xff] }
 0x324   : > { %3254 = vmatmul.bf16.gmra.mxu2 %v1108_v10  ;;  %v1119_v10 = vpack.c.bf16 %v507_v44, %v495_v32 }
 0x325   : > { %3423 = vmatmul.bf16.gmra.mxu3 %v1109_v24 }
 0x327   : > { %v3215_v63 = vpop.f32.mrf.mxu2  ;;  %v2879_v56 = vpop.f32.mrf.mxu0 }
 0x328   : > { %v3384_v27 = vpop.f32.mrf.mxu3  ;;  %v3216_v6 = vadd.f32 %v3215_v63, %v3047_v48  ;;  %v3048_v57 = vpop.f32.mrf.mxu1  ;;  %v2880_v53 = vadd.f32 %v2879_v56, %v5690_v9  ;;  %v1120_v63 = vpack.c.bf16 %v508_v14, %v496_v47  ;;  %v1121_v9 = vpack.c.bf16 %v509_v50, %v497_v33  ;;  %v518_v47 = vld [vmem:[%s5562_s17 + $0x9e0] sm:$0xff]  ;;  %v519_v33 = vld [vmem:[%s5562_s17 + $0x9e8] sm:$0xff] }
 0x329   : > { %v530_v14 = vld [vmem:[%s5562_s17 + $0xa40] sm:$0xff]  ;;  %v531_v50 = vld [vmem:[%s5562_s17 + $0xa48] sm:$0xff] }
 0x32a   : > { %v6072_v29 = vadd.f32 %v3384_v27, %v3216_v6  ;;  %v3049_v39 = vadd.f32 %v3048_v57, %v2880_v53 }
 0x32f   : > { %v3217_v18 = vpop.f32.mrf.mxu2  ;;  %v2882_v30 = vpop.f32.mrf.mxu0 }
 0x330   : > { %v3386_v59 = vpop.f32.mrf.mxu3  ;;  %v3218_v24 = vadd.f32 %v3217_v18, %v3049_v39  ;;  %v3051_v48 = vpop.f32.mrf.mxu1  ;;  %v2883_v27 = vadd.f32 %v2882_v30, %v5692_v17  ;;  %v520_v18 = vld [vmem:[%s5562_s17 + $0x9f0] sm:$0xff] }
 0x332   : > { %v6083_v6 = vadd.f32 %v3386_v59, %v3218_v24  ;;  %v3052_v56 = vadd.f32 %v3051_v48, %v2883_v27  ;;  %2921 = vmatmul.bf16.gmra.mxu0 %v1118_v45  ;;  %v532_v59 = vld [vmem:[%s5562_s17 + $0xa50] sm:$0xff]  ;;  %v521_v45 = vld [vmem:[%s5562_s17 + $0x9f8] sm:$0xff]  ;;  %v1130_v48 = vpack.c.bf16 %v530_v14, %v518_v47 }
 0x333   : > { %3090 = vmatmul.bf16.gmra.mxu1 %v1119_v10  ;;  %v533_v10 = vld [vmem:[%s5562_s17 + $0xa58] sm:$0xff] }
 0x334   : > { %3259 = vmatmul.bf16.gmra.mxu2 %v1120_v63  ;;  %v1131_v63 = vpack.c.bf16 %v531_v50, %v519_v33 }
 0x335   : > { %3428 = vmatmul.bf16.gmra.mxu3 %v1121_v9 }
 0x337   : > { %v3220_v57 = vpop.f32.mrf.mxu2  ;;  %v2884_v62 = vpop.f32.mrf.mxu0 }
 0x338   : > { %v3389_v53 = vpop.f32.mrf.mxu3  ;;  %v3221_v39 = vadd.f32 %v3220_v57, %v3052_v56  ;;  %v3053_v52 = vpop.f32.mrf.mxu1  ;;  %v2885_v17 = vadd.f32 %v2884_v62, %v5702_v38  ;;  %v1132_v57 = vpack.c.bf16 %v532_v59, %v520_v18  ;;  %v1133_v38 = vpack.c.bf16 %v533_v10, %v521_v45  ;;  %v542_v18 = vld [vmem:[%s5562_s17 + $0xaa0] sm:$0xff]  ;;  %v543_v45 = vld [vmem:[%s5562_s17 + $0xaa8] sm:$0xff] }
 0x339   : > { %v554_v59 = vld [vmem:[%s5562_s17 + $0xb00] sm:$0xff]  ;;  %v555_v10 = vld [vmem:[%s5562_s17 + $0xb08] sm:$0xff] }
 0x33a   : > { %v6086_v32 = vadd.f32 %v3389_v53, %v3221_v39  ;;  %v3054_v44 = vadd.f32 %v3053_v52, %v2885_v17 }
 0x33f   : > { %v3222_v24 = vpop.f32.mrf.mxu2  ;;  %v2887_v27 = vpop.f32.mrf.mxu0 }
 0x340   : > { %v3391_v30 = vpop.f32.mrf.mxu3  ;;  %v3223_v9 = vadd.f32 %v3222_v24, %v3054_v44  ;;  %v3056_v56 = vpop.f32.mrf.mxu1  ;;  %v2888_v53 = vadd.f32 %v2887_v27, %v5704_v46  ;;  %v544_v24 = vld [vmem:[%s5562_s17 + $0xab0] sm:$0xff] }
 0x342   : > { %v6097_v39 = vadd.f32 %v3391_v30, %v3223_v9  ;;  %v3057_v62 = vadd.f32 %v3056_v56, %v2888_v53  ;;  %2926 = vmatmul.bf16.gmra.mxu0 %v1130_v48  ;;  %v556_v30 = vld [vmem:[%s5562_s17 + $0xb10] sm:$0xff]  ;;  %v545_v48 = vld [vmem:[%s5562_s17 + $0xab8] sm:$0xff]  ;;  %v1142_v56 = vpack.c.bf16 %v554_v59, %v542_v18  ;;  %v5006_v18 = vld [vmem:[#allocation5 + $0x2c0] sm:$0xff] }
 0x343   : > { %3095 = vmatmul.bf16.gmra.mxu1 %v1131_v63  ;;  %v557_v63 = vld [vmem:[%s5562_s17 + $0xb18] sm:$0xff]  ;;  %4043 = vmatpush.bf16.msra.mxu3 %v5006_v18 }
 0x344   : > { %3264 = vmatmul.bf16.gmra.mxu2 %v1132_v57  ;;  %v1143_v57 = vpack.c.bf16 %v555_v10, %v543_v45 }
 0x345   : > { %3433 = vmatmul.bf16.gmra.mxu3 %v1133_v38 }
 0x347   : > { %v3225_v52 = vpop.f32.mrf.mxu2  ;;  %v2889_v47 = vpop.f32.mrf.mxu0 }
 0x348   : > { %v3394_v17 = vpop.f32.mrf.mxu3  ;;  %v3226_v44 = vadd.f32 %v3225_v52, %v3057_v62  ;;  %v3058_v14 = vpop.f32.mrf.mxu1  ;;  %v2890_v46 = vadd.f32 %v2889_v47, %v5714_v4  ;;  %v1144_v52 = vpack.c.bf16 %v556_v30, %v544_v24  ;;  %v1145_v4 = vpack.c.bf16 %v557_v63, %v545_v48  ;;  %v4993_v48 = vld [vmem:[#allocation5 + $0x258] sm:$0xff] }
 0x349   : > { %3702 = vmatpush.bf16.msra.mxu1 %v4993_v48 }
 0x34a   : > { %v6100_v33 = vadd.f32 %v3394_v17, %v3226_v44  ;;  %v3059_v50 = vadd.f32 %v3058_v14, %v2890_v46  ;;  %v5001_v14 = vld [vmem:[#allocation5 + $0x298] sm:$0xff] }
 0x34b   : > { %v4985_v46 = vld [vmem:[#allocation5 + $0x218] sm:$0xff]  ;;  %3871 = vmatpush.bf16.msra.mxu2 %v5001_v14 }
 0x34c   : > { %3533 = vmatpush.bf16.msra.mxu0 %v4985_v46 }
 0x34f   : > { %v3227_v9 = vpop.f32.mrf.mxu2  ;;  %v2892_v53 = vpop.f32.mrf.mxu0 }
 0x350   : > { %v3396_v27 = vpop.f32.mrf.mxu3  ;;  %v3228_v38 = vadd.f32 %v3227_v9, %v3059_v50  ;;  %v3061_v62 = vpop.f32.mrf.mxu1  ;;  %v2893_v17 = vadd.f32 %v2892_v53, %v5716_v16  ;;  %v566_v9 = vld [vmem:[%s5562_s17 + $0xb60] sm:$0xff]  ;;  %v580_v53 = vld [vmem:[%s5562_s17 + $0xbd0] sm:$0xff] }
 0x352   : > { %v6111_v44 = vadd.f32 %v3396_v27, %v3228_v38  ;;  %v3062_v47 = vadd.f32 %v3061_v62, %v2893_v17  ;;  %2931 = vmatmul.bf16.gmra.mxu0 %v1142_v56  ;;  %v578_v27 = vld [vmem:[%s5562_s17 + $0xbc0] sm:$0xff]  ;;  %v567_v56 = vld [vmem:[%s5562_s17 + $0xb68] sm:$0xff]  ;;  %v568_v38 = vld [vmem:[%s5562_s17 + $0xb70] sm:$0xff] }
 0x353   : > { %3100 = vmatmul.bf16.gmra.mxu1 %v1143_v57  ;;  %v579_v57 = vld [vmem:[%s5562_s17 + $0xbc8] sm:$0xff]  ;;  %v569_v62 = vld [vmem:[%s5562_s17 + $0xb78] sm:$0xff] }
 0x354   : > { %3269 = vmatmul.bf16.gmra.mxu2 %v1144_v52  ;;  %v581_v52 = vld [vmem:[%s5562_s17 + $0xbd8] sm:$0xff]  ;;  %v1155_v14 = vpack.c.bf16 %v579_v57, %v567_v56 }
 0x355   : > { %3438 = vmatmul.bf16.gmra.mxu3 %v1145_v4 }
 0x357   : > { %v3230_v50 = vpop.f32.mrf.mxu2  ;;  %v2894_v45 = vpop.f32.mrf.mxu0 }
 0x358   : > { %v3399_v16 = vpop.f32.mrf.mxu3  ;;  %v3231_v59 = vadd.f32 %v3230_v50, %v3062_v47  ;;  %v3063_v10 = vpop.f32.mrf.mxu1  ;;  %v2895_v24 = vadd.f32 %v2894_v45, %v5726_v40  ;;  %v1154_v47 = vpack.c.bf16 %v578_v27, %v566_v9  ;;  %v1156_v50 = vpack.c.bf16 %v580_v53, %v568_v38  ;;  %v590_v38 = vld [vmem:[%s5562_s17 + $0xc20] sm:$0xff] }
 0x359   : > { %v602_v53 = vld [vmem:[%s5562_s17 + $0xc80] sm:$0xff] }
 0x35a   : > { %v6114_v30 = vadd.f32 %v3399_v16, %v3231_v59  ;;  %v3064_v63 = vadd.f32 %v3063_v10, %v2895_v24  ;;  %v1157_v16 = vpack.c.bf16 %v581_v52, %v569_v62  ;;  %v591_v62 = vld [vmem:[%s5562_s17 + $0xc28] sm:$0xff] }
 0x35b   : > { %v603_v52 = vld [vmem:[%s5562_s17 + $0xc88] sm:$0xff] }
 0x35f   : > { %v3232_v4 = vpop.f32.mrf.mxu2  ;;  %v2897_v18 = vpop.f32.mrf.mxu0 }
 0x360   : > { %v3401_v17 = vpop.f32.mrf.mxu3  ;;  %v3233_v46 = vadd.f32 %v3232_v4, %v3064_v63  ;;  %v3066_v40 = vpop.f32.mrf.mxu1  ;;  %v2898_v59 = vadd.f32 %v2897_v18, %v5728_v49  ;;  %v592_v4 = vld [vmem:[%s5562_s17 + $0xc30] sm:$0xff] }
 0x362   : > { %v6125_v45 = vadd.f32 %v3401_v17, %v3233_v46  ;;  %v3067_v10 = vadd.f32 %v3066_v40, %v2898_v59  ;;  %2936 = vmatmul.bf16.gmra.mxu0 %v1154_v47  ;;  %v604_v17 = vld [vmem:[%s5562_s17 + $0xc90] sm:$0xff]  ;;  %v593_v47 = vld [vmem:[%s5562_s17 + $0xc38] sm:$0xff]  ;;  %v1166_v40 = vpack.c.bf16 %v602_v53, %v590_v38 }
 0x363   : > { %3105 = vmatmul.bf16.gmra.mxu1 %v1155_v14  ;;  %v605_v14 = vld [vmem:[%s5562_s17 + $0xc98] sm:$0xff] }
 0x364   : > { %3274 = vmatmul.bf16.gmra.mxu2 %v1156_v50  ;;  %v1167_v50 = vpack.c.bf16 %v603_v52, %v591_v62 }
 0x365   : > { %3443 = vmatmul.bf16.gmra.mxu3 %v1157_v16 }
 0x367   : > { %v3235_v24 = vpop.f32.mrf.mxu2  ;;  %v2899_v9 = vpop.f32.mrf.mxu0 }
 0x368   : > { %v3404_v48 = vpop.f32.mrf.mxu3  ;;  %v3236_v63 = vadd.f32 %v3235_v24, %v3067_v10  ;;  %v3068_v27 = vpop.f32.mrf.mxu1  ;;  %v2900_v49 = vadd.f32 %v2899_v9, %v5738_v8  ;;  %v1168_v24 = vpack.c.bf16 %v604_v17, %v592_v4  ;;  %v1169_v8 = vpack.c.bf16 %v605_v14, %v593_v47  ;;  %v614_v4 = vld [vmem:[%s5562_s17 + $0xce0] sm:$0xff]  ;;  %v615_v47 = vld [vmem:[%s5562_s17 + $0xce8] sm:$0xff] }
 0x369   : > { %v626_v17 = vld [vmem:[%s5562_s17 + $0xd40] sm:$0xff]  ;;  %v627_v14 = vld [vmem:[%s5562_s17 + $0xd48] sm:$0xff] }
 0x36a   : > { %v6128_v56 = vadd.f32 %v3404_v48, %v3236_v63  ;;  %v3069_v57 = vadd.f32 %v3068_v27, %v2900_v49 }
 0x36f   : > { %v3237_v46 = vpop.f32.mrf.mxu2  ;;  %v2902_v59 = vpop.f32.mrf.mxu0 }
 0x370   : > { %v3406_v18 = vpop.f32.mrf.mxu3  ;;  %v3238_v16 = vadd.f32 %v3237_v46, %v3069_v57  ;;  %v3071_v10 = vpop.f32.mrf.mxu1  ;;  %v2903_v48 = vadd.f32 %v2902_v59, %v5740_v19  ;;  %v616_v46 = vld [vmem:[%s5562_s17 + $0xcf0] sm:$0xff] }
 0x372   : > { %v6139_v63 = vadd.f32 %v3406_v18, %v3238_v16  ;;  %v3072_v9 = vadd.f32 %v3071_v10, %v2903_v48  ;;  %2941 = vmatmul.bf16.gmra.mxu0 %v1166_v40  ;;  %v628_v18 = vld [vmem:[%s5562_s17 + $0xd50] sm:$0xff]  ;;  %v617_v40 = vld [vmem:[%s5562_s17 + $0xcf8] sm:$0xff]  ;;  %v1178_v10 = vpack.c.bf16 %v626_v17, %v614_v4 }
 0x373   : > { %3110 = vmatmul.bf16.gmra.mxu1 %v1167_v50  ;;  %v629_v50 = vld [vmem:[%s5562_s17 + $0xd58] sm:$0xff] }
 0x374   : > { %3279 = vmatmul.bf16.gmra.mxu2 %v1168_v24  ;;  %v1179_v24 = vpack.c.bf16 %v627_v14, %v615_v47 }
 0x375   : > { %3448 = vmatmul.bf16.gmra.mxu3 %v1169_v8 }
 0x377   : > { %v3240_v27 = vpop.f32.mrf.mxu2  ;;  %v2904_v38 = vpop.f32.mrf.mxu0 }
 0x378   : > { %v3409_v49 = vpop.f32.mrf.mxu3  ;;  %v3241_v57 = vadd.f32 %v3240_v27, %v3072_v9  ;;  %v3073_v53 = vpop.f32.mrf.mxu1  ;;  %v2905_v19 = vadd.f32 %v2904_v38, %v5750_v42  ;;  %v1180_v27 = vpack.c.bf16 %v628_v18, %v616_v46  ;;  %v1181_v42 = vpack.c.bf16 %v629_v50, %v617_v40  ;;  %v638_v46 = vld [vmem:[%s5562_s17 + $0xda0] sm:$0xff]  ;;  %v639_v40 = vld [vmem:[%s5562_s17 + $0xda8] sm:$0xff] }
 0x379   : > { %v650_v18 = vld [vmem:[%s5562_s17 + $0xe00] sm:$0xff]  ;;  %v651_v50 = vld [vmem:[%s5562_s17 + $0xe08] sm:$0xff] }
 0x37a   : > { %v6142_v62 = vadd.f32 %v3409_v49, %v3241_v57  ;;  %v3074_v52 = vadd.f32 %v3073_v53, %v2905_v19 }
 0x37f   : > { %v3242_v16 = vpop.f32.mrf.mxu2  ;;  %v2907_v48 = vpop.f32.mrf.mxu0 }
 0x380   : > { %v3411_v59 = vpop.f32.mrf.mxu3  ;;  %v3243_v8 = vadd.f32 %v3242_v16, %v3074_v52  ;;  %v3076_v9 = vpop.f32.mrf.mxu1  ;;  %v2908_v49 = vadd.f32 %v2907_v48, %v5752_v54  ;;  %v640_v16 = vld [vmem:[%s5562_s17 + $0xdb0] sm:$0xff] }
 0x382   : > { %v6153_v57 = vadd.f32 %v3411_v59, %v3243_v8  ;;  %v3077_v38 = vadd.f32 %v3076_v9, %v2908_v49  ;;  %2946 = vmatmul.bf16.gmra.mxu0 %v1178_v10  ;;  %v652_v59 = vld [vmem:[%s5562_s17 + $0xe10] sm:$0xff]  ;;  %v641_v10 = vld [vmem:[%s5562_s17 + $0xdb8] sm:$0xff]  ;;  %v1190_v9 = vpack.c.bf16 %v650_v18, %v638_v46 }
 0x383   : > { %3115 = vmatmul.bf16.gmra.mxu1 %v1179_v24  ;;  %v653_v24 = vld [vmem:[%s5562_s17 + $0xe18] sm:$0xff] }
 0x384   : > { %3284 = vmatmul.bf16.gmra.mxu2 %v1180_v27  ;;  %v1191_v27 = vpack.c.bf16 %v651_v50, %v639_v40 }
 0x385   : > { %3453 = vmatmul.bf16.gmra.mxu3 %v1181_v42 }
 0x387   : > { %v3245_v53 = vpop.f32.mrf.mxu2  ;;  %v2909_v4 = vpop.f32.mrf.mxu0 }
 0x388   : > { %v3414_v19 = vpop.f32.mrf.mxu3  ;;  %v3246_v52 = vadd.f32 %v3245_v53, %v3077_v38  ;;  %v3078_v17 = vpop.f32.mrf.mxu1  ;;  %v2910_v54 = vadd.f32 %v2909_v4, %v5762_v13  ;;  %v1192_v53 = vpack.c.bf16 %v652_v59, %v640_v16  ;;  %v1193_v13 = vpack.c.bf16 %v653_v24, %v641_v10  ;;  %v4992_v59 = vld [vmem:[#allocation5 + $0x250] sm:$0xff]  ;;  %v662_v24 = vld [vmem:[%s5562_s17 + $0xe60] sm:$0xff] }
 0x389   : > { %3703 = vmatpush.bf16.msra.mxu1 %v4992_v59 }
 0x38a   : > { %v6156_v47 = vadd.f32 %v3414_v19, %v3246_v52  ;;  %v3079_v14 = vadd.f32 %v3078_v17, %v2910_v54  ;;  %v5000_v17 = vld [vmem:[#allocation5 + $0x290] sm:$0xff] }
 0x38b   : > { %v4984_v54 = vld [vmem:[#allocation5 + $0x210] sm:$0xff]  ;;  %3872 = vmatpush.bf16.msra.mxu2 %v5000_v17 }
 0x38c   : > { %3534 = vmatpush.bf16.msra.mxu0 %v4984_v54 }
 0x38f   : > { %v3247_v8 = vpop.f32.mrf.mxu2  ;;  %v2912_v49 = vpop.f32.mrf.mxu0 }
 0x390   : > { %v3416_v48 = vpop.f32.mrf.mxu3  ;;  %v3248_v42 = vadd.f32 %v3247_v8, %v3079_v14  ;;  %v3081_v38 = vpop.f32.mrf.mxu1  ;;  %v2913_v19 = vadd.f32 %v2912_v49, %v5764_v28  ;;  %v674_v8 = vld [vmem:[%s5562_s17 + $0xec0] sm:$0xff]  ;;  %v665_v49 = vld [vmem:[%s5562_s17 + $0xe78] sm:$0xff] }
 0x392   : > { %v6167_v52 = vadd.f32 %v3416_v48, %v3248_v42  ;;  %v3082_v4 = vadd.f32 %v3081_v38, %v2913_v19  ;;  %2951 = vmatmul.bf16.gmra.mxu0 %v1190_v9  ;;  %v663_v48 = vld [vmem:[%s5562_s17 + $0xe68] sm:$0xff]  ;;  %v676_v42 = vld [vmem:[%s5562_s17 + $0xed0] sm:$0xff]  ;;  %v677_v38 = vld [vmem:[%s5562_s17 + $0xed8] sm:$0xff]  ;;  %v1202_v19 = vpack.c.bf16 %v674_v8, %v662_v24 }
 0x393   : > { %3120 = vmatmul.bf16.gmra.mxu1 %v1191_v27  ;;  %v675_v9 = vld [vmem:[%s5562_s17 + $0xec8] sm:$0xff]  ;;  %v664_v27 = vld [vmem:[%s5562_s17 + $0xe70] sm:$0xff] }
 0x394   : > { %3289 = vmatmul.bf16.gmra.mxu2 %v1192_v53 }
 0x395   : > { %3458 = vmatmul.bf16.gmra.mxu3 %v1193_v13 }
 0x397   : > { %v3250_v14 = vpop.f32.mrf.mxu2  ;;  %v2914_v18 = vpop.f32.mrf.mxu0 }
 0x398   : > { %v3419_v28 = vpop.f32.mrf.mxu3  ;;  %v3251_v46 = vadd.f32 %v3250_v14, %v3082_v4  ;;  %v3083_v40 = vpop.f32.mrf.mxu1  ;;  %v2915_v50 = vadd.f32 %v2914_v18, %v5774_v58  ;;  %v1203_v4 = vpack.c.bf16 %v675_v9, %v663_v48  ;;  %v1204_v14 = vpack.c.bf16 %v676_v42, %v664_v27  ;;  %v686_v27 = vld [vmem:[%s5562_s17 + $0xf20] sm:$0xff] }
 0x399   : > { %v698_v42 = vld [vmem:[%s5562_s17 + $0xf80] sm:$0xff] }
 0x39a   : > { %v6170_v16 = vadd.f32 %v3419_v28, %v3251_v46  ;;  %v3084_v10 = vadd.f32 %v3083_v40, %v2915_v50  ;;  %v1205_v28 = vpack.c.bf16 %v677_v38, %v665_v49  ;;  %v687_v49 = vld [vmem:[%s5562_s17 + $0xf28] sm:$0xff] }
 0x39b   : > { %v699_v38 = vld [vmem:[%s5562_s17 + $0xf88] sm:$0xff] }
 0x39f   : > { %v3252_v53 = vpop.f32.mrf.mxu2  ;;  %v2917_v54 = vpop.f32.mrf.mxu0 }
 0x3a0   : > { %v3421_v13 = vpop.f32.mrf.mxu3  ;;  %v3253_v17 = vadd.f32 %v3252_v53, %v3084_v10  ;;  %v3086_v58 = vpop.f32.mrf.mxu1  ;;  %v2918_v46 = vadd.f32 %v2917_v54, %v5776_v2  ;;  %v688_v53 = vld [vmem:[%s5562_s17 + $0xf30] sm:$0xff] }
 0x3a2   : > { %v6181_v18 = vadd.f32 %v3421_v13, %v3253_v17  ;;  %v3087_v40 = vadd.f32 %v3086_v58, %v2918_v46  ;;  %2956 = vmatmul.bf16.gmra.mxu0 %v1202_v19  ;;  %v700_v13 = vld [vmem:[%s5562_s17 + $0xf90] sm:$0xff]  ;;  %v689_v19 = vld [vmem:[%s5562_s17 + $0xf38] sm:$0xff]  ;;  %v1214_v58 = vpack.c.bf16 %v698_v42, %v686_v27 }
 0x3a3   : > { %3125 = vmatmul.bf16.gmra.mxu1 %v1203_v4  ;;  %v701_v4 = vld [vmem:[%s5562_s17 + $0xf98] sm:$0xff] }
 0x3a4   : > { %3294 = vmatmul.bf16.gmra.mxu2 %v1204_v14  ;;  %v1215_v14 = vpack.c.bf16 %v699_v38, %v687_v49 }
 0x3a5   : > { %3463 = vmatmul.bf16.gmra.mxu3 %v1205_v28 }
 0x3a7   : > { %v3255_v50 = vpop.f32.mrf.mxu2  ;;  %v2919_v24 = vpop.f32.mrf.mxu0 }
 0x3a8   : > { %v3424_v59 = vpop.f32.mrf.mxu3  ;;  %v3256_v10 = vadd.f32 %v3255_v50, %v3087_v40  ;;  %v3088_v8 = vpop.f32.mrf.mxu1  ;;  %v2920_v2 = vadd.f32 %v2919_v24, %v5786_v31  ;;  %v1216_v50 = vpack.c.bf16 %v700_v13, %v688_v53  ;;  %v1217_v31 = vpack.c.bf16 %v701_v4, %v689_v19  ;;  %v710_v53 = vld [vmem:[%s5562_s17 + $0xfe0] sm:$0xff]  ;;  %v711_v19 = vld [vmem:[%s5562_s17 + $0xfe8] sm:$0xff] }
 0x3a9   : > { %v722_v13 = vld [vmem:[%s5562_s17 + $0x1040] sm:$0xff]  ;;  %v723_v4 = vld [vmem:[%s5562_s17 + $0x1048] sm:$0xff] }
 0x3aa   : > { %v6184_v48 = vadd.f32 %v3424_v59, %v3256_v10  ;;  %v3089_v9 = vadd.f32 %v3088_v8, %v2920_v2 }
 0x3af   : > { %v3257_v17 = vpop.f32.mrf.mxu2  ;;  %v2922_v46 = vpop.f32.mrf.mxu0 }
 0x3b0   : > { %v3426_v54 = vpop.f32.mrf.mxu3  ;;  %v3258_v28 = vadd.f32 %v3257_v17, %v3089_v9  ;;  %v3091_v40 = vpop.f32.mrf.mxu1  ;;  %v2923_v59 = vadd.f32 %v2922_v46, %v5788_v41  ;;  %v712_v17 = vld [vmem:[%s5562_s17 + $0xff0] sm:$0xff] }
 0x3b2   : > { %v6195_v10 = vadd.f32 %v3426_v54, %v3258_v28  ;;  %v3092_v24 = vadd.f32 %v3091_v40, %v2923_v59  ;;  %2961 = vmatmul.bf16.gmra.mxu0 %v1214_v58  ;;  %v724_v54 = vld [vmem:[%s5562_s17 + $0x1050] sm:$0xff]  ;;  %v713_v58 = vld [vmem:[%s5562_s17 + $0xff8] sm:$0xff]  ;;  %v1226_v40 = vpack.c.bf16 %v722_v13, %v710_v53 }
 0x3b3   : > { %3130 = vmatmul.bf16.gmra.mxu1 %v1215_v14  ;;  %v725_v14 = vld [vmem:[%s5562_s17 + $0x1058] sm:$0xff] }
 0x3b4   : > { %3299 = vmatmul.bf16.gmra.mxu2 %v1216_v50  ;;  %v1227_v50 = vpack.c.bf16 %v723_v4, %v711_v19 }
 0x3b5   : > { %3468 = vmatmul.bf16.gmra.mxu3 %v1217_v31 }
 0x3b7   : > { %v3260_v8 = vpop.f32.mrf.mxu2  ;;  %v2924_v27 = vpop.f32.mrf.mxu0 }
 0x3b8   : > { %v3429_v2 = vpop.f32.mrf.mxu3  ;;  %v3261_v9 = vadd.f32 %v3260_v8, %v3092_v24  ;;  %v3093_v42 = vpop.f32.mrf.mxu1  ;;  %v2925_v41 = vadd.f32 %v2924_v27, %v5798_v7  ;;  %v1228_v8 = vpack.c.bf16 %v724_v54, %v712_v17  ;;  %v1229_v7 = vpack.c.bf16 %v725_v14, %v713_v58  ;;  %v734_v17 = vld [vmem:[%s5562_s17 + $0x10a0] sm:$0xff]  ;;  %v735_v58 = vld [vmem:[%s5562_s17 + $0x10a8] sm:$0xff] }
 0x3b9   : > { %v746_v54 = vld [vmem:[%s5562_s17 + $0x1100] sm:$0xff]  ;;  %v747_v14 = vld [vmem:[%s5562_s17 + $0x1108] sm:$0xff] }
 0x3ba   : > { %v6198_v49 = vadd.f32 %v3429_v2, %v3261_v9  ;;  %v3094_v38 = vadd.f32 %v3093_v42, %v2925_v41 }
 0x3bf   : > { %v3262_v28 = vpop.f32.mrf.mxu2  ;;  %v2927_v59 = vpop.f32.mrf.mxu0 }
 0x3c0   : > { %v3431_v46 = vpop.f32.mrf.mxu3  ;;  %v3263_v31 = vadd.f32 %v3262_v28, %v3094_v38  ;;  %v3096_v24 = vpop.f32.mrf.mxu1  ;;  %v2928_v2 = vadd.f32 %v2927_v59, %v5800_v21  ;;  %v736_v28 = vld [vmem:[%s5562_s17 + $0x10b0] sm:$0xff] }
 0x3c2   : > { %v6209_v9 = vadd.f32 %v3431_v46, %v3263_v31  ;;  %v3097_v27 = vadd.f32 %v3096_v24, %v2928_v2  ;;  %2966 = vmatmul.bf16.gmra.mxu0 %v1226_v40  ;;  %v748_v46 = vld [vmem:[%s5562_s17 + $0x1110] sm:$0xff]  ;;  %v737_v40 = vld [vmem:[%s5562_s17 + $0x10b8] sm:$0xff]  ;;  %v1238_v24 = vpack.c.bf16 %v746_v54, %v734_v17 }
 0x3c3   : > { %3135 = vmatmul.bf16.gmra.mxu1 %v1227_v50  ;;  %v749_v50 = vld [vmem:[%s5562_s17 + $0x1118] sm:$0xff] }
 0x3c4   : > { %3304 = vmatmul.bf16.gmra.mxu2 %v1228_v8  ;;  %v1239_v8 = vpack.c.bf16 %v747_v14, %v735_v58 }
 0x3c5   : > { %3473 = vmatmul.bf16.gmra.mxu3 %v1229_v7 }
 0x3c7   : > { %v3265_v42 = vpop.f32.mrf.mxu2  ;;  %v2929_v53 = vpop.f32.mrf.mxu0 }
 0x3c8   : > { %v3434_v41 = vpop.f32.mrf.mxu3  ;;  %v3266_v38 = vadd.f32 %v3265_v42, %v3097_v27  ;;  %v3098_v13 = vpop.f32.mrf.mxu1  ;;  %v2930_v21 = vadd.f32 %v2929_v53, %v5810_v51  ;;  %v1240_v42 = vpack.c.bf16 %v748_v46, %v736_v28  ;;  %v1241_v51 = vpack.c.bf16 %v749_v50, %v737_v40  ;;  %v4991_v46 = vld [vmem:[#allocation5 + $0x248] sm:$0xff]  ;;  %v758_v50 = vld [vmem:[%s5562_s17 + $0x1160] sm:$0xff] }
 0x3c9   : > { %3704 = vmatpush.bf16.msra.mxu1 %v4991_v46 }
 0x3ca   : > { %v6212_v19 = vadd.f32 %v3434_v41, %v3266_v38  ;;  %v3099_v4 = vadd.f32 %v3098_v13, %v2930_v21  ;;  %v4999_v13 = vld [vmem:[#allocation5 + $0x288] sm:$0xff] }
 0x3cb   : > { %v4983_v21 = vld [vmem:[#allocation5 + $0x208] sm:$0xff]  ;;  %3873 = vmatpush.bf16.msra.mxu2 %v4999_v13 }
 0x3cc   : > { %3535 = vmatpush.bf16.msra.mxu0 %v4983_v21 }
 0x3cf   : > { %v3267_v31 = vpop.f32.mrf.mxu2  ;;  %v2932_v2 = vpop.f32.mrf.mxu0 }
 0x3d0   : > { %v3436_v59 = vpop.f32.mrf.mxu3  ;;  %v3268_v7 = vadd.f32 %v3267_v31, %v3099_v4  ;;  %v3101_v27 = vpop.f32.mrf.mxu1  ;;  %v2933_v41 = vadd.f32 %v2932_v2, %v5812_v3  ;;  %v770_v31 = vld [vmem:[%s5562_s17 + $0x11c0] sm:$0xff]  ;;  %v761_v2 = vld [vmem:[%s5562_s17 + $0x1178] sm:$0xff] }
 0x3d2   : > { %v6223_v38 = vadd.f32 %v3436_v59, %v3268_v7  ;;  %v3102_v53 = vadd.f32 %v3101_v27, %v2933_v41  ;;  %2971 = vmatmul.bf16.gmra.mxu0 %v1238_v24  ;;  %v759_v59 = vld [vmem:[%s5562_s17 + $0x1168] sm:$0xff]  ;;  %v772_v7 = vld [vmem:[%s5562_s17 + $0x11d0] sm:$0xff]  ;;  %v773_v27 = vld [vmem:[%s5562_s17 + $0x11d8] sm:$0xff]  ;;  %v1250_v41 = vpack.c.bf16 %v770_v31, %v758_v50 }
 0x3d3   : > { %3140 = vmatmul.bf16.gmra.mxu1 %v1239_v8  ;;  %v771_v24 = vld [vmem:[%s5562_s17 + $0x11c8] sm:$0xff]  ;;  %v760_v8 = vld [vmem:[%s5562_s17 + $0x1170] sm:$0xff] }
 0x3d4   : > { %3309 = vmatmul.bf16.gmra.mxu2 %v1240_v42 }
 0x3d5   : > { %3478 = vmatmul.bf16.gmra.mxu3 %v1241_v51 }
 0x3d7   : > { %v3270_v4 = vpop.f32.mrf.mxu2  ;;  %v2934_v54 = vpop.f32.mrf.mxu0 }
 0x3d8   : > { %v3439_v3 = vpop.f32.mrf.mxu3  ;;  %v3271_v17 = vadd.f32 %v3270_v4, %v3102_v53  ;;  %v3103_v58 = vpop.f32.mrf.mxu1  ;;  %v2935_v14 = vadd.f32 %v2934_v54, %v5822_v37  ;;  %v1251_v53 = vpack.c.bf16 %v771_v24, %v759_v59  ;;  %v1252_v4 = vpack.c.bf16 %v772_v7, %v760_v8  ;;  %v782_v8 = vld [vmem:[%s5562_s17 + $0x1220] sm:$0xff] }
 0x3d9   : > { %v794_v7 = vld [vmem:[%s5562_s17 + $0x1280] sm:$0xff] }
 0x3da   : > { %v6226_v28 = vadd.f32 %v3439_v3, %v3271_v17  ;;  %v3104_v40 = vadd.f32 %v3103_v58, %v2935_v14  ;;  %v1253_v3 = vpack.c.bf16 %v773_v27, %v761_v2  ;;  %v783_v2 = vld [vmem:[%s5562_s17 + $0x1228] sm:$0xff] }
 0x3db   : > { %v795_v27 = vld [vmem:[%s5562_s17 + $0x1288] sm:$0xff] }
 0x3df   : > { %v3272_v42 = vpop.f32.mrf.mxu2  ;;  %v2937_v21 = vpop.f32.mrf.mxu0 }
 0x3e0   : > { %v3441_v51 = vpop.f32.mrf.mxu3  ;;  %v3273_v13 = vadd.f32 %v3272_v42, %v3104_v40  ;;  %v3106_v37 = vpop.f32.mrf.mxu1  ;;  %v2938_v17 = vadd.f32 %v2937_v21, %v5824_v55  ;;  %v784_v42 = vld [vmem:[%s5562_s17 + $0x1230] sm:$0xff] }
 0x3e2   : > { %v6237_v54 = vadd.f32 %v3441_v51, %v3273_v13  ;;  %v3107_v58 = vadd.f32 %v3106_v37, %v2938_v17  ;;  %2976 = vmatmul.bf16.gmra.mxu0 %v1250_v41  ;;  %v796_v51 = vld [vmem:[%s5562_s17 + $0x1290] sm:$0xff]  ;;  %v785_v41 = vld [vmem:[%s5562_s17 + $0x1238] sm:$0xff]  ;;  %v1262_v37 = vpack.c.bf16 %v794_v7, %v782_v8 }
 0x3e3   : > { %3145 = vmatmul.bf16.gmra.mxu1 %v1251_v53  ;;  %v797_v53 = vld [vmem:[%s5562_s17 + $0x1298] sm:$0xff] }
 0x3e4   : > { %3314 = vmatmul.bf16.gmra.mxu2 %v1252_v4  ;;  %v1263_v4 = vpack.c.bf16 %v795_v27, %v783_v2 }
 0x3e5   : > { %3483 = vmatmul.bf16.gmra.mxu3 %v1253_v3 }
 0x3e7   : > { %v3275_v14 = vpop.f32.mrf.mxu2  ;;  %v2939_v50 = vpop.f32.mrf.mxu0 }
 0x3e8   : > { %v3444_v46 = vpop.f32.mrf.mxu3  ;;  %v3276_v40 = vadd.f32 %v3275_v14, %v3107_v58  ;;  %v3108_v31 = vpop.f32.mrf.mxu1  ;;  %v2940_v55 = vadd.f32 %v2939_v50, %v5834_v25  ;;  %v1264_v14 = vpack.c.bf16 %v796_v51, %v784_v42  ;;  %v1265_v25 = vpack.c.bf16 %v797_v53, %v785_v41  ;;  %v806_v42 = vld [vmem:[%s5562_s17 + $0x12e0] sm:$0xff]  ;;  %v807_v41 = vld [vmem:[%s5562_s17 + $0x12e8] sm:$0xff] }
 0x3e9   : > { %v818_v51 = vld [vmem:[%s5562_s17 + $0x1340] sm:$0xff]  ;;  %v819_v53 = vld [vmem:[%s5562_s17 + $0x1348] sm:$0xff] }
 0x3ea   : > { %v6240_v59 = vadd.f32 %v3444_v46, %v3276_v40  ;;  %v3109_v24 = vadd.f32 %v3108_v31, %v2940_v55 }
 0x3ef   : > { %v3277_v13 = vpop.f32.mrf.mxu2  ;;  %v2942_v17 = vpop.f32.mrf.mxu0 }
 0x3f0   : > { %v3446_v21 = vpop.f32.mrf.mxu3  ;;  %v3278_v3 = vadd.f32 %v3277_v13, %v3109_v24  ;;  %v3111_v58 = vpop.f32.mrf.mxu1  ;;  %v2943_v46 = vadd.f32 %v2942_v17, %v5836_v35  ;;  %v808_v13 = vld [vmem:[%s5562_s17 + $0x12f0] sm:$0xff] }
 0x3f2   : > { %v6251_v40 = vadd.f32 %v3446_v21, %v3278_v3  ;;  %v3112_v50 = vadd.f32 %v3111_v58, %v2943_v46  ;;  %2981 = vmatmul.bf16.gmra.mxu0 %v1262_v37  ;;  %v820_v21 = vld [vmem:[%s5562_s17 + $0x1350] sm:$0xff]  ;;  %v809_v37 = vld [vmem:[%s5562_s17 + $0x12f8] sm:$0xff]  ;;  %v1274_v58 = vpack.c.bf16 %v818_v51, %v806_v42 }
 0x3f3   : > { %3150 = vmatmul.bf16.gmra.mxu1 %v1263_v4  ;;  %v821_v4 = vld [vmem:[%s5562_s17 + $0x1358] sm:$0xff] }
 0x3f4   : > { %3319 = vmatmul.bf16.gmra.mxu2 %v1264_v14  ;;  %v1275_v14 = vpack.c.bf16 %v819_v53, %v807_v41 }
 0x3f5   : > { %3488 = vmatmul.bf16.gmra.mxu3 %v1265_v25 }
 0x3f7   : > { %v3280_v31 = vpop.f32.mrf.mxu2  ;;  %v2944_v8 = vpop.f32.mrf.mxu0 }
 0x3f8   : > { %v3449_v55 = vpop.f32.mrf.mxu3  ;;  %v3281_v24 = vadd.f32 %v3280_v31, %v3112_v50  ;;  %v3113_v7 = vpop.f32.mrf.mxu1  ;;  %v2945_v35 = vadd.f32 %v2944_v8, %v5846_v11  ;;  %v1276_v31 = vpack.c.bf16 %v820_v21, %v808_v13  ;;  %v1277_v11 = vpack.c.bf16 %v821_v4, %v809_v37  ;;  %v830_v13 = vld [vmem:[%s5562_s17 + $0x13a0] sm:$0xff]  ;;  %v831_v37 = vld [vmem:[%s5562_s17 + $0x13a8] sm:$0xff] }
 0x3f9   : > { %v842_v21 = vld [vmem:[%s5562_s17 + $0x1400] sm:$0xff]  ;;  %v843_v4 = vld [vmem:[%s5562_s17 + $0x1408] sm:$0xff] }
 0x3fa   : > { %v6254_v2 = vadd.f32 %v3449_v55, %v3281_v24  ;;  %v3114_v27 = vadd.f32 %v3113_v7, %v2945_v35 }
 0x3ff   : > { %v3282_v3 = vpop.f32.mrf.mxu2  ;;  %v2947_v46 = vpop.f32.mrf.mxu0 }
 0x400   : > { %v3451_v17 = vpop.f32.mrf.mxu3  ;;  %v3283_v25 = vadd.f32 %v3282_v3, %v3114_v27  ;;  %v3116_v50 = vpop.f32.mrf.mxu1  ;;  %v2948_v55 = vadd.f32 %v2947_v46, %v5848_v26  ;;  %v832_v3 = vld [vmem:[%s5562_s17 + $0x13b0] sm:$0xff] }
 0x402   : > { %v6265_v24 = vadd.f32 %v3451_v17, %v3283_v25  ;;  %v3117_v8 = vadd.f32 %v3116_v50, %v2948_v55  ;;  %2986 = vmatmul.bf16.gmra.mxu0 %v1274_v58  ;;  %v844_v17 = vld [vmem:[%s5562_s17 + $0x1410] sm:$0xff]  ;;  %v833_v58 = vld [vmem:[%s5562_s17 + $0x13b8] sm:$0xff]  ;;  %v1286_v50 = vpack.c.bf16 %v842_v21, %v830_v13 }
 0x403   : > { %3155 = vmatmul.bf16.gmra.mxu1 %v1275_v14  ;;  %v845_v14 = vld [vmem:[%s5562_s17 + $0x1418] sm:$0xff] }
 0x404   : > { %3324 = vmatmul.bf16.gmra.mxu2 %v1276_v31  ;;  %v1287_v31 = vpack.c.bf16 %v843_v4, %v831_v37 }
 0x405   : > { %3493 = vmatmul.bf16.gmra.mxu3 %v1277_v11 }
 0x407   : > { %v3285_v7 = vpop.f32.mrf.mxu2  ;;  %v2949_v42 = vpop.f32.mrf.mxu0 }
 0x408   : > { %v3454_v35 = vpop.f32.mrf.mxu3  ;;  %v3286_v27 = vadd.f32 %v3285_v7, %v3117_v8  ;;  %v3118_v51 = vpop.f32.mrf.mxu1  ;;  %v2950_v26 = vadd.f32 %v2949_v42, %v5858_v0  ;;  %v1288_v7 = vpack.c.bf16 %v844_v17, %v832_v3  ;;  %v1289_v0 = vpack.c.bf16 %v845_v14, %v833_v58  ;;  %v4990_v17 = vld [vmem:[#allocation5 + $0x240] sm:$0xff] }
 0x409   : > { %v854_v14 = vld [vmem:[%s5562_s17 + $0x1460] sm:$0xff]  ;;  %3705 = vmatpush.bf16.msra.mxu1 %v4990_v17 }
 0x40a   : > { %v6268_v41 = vadd.f32 %v3454_v35, %v3286_v27  ;;  %v3119_v53 = vadd.f32 %v3118_v51, %v2950_v26  ;;  %v4998_v51 = vld [vmem:[#allocation5 + $0x280] sm:$0xff] }
 0x40b   : > { %v4982_v26 = vld [vmem:[#allocation5 + $0x200] sm:$0xff]  ;;  %3874 = vmatpush.bf16.msra.mxu2 %v4998_v51 }
 0x40c   : > { %3536 = vmatpush.bf16.msra.mxu0 %v4982_v26 }
 0x40f   : > { %v3287_v25 = vpop.f32.mrf.mxu2  ;;  %v2952_v55 = vpop.f32.mrf.mxu0 }
 0x410   : > { %v3456_v46 = vpop.f32.mrf.mxu3  ;;  %v3288_v11 = vadd.f32 %v3287_v25, %v3119_v53  ;;  %v3121_v8 = vpop.f32.mrf.mxu1  ;;  %v2953_v35 = vadd.f32 %v2952_v55, %v5860_v23  ;;  %v866_v25 = vld [vmem:[%s5562_s17 + $0x14c0] sm:$0xff]  ;;  %v857_v55 = vld [vmem:[%s5562_s17 + $0x1478] sm:$0xff] }
 0x412   : > { %v6279_v27 = vadd.f32 %v3456_v46, %v3288_v11  ;;  %v3122_v42 = vadd.f32 %v3121_v8, %v2953_v35  ;;  %2991 = vmatmul.bf16.gmra.mxu0 %v1286_v50  ;;  %v855_v46 = vld [vmem:[%s5562_s17 + $0x1468] sm:$0xff]  ;;  %v868_v11 = vld [vmem:[%s5562_s17 + $0x14d0] sm:$0xff]  ;;  %v869_v8 = vld [vmem:[%s5562_s17 + $0x14d8] sm:$0xff]  ;;  %v1298_v35 = vpack.c.bf16 %v866_v25, %v854_v14 }
 0x413   : > { %3160 = vmatmul.bf16.gmra.mxu1 %v1287_v31  ;;  %v867_v50 = vld [vmem:[%s5562_s17 + $0x14c8] sm:$0xff]  ;;  %v856_v31 = vld [vmem:[%s5562_s17 + $0x1470] sm:$0xff] }
 0x414   : > { %3329 = vmatmul.bf16.gmra.mxu2 %v1288_v7 }
 0x415   : > { %3498 = vmatmul.bf16.gmra.mxu3 %v1289_v0 }
 0x417   : > { %v3290_v53 = vpop.f32.mrf.mxu2  ;;  %v2954_v21 = vpop.f32.mrf.mxu0 }
 0x418   : > { %v3459_v23 = vpop.f32.mrf.mxu3  ;;  %v3291_v13 = vadd.f32 %v3290_v53, %v3122_v42  ;;  %v3123_v37 = vpop.f32.mrf.mxu1  ;;  %v2955_v4 = vadd.f32 %v2954_v21, %v5870_v5  ;;  %v1299_v42 = vpack.c.bf16 %v867_v50, %v855_v46  ;;  %v1300_v53 = vpack.c.bf16 %v868_v11, %v856_v31  ;;  %v878_v31 = vld [vmem:[%s5562_s17 + $0x1520] sm:$0xff] }
 0x419   : > { %v890_v11 = vld [vmem:[%s5562_s17 + $0x1580] sm:$0xff] }
 0x41a   : > { %v6282_v3 = vadd.f32 %v3459_v23, %v3291_v13  ;;  %v3124_v58 = vadd.f32 %v3123_v37, %v2955_v4  ;;  %v1301_v23 = vpack.c.bf16 %v869_v8, %v857_v55  ;;  %v879_v55 = vld [vmem:[%s5562_s17 + $0x1528] sm:$0xff] }
 0x41b   : > { %v891_v8 = vld [vmem:[%s5562_s17 + $0x1588] sm:$0xff] }
 0x41f   : > { %v3292_v7 = vpop.f32.mrf.mxu2  ;;  %v2957_v26 = vpop.f32.mrf.mxu0 }
 0x420   : > { %v3461_v0 = vpop.f32.mrf.mxu3  ;;  %v3293_v51 = vadd.f32 %v3292_v7, %v3124_v58  ;;  %v3126_v5 = vpop.f32.mrf.mxu1  ;;  %v2958_v13 = vadd.f32 %v2957_v26, %v5872_v22  ;;  %v880_v7 = vld [vmem:[%s5562_s17 + $0x1530] sm:$0xff] }
 0x422   : > { %v6293_v21 = vadd.f32 %v3461_v0, %v3293_v51  ;;  %v3127_v37 = vadd.f32 %v3126_v5, %v2958_v13  ;;  %2996 = vmatmul.bf16.gmra.mxu0 %v1298_v35  ;;  %v892_v0 = vld [vmem:[%s5562_s17 + $0x1590] sm:$0xff]  ;;  %v881_v35 = vld [vmem:[%s5562_s17 + $0x1538] sm:$0xff]  ;;  %v1310_v5 = vpack.c.bf16 %v890_v11, %v878_v31 }
 0x423   : > { %3165 = vmatmul.bf16.gmra.mxu1 %v1299_v42  ;;  %v893_v42 = vld [vmem:[%s5562_s17 + $0x1598] sm:$0xff] }
 0x424   : > { %3334 = vmatmul.bf16.gmra.mxu2 %v1300_v53  ;;  %v1311_v53 = vpack.c.bf16 %v891_v8, %v879_v55  ;;  %v6892_v8 = vld [vmem:[#allocation12_spill] sm:$0xff] }
 0x425   : > { %3503 = vmatmul.bf16.gmra.mxu3 %v1301_v23 }
 0x427   : > { %v3295_v4 = vpop.f32.mrf.mxu2  ;;  %v2959_v14 = vpop.f32.mrf.mxu0 }
 0x428   : > { %v3464_v17 = vpop.f32.mrf.mxu3  ;;  %v3296_v58 = vadd.f32 %v3295_v4, %v3127_v37  ;;  %v3128_v25 = vpop.f32.mrf.mxu1  ;;  %v2960_v22 = vadd.f32 %v2959_v14, %v5882_v1  ;;  %v1312_v4 = vpack.c.bf16 %v892_v0, %v880_v7  ;;  %v1313_v1 = vpack.c.bf16 %v893_v42, %v881_v35  ;;  %v902_v42 = vld [vmem:[%s5562_s17 + $0x15e0] sm:$0xff] }
 0x42a   : > { %v6296_v46 = vadd.f32 %v3464_v17, %v3296_v58  ;;  %v3129_v50 = vadd.f32 %v3128_v25, %v2960_v22  ;;  %v6890_v17 = vld [vmem:[#allocation11_spill] sm:$0xff] }
 0x42c   : > { %6889 = vst [vmem:[#allocation33_spill] sm:$0xff] %v6296_v46 }
 0x42f   : > { %v3297_v51 = vpop.f32.mrf.mxu2  ;;  %v2962_v13 = vpop.f32.mrf.mxu0 }
 0x430   : > { %v3466_v26 = vpop.f32.mrf.mxu3  ;;  %v3298_v23 = vadd.f32 %v3297_v51, %v3129_v50  ;;  %v3131_v37 = vpop.f32.mrf.mxu1  ;;  %v2963_v58 = vadd.f32 %v2962_v13, %v6890_v17  ;;  %v914_v51 = vld [vmem:[%s5562_s17 + $0x1640] sm:$0xff]  ;;  %v905_v13 = vld [vmem:[%s5562_s17 + $0x15f8] sm:$0xff] }
 0x431   : > { %v1322_v17 = vpack.c.bf16 %v914_v51, %v902_v42 }
 0x432   : > { %v6307_v14 = vadd.f32 %v3466_v26, %v3298_v23  ;;  %v3132_v25 = vadd.f32 %v3131_v37, %v2963_v58  ;;  %3001 = vmatmul.bf16.gmra.mxu0 %v1310_v5  ;;  %v903_v26 = vld [vmem:[%s5562_s17 + $0x15e8] sm:$0xff]  ;;  %v916_v23 = vld [vmem:[%s5562_s17 + $0x1650] sm:$0xff]  ;;  %v917_v37 = vld [vmem:[%s5562_s17 + $0x1658] sm:$0xff] }
 0x433   : > { %3170 = vmatmul.bf16.gmra.mxu1 %v1311_v53  ;;  %v915_v5 = vld [vmem:[%s5562_s17 + $0x1648] sm:$0xff]  ;;  %v904_v53 = vld [vmem:[%s5562_s17 + $0x15f0] sm:$0xff] }
 0x434   : > { %6891 = vst [vmem:[#allocation11_spill] sm:$0xff] %v6307_v14  ;;  %3339 = vmatmul.bf16.gmra.mxu2 %v1312_v4  ;;  %v1323_v58 = vpack.c.bf16 %v915_v5, %v903_v26  ;;  %v1324_v46 = vpack.c.bf16 %v916_v23, %v904_v53 }
 0x435   : > { %3508 = vmatmul.bf16.gmra.mxu3 %v1313_v1 }
 0x437   : > { %v3300_v22 = vpop.f32.mrf.mxu2  ;;  %v2964_v11 = vpop.f32.mrf.mxu0 }
 0x438   : > { %v3469_v50 = vpop.f32.mrf.mxu3  ;;  %v3301_v31 = vadd.f32 %v3300_v22, %v3132_v25  ;;  %v3133_v55 = vpop.f32.mrf.mxu1  ;;  %v2965_v7 = vadd.f32 %v2964_v11, %v6892_v8  ;;  %v1325_v11 = vpack.c.bf16 %v917_v37, %v905_v13  ;;  %v938_v13 = vld [vmem:[%s5562_s17 + $0x1700] sm:$0xff]  ;;  %v927_v37 = vld [vmem:[%s5562_s17 + $0x16a8] sm:$0xff] }
 0x43a   : > { %v6310_v0 = vadd.f32 %v3469_v50, %v3301_v31  ;;  %v3134_v35 = vadd.f32 %v3133_v55, %v2965_v7  ;;  %v6893_v50 = vld [vmem:[#allocation13_spill] sm:$0xff] }
 0x43f   : > { %v3302_v4 = vpop.f32.mrf.mxu2  ;;  %v2967_v22 = vpop.f32.mrf.mxu0 }
 0x440   : > { %v3471_v1 = vpop.f32.mrf.mxu3  ;;  %v3303_v25 = vadd.f32 %v3302_v4, %v3134_v35  ;;  %v3136_v14 = vpop.f32.mrf.mxu1  ;;  %v2968_v31 = vadd.f32 %v2967_v22, %v6893_v50  ;;  %v939_v4 = vld [vmem:[%s5562_s17 + $0x1708] sm:$0xff] }
 0x441   : > { %v1335_v50 = vpack.c.bf16 %v939_v4, %v927_v37  ;;  %v6898_v4 = vld [vmem:[#allocation15_spill] sm:$0xff] }
 0x442   : > { %v6321_v55 = vadd.f32 %v3471_v1, %v3303_v25  ;;  %v3137_v8 = vadd.f32 %v3136_v14, %v2968_v31  ;;  %3006 = vmatmul.bf16.gmra.mxu0 %v1322_v17  ;;  %v926_v14 = vld [vmem:[%s5562_s17 + $0x16a0] sm:$0xff]  ;;  %v928_v1 = vld [vmem:[%s5562_s17 + $0x16b0] sm:$0xff] }
 0x443   : > { %3175 = vmatmul.bf16.gmra.mxu1 %v1323_v58  ;;  %v940_v17 = vld [vmem:[%s5562_s17 + $0x1710] sm:$0xff]  ;;  %v941_v58 = vld [vmem:[%s5562_s17 + $0x1718] sm:$0xff] }
 0x444   : > { %6894 = vst [vmem:[#allocation12_spill] sm:$0xff] %v6321_v55  ;;  %3344 = vmatmul.bf16.gmra.mxu2 %v1324_v46  ;;  %v929_v46 = vld [vmem:[%s5562_s17 + $0x16b8] sm:$0xff]  ;;  %v1336_v55 = vpack.c.bf16 %v940_v17, %v928_v1 }
 0x445   : > { %3513 = vmatmul.bf16.gmra.mxu3 %v1325_v11  ;;  %v1334_v11 = vpack.c.bf16 %v938_v13, %v926_v14 }
 0x447   : > { %v3305_v7 = vpop.f32.mrf.mxu2  ;;  %v2969_v51 = vpop.f32.mrf.mxu0 }
 0x448   : > { %v3474_v35 = vpop.f32.mrf.mxu3  ;;  %v3306_v42 = vadd.f32 %v3305_v7, %v3137_v8  ;;  %v3138_v26 = vpop.f32.mrf.mxu1  ;;  %v2970_v5 = vadd.f32 %v2969_v51, %v5906_v15  ;;  %v1337_v15 = vpack.c.bf16 %v941_v58, %v929_v46  ;;  %v950_v58 = vld [vmem:[%s5562_s17 + $0x1760] sm:$0xff] }
 0x44a   : > { %v6324_v53 = vadd.f32 %v3474_v35, %v3306_v42  ;;  %v3139_v23 = vadd.f32 %v3138_v26, %v2970_v5  ;;  %v6896_v35 = vld [vmem:[#allocation14_spill] sm:$0xff] }
 0x44c   : > { %6895 = vst [vmem:[#allocation13_spill] sm:$0xff] %v6324_v53 }
 0x44f   : > { %v3307_v25 = vpop.f32.mrf.mxu2  ;;  %v2972_v8 = vpop.f32.mrf.mxu0 }
 0x450   : > { %v3476_v22 = vpop.f32.mrf.mxu3  ;;  %v3308_v31 = vadd.f32 %v3307_v25, %v3139_v23  ;;  %v3141_v7 = vpop.f32.mrf.mxu1  ;;  %v2973_v42 = vadd.f32 %v2972_v8, %v6896_v35  ;;  %v962_v25 = vld [vmem:[%s5562_s17 + $0x17c0] sm:$0xff]  ;;  %v965_v8 = vld [vmem:[%s5562_s17 + $0x17d8] sm:$0xff] }
 0x451   : > { %v1346_v35 = vpack.c.bf16 %v962_v25, %v950_v58 }
 0x452   : > { %v6335_v51 = vadd.f32 %v3476_v22, %v3308_v31  ;;  %v3142_v26 = vadd.f32 %v3141_v7, %v2973_v42  ;;  %3011 = vmatmul.bf16.gmra.mxu0 %v1334_v11  ;;  %v951_v22 = vld [vmem:[%s5562_s17 + $0x1768] sm:$0xff]  ;;  %v964_v31 = vld [vmem:[%s5562_s17 + $0x17d0] sm:$0xff] }
 0x453   : > { %3180 = vmatmul.bf16.gmra.mxu1 %v1335_v50  ;;  %v963_v11 = vld [vmem:[%s5562_s17 + $0x17c8] sm:$0xff]  ;;  %v952_v50 = vld [vmem:[%s5562_s17 + $0x1770] sm:$0xff] }
 0x454   : > { %6897 = vst [vmem:[#allocation14_spill] sm:$0xff] %v6335_v51  ;;  %3349 = vmatmul.bf16.gmra.mxu2 %v1336_v55  ;;  %v953_v55 = vld [vmem:[%s5562_s17 + $0x1778] sm:$0xff]  ;;  %v1347_v42 = vpack.c.bf16 %v963_v11, %v951_v22  ;;  %v1348_v53 = vpack.c.bf16 %v964_v31, %v952_v50  ;;  %v6902_v11 = vld [vmem:[#allocation17_spill] sm:$0xff] }
 0x455   : > { %3518 = vmatmul.bf16.gmra.mxu3 %v1337_v15 }
 0x457   : > { %v3310_v5 = vpop.f32.mrf.mxu2  ;;  %v2974_v13 = vpop.f32.mrf.mxu0 }
 0x458   : > { %v3479_v23 = vpop.f32.mrf.mxu3  ;;  %v3311_v14 = vadd.f32 %v3310_v5, %v3142_v26  ;;  %v3143_v37 = vpop.f32.mrf.mxu1  ;;  %v2975_v1 = vadd.f32 %v2974_v13, %v6898_v4  ;;  %v1349_v13 = vpack.c.bf16 %v965_v8, %v953_v55  ;;  %v222_v8 = vld [vmem:[%s5562_s17 + $0xa0] sm:$0xff] }
 0x45a   : > { %v6338_v17 = vadd.f32 %v3479_v23, %v3311_v14  ;;  %v3144_v46 = vadd.f32 %v3143_v37, %v2975_v1  ;;  %v6900_v23 = vld [vmem:[#allocation16_spill] sm:$0xff] }
 0x45c   : > { %6899 = vst [vmem:[#allocation15_spill] sm:$0xff] %v6338_v17 }
 0x45f   : > { %v3312_v7 = vpop.f32.mrf.mxu2  ;;  %v2977_v5 = vpop.f32.mrf.mxu0 }
 0x460   : > { %v3481_v15 = vpop.f32.mrf.mxu3  ;;  %v3313_v26 = vadd.f32 %v3312_v7, %v3144_v46  ;;  %v3146_v51 = vpop.f32.mrf.mxu1  ;;  %v2978_v14 = vadd.f32 %v2977_v5, %v6900_v23  ;;  %v211_v7 = vld [vmem:[%s5562_s17 + $0x48] sm:$0xff] }
 0x462   : > { %v6349_v37 = vadd.f32 %v3481_v15, %v3313_v26  ;;  %v3147_v4 = vadd.f32 %v3146_v51, %v2978_v14  ;;  %3016 = vmatmul.bf16.gmra.mxu0 %v1346_v35  ;;  %v210_v51 = vld [vmem:[%s5562_s17 + $0x40] sm:$0xff]  ;;  %v223_v15 = vld [vmem:[%s5562_s17 + $0xa8] sm:$0xff]  ;;  %v212_v35 = vld [vmem:[%s5562_s17 + $0x50] sm:$0xff] }
 0x463   : > { %3185 = vmatmul.bf16.gmra.mxu1 %v1347_v42  ;;  %v224_v42 = vld [vmem:[%s5562_s17 + $0xb0] sm:$0xff]  ;;  %v225_v26 = vld [vmem:[%s5562_s17 + $0xb8] sm:$0xff]  ;;  %v978_v23 = vpack.c.bf16 %v222_v8, %v210_v51  ;;  %v979_v14 = vpack.c.bf16 %v223_v15, %v211_v7 }
 0x464   : > { %6901 = vst [vmem:[#allocation16_spill] sm:$0xff] %v6349_v37  ;;  %3354 = vmatmul.bf16.gmra.mxu2 %v1348_v53  ;;  %v213_v53 = vld [vmem:[%s5562_s17 + $0x58] sm:$0xff]  ;;  %v980_v17 = vpack.c.bf16 %v224_v42, %v212_v35  ;;  %v6906_v15 = vld [vmem:[#allocation19_spill] sm:$0xff] }
 0x465   : > { %3523 = vmatmul.bf16.gmra.mxu3 %v1349_v13 }
 0x467   : > { %v3315_v1 = vpop.f32.mrf.mxu2  ;;  %v2979_v25 = vpop.f32.mrf.mxu0 }
 0x468   : > { %v3484_v46 = vpop.f32.mrf.mxu3  ;;  %v3316_v58 = vadd.f32 %v3315_v1, %v3147_v4  ;;  %v3148_v22 = vpop.f32.mrf.mxu1  ;;  %v2980_v50 = vadd.f32 %v2979_v25, %v6902_v11  ;;  %v981_v25 = vpack.c.bf16 %v225_v26, %v213_v53  ;;  %v234_v53 = vld [vmem:[%s5562_s17 + $0x100] sm:$0xff] }
 0x469   : > { %v246_v26 = vld [vmem:[%s5562_s17 + $0x160] sm:$0xff] }
 0x46a   : > { %v6352_v31 = vadd.f32 %v3484_v46, %v3316_v58  ;;  %v3149_v55 = vadd.f32 %v3148_v22, %v2980_v50  ;;  %v6904_v46 = vld [vmem:[#allocation18_spill] sm:$0xff] }
 0x46c   : > { %6903 = vst [vmem:[#allocation17_spill] sm:$0xff] %v6352_v31 }
 0x46f   : > { %v3317_v5 = vpop.f32.mrf.mxu2  ;;  %v2982_v1 = vpop.f32.mrf.mxu0 }
 0x470   : > { %v3486_v13 = vpop.f32.mrf.mxu3  ;;  %v3318_v4 = vadd.f32 %v3317_v5, %v3149_v55  ;;  %v3151_v37 = vpop.f32.mrf.mxu1  ;;  %v2983_v58 = vadd.f32 %v2982_v1, %v6904_v46  ;;  %v235_v5 = vld [vmem:[%s5562_s17 + $0x108] sm:$0xff]  ;;  %v990_v46 = vpack.c.bf16 %v246_v26, %v234_v53 }
 0x472   : > { %v6363_v22 = vadd.f32 %v3486_v13, %v3318_v4  ;;  %v3152_v11 = vadd.f32 %v3151_v37, %v2983_v58  ;;  %3537 = vmatmul.bf16.vlgmr.msra.gmra.mxu0 %v978_v23  ;;  %v247_v13 = vld [vmem:[%s5562_s17 + $0x168] sm:$0xff]  ;;  %v236_v23 = vld [vmem:[%s5562_s17 + $0x110] sm:$0xff]  ;;  %v249_v4 = vld [vmem:[%s5562_s17 + $0x178] sm:$0xff] }
 0x473   : > { %3706 = vmatmul.bf16.vlgmr.msra.gmra.mxu1 %v979_v14  ;;  %v237_v14 = vld [vmem:[%s5562_s17 + $0x118] sm:$0xff]  ;;  %v991_v58 = vpack.c.bf16 %v247_v13, %v235_v5  ;;  %v6910_v13 = vld [vmem:[#allocation21_spill] sm:$0xff] }
 0x474   : > { %6905 = vst [vmem:[#allocation18_spill] sm:$0xff] %v6363_v22  ;;  %3875 = vmatmul.bf16.vlgmr.msra.gmra.mxu2 %v980_v17  ;;  %v248_v17 = vld [vmem:[%s5562_s17 + $0x170] sm:$0xff] }
 0x475   : > { %4877 = vmatmul.msk.bf16.vlgmr.msra.gmra.mxu3 %vm2073_vm2, %v981_v25  ;;  %v992_v31 = vpack.c.bf16 %v248_v17, %v236_v23 }
 0x477   : > { %v3320_v50 = vpop.f32.mrf.mxu2  ;;  %v2984_v8 = vpop.f32.mrf.mxu0 }
 0x478   : > { %v3489_v55 = vpop.f32.mrf.mxu3  ;;  %v3321_v51 = vadd.f32 %v3320_v50, %v3152_v11  ;;  %v3153_v7 = vpop.f32.mrf.mxu1  ;;  %v2985_v35 = vadd.f32 %v2984_v8, %v6906_v15  ;;  %v993_v8 = vpack.c.bf16 %v249_v4, %v237_v14  ;;  %v258_v14 = vld [vmem:[%s5562_s17 + $0x1c0] sm:$0xff] }
 0x479   : > { %v270_v4 = vld [vmem:[%s5562_s17 + $0x220] sm:$0xff] }
 0x47a   : > { %v6367_v42 = vadd.f32 %v3489_v55, %v3321_v51  ;;  %v3154_v37 = vadd.f32 %v3153_v7, %v2985_v35  ;;  %v6908_v55 = vld [vmem:[#allocation20_spill] sm:$0xff] }
 0x47c   : > { %6907 = vst [vmem:[#allocation19_spill] sm:$0xff] %v6367_v42 }
 0x47f   : > { %v3322_v1 = vpop.f32.mrf.mxu2  ;;  %v2987_v50 = vpop.f32.mrf.mxu0 }
 0x480   : > { %v3491_v25 = vpop.f32.mrf.mxu3  ;;  %v3323_v11 = vadd.f32 %v3322_v1, %v3154_v37  ;;  %v3156_v22 = vpop.f32.mrf.mxu1  ;;  %v2988_v51 = vadd.f32 %v2987_v50, %v6908_v55  ;;  %v259_v1 = vld [vmem:[%s5562_s17 + $0x1c8] sm:$0xff]  ;;  %v1002_v55 = vpack.c.bf16 %v270_v4, %v258_v14 }
 0x482   : > { %v6378_v7 = vadd.f32 %v3491_v25, %v3323_v11  ;;  %v3157_v15 = vadd.f32 %v3156_v22, %v2988_v51  ;;  %3542 = vmatmul.bf16.gmra.mxu0 %v990_v46  ;;  %v271_v25 = vld [vmem:[%s5562_s17 + $0x228] sm:$0xff]  ;;  %v260_v46 = vld [vmem:[%s5562_s17 + $0x1d0] sm:$0xff]  ;;  %v273_v11 = vld [vmem:[%s5562_s17 + $0x238] sm:$0xff] }
 0x483   : > { %3711 = vmatmul.bf16.gmra.mxu1 %v991_v58  ;;  %v261_v58 = vld [vmem:[%s5562_s17 + $0x1d8] sm:$0xff]  ;;  %v1003_v51 = vpack.c.bf16 %v271_v25, %v259_v1  ;;  %v6914_v25 = vld [vmem:[#allocation23_spill] sm:$0xff] }
 0x484   : > { %6909 = vst [vmem:[#allocation20_spill] sm:$0xff] %v6378_v7  ;;  %3880 = vmatmul.bf16.gmra.mxu2 %v992_v31  ;;  %v272_v31 = vld [vmem:[%s5562_s17 + $0x230] sm:$0xff] }
 0x485   : > { %4878 = vmatmul.msk.bf16.gmra.mxu3 %vm2073_vm2, %v993_v8  ;;  %v1004_v42 = vpack.c.bf16 %v272_v31, %v260_v46 }
 0x487   : > { %v3325_v35 = vpop.f32.mrf.mxu2  ;;  %v2989_v26 = vpop.f32.mrf.mxu0 }
 0x488   : > { %v3494_v37 = vpop.f32.mrf.mxu3  ;;  %v3326_v53 = vadd.f32 %v3325_v35, %v3157_v15  ;;  %v3158_v5 = vpop.f32.mrf.mxu1  ;;  %v2990_v23 = vadd.f32 %v2989_v26, %v6910_v13  ;;  %v1005_v26 = vpack.c.bf16 %v273_v11, %v261_v58  ;;  %v282_v58 = vld [vmem:[%s5562_s17 + $0x280] sm:$0xff] }
 0x489   : > { %v294_v11 = vld [vmem:[%s5562_s17 + $0x2e0] sm:$0xff] }
 0x48a   : > { %v6382_v17 = vadd.f32 %v3494_v37, %v3326_v53  ;;  %v3159_v22 = vadd.f32 %v3158_v5, %v2990_v23  ;;  %v6912_v37 = vld [vmem:[#allocation22_spill] sm:$0xff] }
 0x48c   : > { %6911 = vst [vmem:[#allocation21_spill] sm:$0xff] %v6382_v17 }
 0x48f   : > { %v3327_v50 = vpop.f32.mrf.mxu2  ;;  %v2992_v35 = vpop.f32.mrf.mxu0 }
 0x490   : > { %v3496_v8 = vpop.f32.mrf.mxu3  ;;  %v3328_v15 = vadd.f32 %v3327_v50, %v3159_v22  ;;  %v3161_v7 = vpop.f32.mrf.mxu1  ;;  %v2993_v53 = vadd.f32 %v2992_v35, %v6912_v37  ;;  %v283_v50 = vld [vmem:[%s5562_s17 + $0x288] sm:$0xff]  ;;  %v1014_v37 = vpack.c.bf16 %v294_v11, %v282_v58 }
 0x492   : > { %v6393_v5 = vadd.f32 %v3496_v8, %v3328_v15  ;;  %v3162_v13 = vadd.f32 %v3161_v7, %v2993_v53  ;;  %3547 = vmatmul.bf16.gmra.mxu0 %v1002_v55  ;;  %v295_v8 = vld [vmem:[%s5562_s17 + $0x2e8] sm:$0xff]  ;;  %v284_v55 = vld [vmem:[%s5562_s17 + $0x290] sm:$0xff]  ;;  %v297_v15 = vld [vmem:[%s5562_s17 + $0x2f8] sm:$0xff] }
 0x493   : > { %3716 = vmatmul.bf16.gmra.mxu1 %v1003_v51  ;;  %v285_v51 = vld [vmem:[%s5562_s17 + $0x298] sm:$0xff]  ;;  %v1015_v53 = vpack.c.bf16 %v295_v8, %v283_v50  ;;  %v6918_v8 = vld [vmem:[#allocation25_spill] sm:$0xff] }
 0x494   : > { %6913 = vst [vmem:[#allocation22_spill] sm:$0xff] %v6393_v5  ;;  %3885 = vmatmul.bf16.gmra.mxu2 %v1004_v42  ;;  %v296_v42 = vld [vmem:[%s5562_s17 + $0x2f0] sm:$0xff] }
 0x495   : > { %4879 = vmatmul.msk.bf16.gmra.mxu3 %vm2073_vm2, %v1005_v26  ;;  %v1016_v17 = vpack.c.bf16 %v296_v42, %v284_v55 }
 0x497   : > { %v3330_v23 = vpop.f32.mrf.mxu2  ;;  %v2994_v4 = vpop.f32.mrf.mxu0 }
 0x498   : > { %v3499_v22 = vpop.f32.mrf.mxu3  ;;  %v3331_v14 = vadd.f32 %v3330_v23, %v3162_v13  ;;  %v3163_v1 = vpop.f32.mrf.mxu1  ;;  %v2995_v46 = vadd.f32 %v2994_v4, %v6914_v25  ;;  %v1017_v4 = vpack.c.bf16 %v297_v15, %v285_v51  ;;  %v306_v51 = vld [vmem:[%s5562_s17 + $0x340] sm:$0xff] }
 0x499   : > { %v318_v15 = vld [vmem:[%s5562_s17 + $0x3a0] sm:$0xff] }
 0x49a   : > { %v6397_v31 = vadd.f32 %v3499_v22, %v3331_v14  ;;  %v3164_v7 = vadd.f32 %v3163_v1, %v2995_v46  ;;  %v6916_v22 = vld [vmem:[#allocation24_spill] sm:$0xff] }
 0x49c   : > { %6915 = vst [vmem:[#allocation23_spill] sm:$0xff] %v6397_v31 }
 0x49f   : > { %v3332_v35 = vpop.f32.mrf.mxu2  ;;  %v2997_v23 = vpop.f32.mrf.mxu0 }
 0x4a0   : > { %v3501_v26 = vpop.f32.mrf.mxu3  ;;  %v3333_v13 = vadd.f32 %v3332_v35, %v3164_v7  ;;  %v3166_v5 = vpop.f32.mrf.mxu1  ;;  %v2998_v14 = vadd.f32 %v2997_v23, %v6916_v22  ;;  %v307_v35 = vld [vmem:[%s5562_s17 + $0x348] sm:$0xff]  ;;  %v1026_v22 = vpack.c.bf16 %v318_v15, %v306_v51 }
 0x4a2   : > { %v6408_v1 = vadd.f32 %v3501_v26, %v3333_v13  ;;  %v3167_v25 = vadd.f32 %v3166_v5, %v2998_v14  ;;  %3552 = vmatmul.bf16.gmra.mxu0 %v1014_v37  ;;  %v319_v26 = vld [vmem:[%s5562_s17 + $0x3a8] sm:$0xff]  ;;  %v308_v37 = vld [vmem:[%s5562_s17 + $0x350] sm:$0xff]  ;;  %v321_v13 = vld [vmem:[%s5562_s17 + $0x3b8] sm:$0xff] }
 0x4a3   : > { %3721 = vmatmul.bf16.gmra.mxu1 %v1015_v53  ;;  %v309_v53 = vld [vmem:[%s5562_s17 + $0x358] sm:$0xff]  ;;  %v1027_v14 = vpack.c.bf16 %v319_v26, %v307_v35  ;;  %v6922_v26 = vld [vmem:[#allocation27_spill] sm:$0xff] }
 0x4a4   : > { %6917 = vst [vmem:[#allocation24_spill] sm:$0xff] %v6408_v1  ;;  %3890 = vmatmul.bf16.gmra.mxu2 %v1016_v17  ;;  %v320_v17 = vld [vmem:[%s5562_s17 + $0x3b0] sm:$0xff] }
 0x4a5   : > { %4880 = vmatmul.msk.bf16.gmra.mxu3 %vm2073_vm2, %v1017_v4  ;;  %v1028_v31 = vpack.c.bf16 %v320_v17, %v308_v37 }
 0x4a7   : > { %v3335_v46 = vpop.f32.mrf.mxu2  ;;  %v2999_v11 = vpop.f32.mrf.mxu0 }
 0x4a8   : > { %v3504_v7 = vpop.f32.mrf.mxu3  ;;  %v3336_v58 = vadd.f32 %v3335_v46, %v3167_v25  ;;  %v3168_v50 = vpop.f32.mrf.mxu1  ;;  %v3000_v55 = vadd.f32 %v2999_v11, %v6918_v8  ;;  %v1029_v11 = vpack.c.bf16 %v321_v13, %v309_v53  ;;  %v330_v53 = vld [vmem:[%s5562_s17 + $0x400] sm:$0xff] }
 0x4a9   : > { %v342_v13 = vld [vmem:[%s5562_s17 + $0x460] sm:$0xff] }
 0x4aa   : > { %v6412_v42 = vadd.f32 %v3504_v7, %v3336_v58  ;;  %v3169_v5 = vadd.f32 %v3168_v50, %v3000_v55  ;;  %v6920_v7 = vld [vmem:[#allocation26_spill] sm:$0xff] }
 0x4ac   : > { %6919 = vst [vmem:[#allocation25_spill] sm:$0xff] %v6412_v42 }
 0x4af   : > { %v3337_v23 = vpop.f32.mrf.mxu2  ;;  %v3002_v46 = vpop.f32.mrf.mxu0 }
 0x4b0   : > { %v3506_v4 = vpop.f32.mrf.mxu3  ;;  %v3338_v25 = vadd.f32 %v3337_v23, %v3169_v5  ;;  %v3171_v1 = vpop.f32.mrf.mxu1  ;;  %v3003_v58 = vadd.f32 %v3002_v46, %v6920_v7  ;;  %v331_v23 = vld [vmem:[%s5562_s17 + $0x408] sm:$0xff]  ;;  %v1038_v7 = vpack.c.bf16 %v342_v13, %v330_v53 }
 0x4b2   : > { %v6423_v50 = vadd.f32 %v3506_v4, %v3338_v25  ;;  %v3172_v8 = vadd.f32 %v3171_v1, %v3003_v58  ;;  %3557 = vmatmul.bf16.gmra.mxu0 %v1026_v22  ;;  %v343_v4 = vld [vmem:[%s5562_s17 + $0x468] sm:$0xff]  ;;  %v332_v22 = vld [vmem:[%s5562_s17 + $0x410] sm:$0xff]  ;;  %v345_v25 = vld [vmem:[%s5562_s17 + $0x478] sm:$0xff] }
 0x4b3   : > { %3726 = vmatmul.bf16.gmra.mxu1 %v1027_v14  ;;  %v333_v14 = vld [vmem:[%s5562_s17 + $0x418] sm:$0xff]  ;;  %v1039_v58 = vpack.c.bf16 %v343_v4, %v331_v23  ;;  %v6926_v4 = vld [vmem:[#allocation29_spill] sm:$0xff] }
 0x4b4   : > { %6921 = vst [vmem:[#allocation26_spill] sm:$0xff] %v6423_v50  ;;  %3895 = vmatmul.bf16.gmra.mxu2 %v1028_v31  ;;  %v344_v31 = vld [vmem:[%s5562_s17 + $0x470] sm:$0xff] }
 0x4b5   : > { %4881 = vmatmul.msk.bf16.gmra.mxu3 %vm2073_vm2, %v1029_v11  ;;  %v1040_v42 = vpack.c.bf16 %v344_v31, %v332_v22 }
 0x4b7   : > { %v3340_v55 = vpop.f32.mrf.mxu2  ;;  %v3004_v15 = vpop.f32.mrf.mxu0 }
 0x4b8   : > { %v3509_v5 = vpop.f32.mrf.mxu3  ;;  %v3341_v51 = vadd.f32 %v3340_v55, %v3172_v8  ;;  %v3173_v35 = vpop.f32.mrf.mxu1  ;;  %v3005_v37 = vadd.f32 %v3004_v15, %v6922_v26  ;;  %v1041_v15 = vpack.c.bf16 %v345_v25, %v333_v14  ;;  %v354_v14 = vld [vmem:[%s5562_s17 + $0x4c0] sm:$0xff] }
 0x4b9   : > { %v366_v25 = vld [vmem:[%s5562_s17 + $0x520] sm:$0xff] }
 0x4ba   : > { %v6427_v17 = vadd.f32 %v3509_v5, %v3341_v51  ;;  %v3174_v1 = vadd.f32 %v3173_v35, %v3005_v37  ;;  %v6924_v5 = vld [vmem:[#allocation28_spill] sm:$0xff] }
 0x4bc   : > { %6923 = vst [vmem:[#allocation27_spill] sm:$0xff] %v6427_v17 }
 0x4bf   : > { %v3342_v46 = vpop.f32.mrf.mxu2  ;;  %v3007_v55 = vpop.f32.mrf.mxu0 }
 0x4c0   : > { %v3511_v11 = vpop.f32.mrf.mxu3  ;;  %v3343_v8 = vadd.f32 %v3342_v46, %v3174_v1  ;;  %v3176_v50 = vpop.f32.mrf.mxu1  ;;  %v3008_v51 = vadd.f32 %v3007_v55, %v6924_v5  ;;  %v355_v46 = vld [vmem:[%s5562_s17 + $0x4c8] sm:$0xff]  ;;  %v1050_v5 = vpack.c.bf16 %v366_v25, %v354_v14 }
 0x4c2   : > { %v6438_v35 = vadd.f32 %v3511_v11, %v3343_v8  ;;  %v3177_v26 = vadd.f32 %v3176_v50, %v3008_v51  ;;  %3562 = vmatmul.bf16.gmra.mxu0 %v1038_v7  ;;  %v367_v11 = vld [vmem:[%s5562_s17 + $0x528] sm:$0xff]  ;;  %v356_v7 = vld [vmem:[%s5562_s17 + $0x4d0] sm:$0xff]  ;;  %v369_v8 = vld [vmem:[%s5562_s17 + $0x538] sm:$0xff] }
 0x4c3   : > { %3731 = vmatmul.bf16.gmra.mxu1 %v1039_v58  ;;  %v357_v58 = vld [vmem:[%s5562_s17 + $0x4d8] sm:$0xff]  ;;  %v1051_v51 = vpack.c.bf16 %v367_v11, %v355_v46  ;;  %v6930_v11 = vld [vmem:[#allocation31_spill] sm:$0xff] }
 0x4c4   : > { %6925 = vst [vmem:[#allocation28_spill] sm:$0xff] %v6438_v35  ;;  %3900 = vmatmul.bf16.gmra.mxu2 %v1040_v42  ;;  %v368_v42 = vld [vmem:[%s5562_s17 + $0x530] sm:$0xff] }
 0x4c5   : > { %4882 = vmatmul.msk.bf16.gmra.mxu3 %vm2073_vm2, %v1041_v15  ;;  %v1052_v17 = vpack.c.bf16 %v368_v42, %v356_v7 }
 0x4c7   : > { %v3345_v37 = vpop.f32.mrf.mxu2  ;;  %v3009_v13 = vpop.f32.mrf.mxu0 }
 0x4c8   : > { %v3514_v1 = vpop.f32.mrf.mxu3  ;;  %v3346_v53 = vadd.f32 %v3345_v37, %v3177_v26  ;;  %v3178_v23 = vpop.f32.mrf.mxu1  ;;  %v3010_v22 = vadd.f32 %v3009_v13, %v6926_v4  ;;  %v1053_v13 = vpack.c.bf16 %v369_v8, %v357_v58  ;;  %v378_v58 = vld [vmem:[%s5562_s17 + $0x580] sm:$0xff] }
 0x4c9   : > { %v390_v8 = vld [vmem:[%s5562_s17 + $0x5e0] sm:$0xff] }
 0x4ca   : > { %v6442_v31 = vadd.f32 %v3514_v1, %v3346_v53  ;;  %v3179_v50 = vadd.f32 %v3178_v23, %v3010_v22  ;;  %v6928_v1 = vld [vmem:[#allocation30_spill] sm:$0xff] }
 0x4cc   : > { %6927 = vst [vmem:[#allocation29_spill] sm:$0xff] %v6442_v31 }
 0x4cf   : > { %v3347_v55 = vpop.f32.mrf.mxu2  ;;  %v3012_v37 = vpop.f32.mrf.mxu0 }
 0x4d0   : > { %v3516_v15 = vpop.f32.mrf.mxu3  ;;  %v3348_v26 = vadd.f32 %v3347_v55, %v3179_v50  ;;  %v3181_v35 = vpop.f32.mrf.mxu1  ;;  %v3013_v53 = vadd.f32 %v3012_v37, %v6928_v1  ;;  %v379_v55 = vld [vmem:[%s5562_s17 + $0x588] sm:$0xff]  ;;  %v1062_v1 = vpack.c.bf16 %v390_v8, %v378_v58  ;;  %v6932_v8 = vld [vmem:[#allocation32_spill] sm:$0xff] }
 0x4d2   : > { %v6453_v23 = vadd.f32 %v3516_v15, %v3348_v26  ;;  %v3182_v4 = vadd.f32 %v3181_v35, %v3013_v53  ;;  %3567 = vmatmul.bf16.gmra.mxu0 %v1050_v5  ;;  %v391_v15 = vld [vmem:[%s5562_s17 + $0x5e8] sm:$0xff]  ;;  %v380_v5 = vld [vmem:[%s5562_s17 + $0x590] sm:$0xff]  ;;  %v393_v26 = vld [vmem:[%s5562_s17 + $0x5f8] sm:$0xff] }
 0x4d3   : > { %3736 = vmatmul.bf16.gmra.mxu1 %v1051_v51  ;;  %v381_v51 = vld [vmem:[%s5562_s17 + $0x598] sm:$0xff]  ;;  %v1063_v53 = vpack.c.bf16 %v391_v15, %v379_v55 }
 0x4d4   : > { %6929 = vst [vmem:[#allocation30_spill] sm:$0xff] %v6453_v23  ;;  %3905 = vmatmul.bf16.gmra.mxu2 %v1052_v17  ;;  %v392_v17 = vld [vmem:[%s5562_s17 + $0x5f0] sm:$0xff] }
 0x4d5   : > { %4883 = vmatmul.msk.bf16.gmra.mxu3 %vm2073_vm2, %v1053_v13  ;;  %v1064_v31 = vpack.c.bf16 %v392_v17, %v380_v5  ;;  %v402_v5 = vld [vmem:[%s5562_s17 + $0x640] sm:$0xff] }
 0x4d6   : > { %v414_v17 = vld [vmem:[%s5562_s17 + $0x6a0] sm:$0xff] }
 0x4d7   : > { %v3350_v22 = vpop.f32.mrf.mxu2  ;;  %v3014_v25 = vpop.f32.mrf.mxu0 }
 0x4d8   : > { %v3519_v50 = vpop.f32.mrf.mxu3  ;;  %v3351_v14 = vadd.f32 %v3350_v22, %v3182_v4  ;;  %v3183_v46 = vpop.f32.mrf.mxu1  ;;  %v3015_v7 = vadd.f32 %v3014_v25, %v6930_v11  ;;  %v1065_v25 = vpack.c.bf16 %v393_v26, %v381_v51  ;;  %v403_v51 = vld [vmem:[%s5562_s17 + $0x648] sm:$0xff] }
 0x4d9   : > { %v415_v26 = vld [vmem:[%s5562_s17 + $0x6a8] sm:$0xff] }
 0x4da   : > { %v6457_v42 = vadd.f32 %v3519_v50, %v3351_v14  ;;  %v3184_v35 = vadd.f32 %v3183_v46, %v3015_v7 }
 0x4df   : > { %v3352_v37 = vpop.f32.mrf.mxu2  ;;  %v3017_v22 = vpop.f32.mrf.mxu0 }
 0x4e0   : > { %v3521_v13 = vpop.f32.mrf.mxu3  ;;  %v3353_v4 = vadd.f32 %v3352_v37, %v3184_v35  ;;  %v3186_v23 = vpop.f32.mrf.mxu1  ;;  %v3018_v50 = vadd.f32 %v3017_v22, %v6016_v43  ;;  %v404_v37 = vld [vmem:[%s5562_s17 + $0x650] sm:$0xff]  ;;  %v1074_v22 = vpack.c.bf16 %v414_v17, %v402_v5 }
 0x4e2   : > { %v6468_v14 = vadd.f32 %v3521_v13, %v3353_v4  ;;  %v3187_v46 = vadd.f32 %v3186_v23, %v3018_v50  ;;  %3572 = vmatmul.bf16.gmra.mxu0 %v1062_v1  ;;  %v405_v13 = vld [vmem:[%s5562_s17 + $0x658] sm:$0xff] }
 0x4e3   : > { %3741 = vmatmul.bf16.gmra.mxu1 %v1063_v53  ;;  %v417_v1 = vld [vmem:[%s5562_s17 + $0x6b8] sm:$0xff] }
 0x4e4   : > { %6931 = vst [vmem:[#allocation31_spill] sm:$0xff] %v6468_v14  ;;  %3910 = vmatmul.bf16.gmra.mxu2 %v1064_v31  ;;  %v416_v31 = vld [vmem:[%s5562_s17 + $0x6b0] sm:$0xff] }
 0x4e5   : > { %4884 = vmatmul.msk.bf16.gmra.mxu3 %vm2073_vm2, %v1065_v25  ;;  %v1075_v25 = vpack.c.bf16 %v415_v26, %v403_v51  ;;  %v426_v26 = vld [vmem:[%s5562_s17 + $0x700] sm:$0xff] }
 0x4e7   : > { %v3355_v11 = vpop.f32.mrf.mxu2  ;;  %v3019_v58 = vpop.f32.mrf.mxu0 }
 0x4e8   : > { %v3524_v7 = vpop.f32.mrf.mxu3  ;;  %v3356_v35 = vadd.f32 %v3355_v11, %v3187_v46  ;;  %v3188_v43 = vpop.f32.mrf.mxu1  ;;  %v3020_v55 = vadd.f32 %v3019_v58, %v6932_v8 }
 0x4ea   : > { %v6472_v15 = vadd.f32 %v3524_v7, %v3356_v35  ;;  %v3189_v23 = vadd.f32 %v3188_v43, %v3020_v55  ;;  %v1076_v7 = vpack.c.bf16 %v416_v31, %v404_v37  ;;  %v1077_v35 = vpack.c.bf16 %v417_v1, %v405_v13  ;;  %v438_v37 = vld [vmem:[%s5562_s17 + $0x760] sm:$0xff]  ;;  %v427_v13 = vld [vmem:[%s5562_s17 + $0x708] sm:$0xff] }
 0x4eb   : > { %v439_v1 = vld [vmem:[%s5562_s17 + $0x768] sm:$0xff] }
 0x4ec   : > { %6933 = vst [vmem:[#allocation32_spill] sm:$0xff] %v6472_v15 }
 0x4ef   : > { %v3357_v53 = vpop.f32.mrf.mxu2  ;;  %v3538_v46 = vpop.f32.mrf.mxu0 }
 0x4f0   : > { %v3526_v4 = vpop.f32.mrf.mxu3  ;;  %v3358_v50 = vadd.f32 %v3357_v53, %v3189_v23  ;;  %v3707_v11 = vpop.f32.mrf.mxu1  ;;  %v3539_v43 = vadd.f32 %v3538_v46, %v6030_v36  ;;  %v428_v53 = vld [vmem:[%s5562_s17 + $0x710] sm:$0xff]  ;;  %v1086_v46 = vpack.c.bf16 %v438_v37, %v426_v26 }
 0x4f2   : > { %v6482_v58 = vadd.f32 %v3526_v4, %v3358_v50  ;;  %3577 = vmatmul.bf16.gmra.mxu0 %v1074_v22  ;;  %v3708_v17 = vadd.f32 %v3707_v11, %v3539_v43  ;;  %v440_v4 = vld [vmem:[%s5562_s17 + $0x770] sm:$0xff]  ;;  %v429_v22 = vld [vmem:[%s5562_s17 + $0x718] sm:$0xff] }
 0x4f3   : > { %3746 = vmatmul.bf16.gmra.mxu1 %v1075_v25  ;;  %v441_v25 = vld [vmem:[%s5562_s17 + $0x778] sm:$0xff] }
 0x4f4   : > { %6934 = vst [vmem:[#allocation34_spill] sm:$0xff] %v6482_v58  ;;  %3915 = vmatmul.bf16.gmra.mxu2 %v1076_v7 }
 0x4f5   : > { %4885 = vmatmul.msk.bf16.gmra.mxu3 %vm2073_vm2, %v1077_v35  ;;  %v1087_v35 = vpack.c.bf16 %v439_v1, %v427_v13  ;;  %v450_v13 = vld [vmem:[%s5562_s17 + $0x7c0] sm:$0xff] }
 0x4f6   : > { %v462_v1 = vld [vmem:[%s5562_s17 + $0x820] sm:$0xff] }
 0x4f7   : > { %v3876_v8 = vpop.f32.mrf.mxu2  ;;  %v3540_v23 = vpop.f32.mrf.mxu0 }
 0x4f8   : > { %v4045_v55 = vpop.f32.mrf.mxu3  ;;  %v3709_v5 = vpop.f32.mrf.mxu1  ;;  %v3541_v51 = vadd.f32 %v3540_v23, %v6041_v61  ;;  %v3877_v31 = vadd.f32 %v3876_v8, %v3708_v17  ;;  %v1088_v61 = vpack.c.bf16 %v440_v4, %v428_v53  ;;  %v1089_v23 = vpack.c.bf16 %v441_v25, %v429_v22  ;;  %v463_v4 = vld [vmem:[%s5562_s17 + $0x828] sm:$0xff]  ;;  %v452_v22 = vld [vmem:[%s5562_s17 + $0x7d0] sm:$0xff]  ;;  %v453_v25 = vld [vmem:[%s5562_s17 + $0x7d8] sm:$0xff] }
 0x4fa   : > { %v3710_v50 = vadd.f32 %v3709_v5, %v3541_v51  ;;  %v4046_v58 = vadd.f32 %v4045_v55, %v3877_v31 }
 0x4fc   : > { %v4205_v17 = vmax.f32 %v4046_v58, 0.0 }
 0x4ff   : > { %v3878_v7 = vpop.f32.mrf.mxu2  ;;  %v3543_v11 = vpop.f32.mrf.mxu0 }
 0x500   : > { %v4047_v36 = vpop.f32.mrf.mxu3  ;;  %v3879_v15 = vadd.f32 %v3878_v7, %v3710_v50  ;;  %v3712_v43 = vpop.f32.mrf.mxu1  ;;  %v3544_v5 = vadd.f32 %v3543_v11, %v6044_v60  ;;  %v464_v60 = vld [vmem:[%s5562_s17 + $0x830] sm:$0xff]  ;;  %v465_v50 = vld [vmem:[%s5562_s17 + $0x838] sm:$0xff] }
 0x502   : > { %v4048_v8 = vadd.f32 %v4047_v36, %v3879_v15  ;;  %3582 = vmatmul.bf16.gmra.mxu0 %v1086_v46  ;;  %v3713_v37 = vadd.f32 %v3712_v43, %v3544_v5 }
 0x503   : > { %3751 = vmatmul.bf16.gmra.mxu1 %v1087_v35  ;;  %v1098_v35 = vpack.c.bf16 %v462_v1, %v450_v13 }
 0x504   : > { %v4206_v14 = vmax.f32 %v4048_v8, 0.0  ;;  %3920 = vmatmul.bf16.gmra.mxu2 %v1088_v61 }
 0x505   : > { %4886 = vmatmul.msk.bf16.gmra.mxu3 %vm2073_vm2, %v1089_v23 }
 0x506   : > { %v5012_v55 = vpack.c.bf16 %v4206_v14, %v4205_v17  ;;  %v451_v14 = vld [vmem:[%s5562_s17 + $0x7c8] sm:$0xff]  ;;  %v1101_v17 = vpack.c.bf16 %v465_v50, %v453_v25  ;;  %v476_v50 = vld [vmem:[%s5562_s17 + $0x890] sm:$0xff] }
 0x507   : > { %v3881_v51 = vpop.f32.mrf.mxu2  ;;  %v3545_v58 = vpop.f32.mrf.mxu0  ;;  %v1099_v11 = vpack.c.bf16 %v463_v4, %v451_v14  ;;  %v474_v14 = vld [vmem:[%s5562_s17 + $0x880] sm:$0xff]  ;;  %v487_v25 = vld [vmem:[%s5562_s17 + $0x8e8] sm:$0xff] }
 0x508   : > { %v4050_v15 = vpop.f32.mrf.mxu3  ;;  %5013 = vst [vmem:[%s6498_s23] sm:$0xff] %v5012_v55   ;;  %v3714_v26 = vpop.f32.mrf.mxu1  ;;  %v3546_v31 = vadd.f32 %v3545_v58, %v6055_v20  ;;  %v3882_v53 = vadd.f32 %v3881_v51, %v3713_v37  ;;  %v1100_v20 = vpack.c.bf16 %v464_v60, %v452_v22  ;;  %v486_v4 = vld [vmem:[%s5562_s17 + $0x8e0] sm:$0xff]  ;;  %v475_v60 = vld [vmem:[%s5562_s17 + $0x888] sm:$0xff] }
 0x50a   : > { %v3715_v7 = vadd.f32 %v3714_v26, %v3546_v31  ;;  %v4051_v61 = vadd.f32 %v4050_v15, %v3882_v53 }
 0x50c   : > { %v4207_v5 = vmax.f32 %v4051_v61, 0.0  ;;  %v1110_v61 = vpack.c.bf16 %v486_v4, %v474_v14  ;;  %v498_v4 = vld [vmem:[%s5562_s17 + $0x940] sm:$0xff] }
 0x50f   : > { %v3883_v36 = vpop.f32.mrf.mxu2  ;;  %v3548_v43 = vpop.f32.mrf.mxu0 }
 0x510   : > { %v4052_v46 = vpop.f32.mrf.mxu3  ;;  %v3884_v23 = vadd.f32 %v3883_v36, %v3715_v7  ;;  %v3717_v8 = vpop.f32.mrf.mxu1  ;;  %v3549_v58 = vadd.f32 %v3548_v43, %v6058_v34  ;;  %v488_v7 = vld [vmem:[%s5562_s17 + $0x8f0] sm:$0xff]  ;;  %v477_v36 = vld [vmem:[%s5562_s17 + $0x898] sm:$0xff] }
 0x512   : > { %v4053_v55 = vadd.f32 %v4052_v46, %v3884_v23  ;;  %3587 = vmatmul.bf16.gmra.mxu0 %v1098_v35  ;;  %v3718_v1 = vadd.f32 %v3717_v8, %v3549_v58  ;;  %v489_v46 = vld [vmem:[%s5562_s17 + $0x8f8] sm:$0xff]  ;;  %v1111_v23 = vpack.c.bf16 %v487_v25, %v475_v60  ;;  %v499_v25 = vld [vmem:[%s5562_s17 + $0x948] sm:$0xff] }
 0x513   : > { %3756 = vmatmul.bf16.gmra.mxu1 %v1099_v11 }
 0x514   : > { %v4208_v51 = vmax.f32 %v4053_v55, 0.0  ;;  %3925 = vmatmul.bf16.gmra.mxu2 %v1100_v20  ;;  %v1113_v55 = vpack.c.bf16 %v489_v46, %v477_v36  ;;  %v512_v36 = vld [vmem:[%s5562_s17 + $0x9b0] sm:$0xff]  ;;  %v501_v46 = vld [vmem:[%s5562_s17 + $0x958] sm:$0xff] }
 0x515   : > { %4887 = vmatmul.msk.bf16.gmra.mxu3 %vm2073_vm2, %v1101_v17 }
 0x516   : > { %v5017_v15 = vpack.c.bf16 %v4208_v51, %v4207_v5 }
 0x517   : > { %v3886_v26 = vpop.f32.mrf.mxu2  ;;  %v3550_v31 = vpop.f32.mrf.mxu0 }
 0x518   : > { %v4055_v37 = vpop.f32.mrf.mxu3  ;;  %5169 = vst [vmem:[%s6498_s23 + $0x8] sm:$0xff] %v5017_v15   ;;  %v3719_v13 = vpop.f32.mrf.mxu1  ;;  %v3551_v53 = vadd.f32 %v3550_v31, %v6069_v12  ;;  %v3887_v22 = vadd.f32 %v3886_v26, %v3718_v1  ;;  %v1112_v12 = vpack.c.bf16 %v488_v7, %v476_v50  ;;  %v511_v50 = vld [vmem:[%s5562_s17 + $0x9a8] sm:$0xff]  ;;  %v500_v7 = vld [vmem:[%s5562_s17 + $0x950] sm:$0xff] }
 0x51a   : > { %v3720_v35 = vadd.f32 %v3719_v13, %v3551_v53  ;;  %v4056_v43 = vadd.f32 %v4055_v37, %v3887_v22  ;;  %v510_v22 = vld [vmem:[%s5562_s17 + $0x9a0] sm:$0xff] }
 0x51c   : > { %v4209_v51 = vmax.f32 %v4056_v43, 0.0 }
 0x51f   : > { %v3888_v34 = vpop.f32.mrf.mxu2  ;;  %v3553_v8 = vpop.f32.mrf.mxu0 }
 0x520   : > { %v4057_v11 = vpop.f32.mrf.mxu3  ;;  %v3889_v20 = vadd.f32 %v3888_v34, %v3720_v35  ;;  %v3722_v17 = vpop.f32.mrf.mxu1  ;;  %v3554_v26 = vadd.f32 %v3553_v8, %v6072_v29  ;;  %v513_v35 = vld [vmem:[%s5562_s17 + $0x9b8] sm:$0xff] }
 0x522   : > { %v4058_v5 = vadd.f32 %v4057_v11, %v3889_v20  ;;  %3592 = vmatmul.bf16.gmra.mxu0 %v1110_v61  ;;  %v3723_v53 = vadd.f32 %v3722_v17, %v3554_v26  ;;  %v1122_v61 = vpack.c.bf16 %v510_v22, %v498_v4  ;;  %v534_v4 = vld [vmem:[%s5562_s17 + $0xa60] sm:$0xff] }
 0x523   : > { %3761 = vmatmul.bf16.gmra.mxu1 %v1111_v23  ;;  %v1123_v23 = vpack.c.bf16 %v511_v50, %v499_v25  ;;  %v535_v25 = vld [vmem:[%s5562_s17 + $0xa68] sm:$0xff]  ;;  %v524_v50 = vld [vmem:[%s5562_s17 + $0xa10] sm:$0xff] }
 0x524   : > { %v4210_v15 = vmax.f32 %v4058_v5, 0.0  ;;  %3930 = vmatmul.bf16.gmra.mxu2 %v1112_v12  ;;  %v1125_v12 = vpack.c.bf16 %v513_v35, %v501_v46  ;;  %v537_v46 = vld [vmem:[%s5562_s17 + $0xa78] sm:$0xff] }
 0x525   : > { %4888 = vmatmul.msk.bf16.gmra.mxu3 %vm2073_vm2, %v1113_v55 }
 0x526   : > { %v5022_v58 = vpack.c.bf16 %v4210_v15, %v4209_v51 }
 0x527   : > { %v3891_v37 = vpop.f32.mrf.mxu2  ;;  %v3555_v13 = vpop.f32.mrf.mxu0 }
 0x528   : > { %v4060_v31 = vpop.f32.mrf.mxu3  ;;  %5170 = vst [vmem:[%s6498_s23 + $0x10] sm:$0xff] %v5022_v58   ;;  %v3724_v1 = vpop.f32.mrf.mxu1  ;;  %v3556_v14 = vadd.f32 %v3555_v13, %v6083_v6  ;;  %v3892_v60 = vadd.f32 %v3891_v37, %v3723_v53  ;;  %v1124_v6 = vpack.c.bf16 %v512_v36, %v500_v7  ;;  %v536_v7 = vld [vmem:[%s5562_s17 + $0xa70] sm:$0xff]  ;;  %v525_v36 = vld [vmem:[%s5562_s17 + $0xa18] sm:$0xff] }
 0x52a   : > { %v3725_v34 = vadd.f32 %v3724_v1, %v3556_v14  ;;  %v4061_v43 = vadd.f32 %v4060_v31, %v3892_v60  ;;  %v522_v14 = vld [vmem:[%s5562_s17 + $0xa00] sm:$0xff]  ;;  %v523_v60 = vld [vmem:[%s5562_s17 + $0xa08] sm:$0xff] }
 0x52c   : > { %v4211_v5 = vmax.f32 %v4061_v43, 0.0 }
 0x52f   : > { %v3893_v29 = vpop.f32.mrf.mxu2  ;;  %v3558_v8 = vpop.f32.mrf.mxu0 }
 0x530   : > { %v4062_v11 = vpop.f32.mrf.mxu3  ;;  %v3894_v20 = vadd.f32 %v3893_v29, %v3725_v34  ;;  %v3727_v17 = vpop.f32.mrf.mxu1  ;;  %v3559_v58 = vadd.f32 %v3558_v8, %v6086_v32  ;;  %v1134_v29 = vpack.c.bf16 %v534_v4, %v522_v14  ;;  %v1137_v8 = vpack.c.bf16 %v537_v46, %v525_v36  ;;  %v547_v14 = vld [vmem:[%s5562_s17 + $0xac8] sm:$0xff] }
 0x531   : > { %v559_v4 = vld [vmem:[%s5562_s17 + $0xb28] sm:$0xff] }
 0x532   : > { %v4063_v55 = vadd.f32 %v4062_v11, %v3894_v20  ;;  %3597 = vmatmul.bf16.gmra.mxu0 %v1122_v61  ;;  %v3728_v1 = vadd.f32 %v3727_v17, %v3559_v58  ;;  %v1135_v11 = vpack.c.bf16 %v535_v25, %v523_v60  ;;  %v560_v60 = vld [vmem:[%s5562_s17 + $0xb30] sm:$0xff]  ;;  %v549_v25 = vld [vmem:[%s5562_s17 + $0xad8] sm:$0xff] }
 0x533   : > { %3766 = vmatmul.bf16.gmra.mxu1 %v1123_v23 }
 0x534   : > { %v4212_v51 = vmax.f32 %v4063_v55, 0.0  ;;  %3935 = vmatmul.bf16.gmra.mxu2 %v1124_v6 }
 0x535   : > { %4889 = vmatmul.msk.bf16.gmra.mxu3 %vm2073_vm2, %v1125_v12 }
 0x536   : > { %v5027_v15 = vpack.c.bf16 %v4212_v51, %v4211_v5 }
 0x537   : > { %v3896_v26 = vpop.f32.mrf.mxu2  ;;  %v3560_v31 = vpop.f32.mrf.mxu0 }
 0x538   : > { %v4065_v37 = vpop.f32.mrf.mxu3  ;;  %5171 = vst [vmem:[%s6498_s23 + $0x18] sm:$0xff] %v5027_v15   ;;  %v3729_v13 = vpop.f32.mrf.mxu1  ;;  %v3561_v53 = vadd.f32 %v3560_v31, %v6097_v39  ;;  %v3897_v22 = vadd.f32 %v3896_v26, %v3728_v1  ;;  %v1136_v39 = vpack.c.bf16 %v536_v7, %v524_v50  ;;  %v558_v1 = vld [vmem:[%s5562_s17 + $0xb20] sm:$0xff]  ;;  %v561_v50 = vld [vmem:[%s5562_s17 + $0xb38] sm:$0xff] }
 0x53a   : > { %v3730_v35 = vadd.f32 %v3729_v13, %v3561_v53  ;;  %v4066_v61 = vadd.f32 %v4065_v37, %v3897_v22  ;;  %v546_v13 = vld [vmem:[%s5562_s17 + $0xac0] sm:$0xff]  ;;  %v548_v22 = vld [vmem:[%s5562_s17 + $0xad0] sm:$0xff] }
 0x53b   : > { %v1146_v46 = vpack.c.bf16 %v558_v1, %v546_v13  ;;  %v572_v13 = vld [vmem:[%s5562_s17 + $0xb90] sm:$0xff] }
 0x53c   : > { %v4213_v6 = vmax.f32 %v4066_v61, 0.0  ;;  %v1149_v61 = vpack.c.bf16 %v561_v50, %v549_v25  ;;  %v584_v1 = vld [vmem:[%s5562_s17 + $0xbf0] sm:$0xff] }
 0x53f   : > { %v3898_v32 = vpop.f32.mrf.mxu2  ;;  %v3563_v43 = vpop.f32.mrf.mxu0 }
 0x540   : > { %v4067_v34 = vpop.f32.mrf.mxu3  ;;  %v3899_v23 = vadd.f32 %v3898_v32, %v3730_v35  ;;  %v3732_v20 = vpop.f32.mrf.mxu1  ;;  %v3564_v5 = vadd.f32 %v3563_v43, %v6100_v33  ;;  %v1147_v35 = vpack.c.bf16 %v559_v4, %v547_v14  ;;  %v585_v14 = vld [vmem:[%s5562_s17 + $0xbf8] sm:$0xff] }
 0x542   : > { %v4068_v17 = vadd.f32 %v4067_v34, %v3899_v23  ;;  %3602 = vmatmul.bf16.gmra.mxu0 %v1134_v29  ;;  %v3733_v37 = vadd.f32 %v3732_v20, %v3564_v5 }
 0x543   : > { %3771 = vmatmul.bf16.gmra.mxu1 %v1135_v11 }
 0x544   : > { %v4214_v12 = vmax.f32 %v4068_v17, 0.0  ;;  %3940 = vmatmul.bf16.gmra.mxu2 %v1136_v39 }
 0x545   : > { %4890 = vmatmul.msk.bf16.gmra.mxu3 %vm2073_vm2, %v1137_v8 }
 0x546   : > { %v5032_v55 = vpack.c.bf16 %v4214_v12, %v4213_v6 }
 0x547   : > { %v3901_v51 = vpop.f32.mrf.mxu2  ;;  %v3565_v58 = vpop.f32.mrf.mxu0 }
 0x548   : > { %v4070_v15 = vpop.f32.mrf.mxu3  ;;  %5172 = vst [vmem:[%s6498_s23 + $0x20] sm:$0xff] %v5032_v55   ;;  %v3734_v26 = vpop.f32.mrf.mxu1  ;;  %v3566_v31 = vadd.f32 %v3565_v58, %v6111_v44  ;;  %v3902_v53 = vadd.f32 %v3901_v51, %v3733_v37  ;;  %v1148_v44 = vpack.c.bf16 %v560_v60, %v548_v22  ;;  %v582_v58 = vld [vmem:[%s5562_s17 + $0xbe0] sm:$0xff]  ;;  %v571_v37 = vld [vmem:[%s5562_s17 + $0xb88] sm:$0xff] }
 0x54a   : > { %v3735_v7 = vadd.f32 %v3734_v26, %v3566_v31  ;;  %v4071_v32 = vadd.f32 %v4070_v15, %v3902_v53  ;;  %v570_v15 = vld [vmem:[%s5562_s17 + $0xb80] sm:$0xff]  ;;  %v583_v31 = vld [vmem:[%s5562_s17 + $0xbe8] sm:$0xff]  ;;  %v573_v53 = vld [vmem:[%s5562_s17 + $0xb98] sm:$0xff] }
 0x54b   : > { %v1158_v60 = vpack.c.bf16 %v582_v58, %v570_v15  ;;  %v1159_v25 = vpack.c.bf16 %v583_v31, %v571_v37  ;;  %v597_v15 = vld [vmem:[%s5562_s17 + $0xc58] sm:$0xff] }
 0x54c   : > { %v4215_v43 = vmax.f32 %v4071_v32, 0.0  ;;  %v609_v58 = vld [vmem:[%s5562_s17 + $0xcb8] sm:$0xff] }
 0x54f   : > { %v3903_v33 = vpop.f32.mrf.mxu2  ;;  %v3568_v29 = vpop.f32.mrf.mxu0 }
 0x550   : > { %v4072_v36 = vpop.f32.mrf.mxu3  ;;  %v3904_v34 = vadd.f32 %v3903_v33, %v3735_v7  ;;  %v3737_v11 = vpop.f32.mrf.mxu1  ;;  %v3569_v8 = vadd.f32 %v3568_v29, %v6114_v30 }
 0x552   : > { %v4073_v23 = vadd.f32 %v4072_v36, %v3904_v34  ;;  %3607 = vmatmul.bf16.gmra.mxu0 %v1146_v46  ;;  %v3738_v5 = vadd.f32 %v3737_v11, %v3569_v8  ;;  %v1161_v46 = vpack.c.bf16 %v585_v14, %v573_v53  ;;  %v594_v8 = vld [vmem:[%s5562_s17 + $0xc40] sm:$0xff] }
 0x553   : > { %3776 = vmatmul.bf16.gmra.mxu1 %v1147_v35 }
 0x554   : > { %v4216_v20 = vmax.f32 %v4073_v23, 0.0  ;;  %3945 = vmatmul.bf16.gmra.mxu2 %v1148_v44 }
 0x555   : > { %4891 = vmatmul.msk.bf16.gmra.mxu3 %vm2073_vm2, %v1149_v61 }
 0x556   : > { %v5037_v39 = vpack.c.bf16 %v4216_v20, %v4215_v43 }
 0x557   : > { %v3906_v17 = vpop.f32.mrf.mxu2  ;;  %v3570_v12 = vpop.f32.mrf.mxu0 }
 0x558   : > { %v4075_v6 = vpop.f32.mrf.mxu3  ;;  %5173 = vst [vmem:[%s6498_s23 + $0x28] sm:$0xff] %v5037_v39   ;;  %v3739_v55 = vpop.f32.mrf.mxu1  ;;  %v3571_v51 = vadd.f32 %v3570_v12, %v6125_v45  ;;  %v3907_v26 = vadd.f32 %v3906_v17, %v3738_v5  ;;  %v1160_v45 = vpack.c.bf16 %v584_v1, %v572_v13  ;;  %v606_v17 = vld [vmem:[%s5562_s17 + $0xca0] sm:$0xff]  ;;  %v595_v12 = vld [vmem:[%s5562_s17 + $0xc48] sm:$0xff]  ;;  %v596_v5 = vld [vmem:[%s5562_s17 + $0xc50] sm:$0xff] }
 0x559   : > { %v1170_v31 = vpack.c.bf16 %v606_v17, %v594_v8 }
 0x55a   : > { %v3740_v4 = vadd.f32 %v3739_v55, %v3571_v51  ;;  %v4076_v50 = vadd.f32 %v4075_v6, %v3907_v26  ;;  %v607_v55 = vld [vmem:[%s5562_s17 + $0xca8] sm:$0xff]  ;;  %v608_v51 = vld [vmem:[%s5562_s17 + $0xcb0] sm:$0xff] }
 0x55b   : > { %v1171_v13 = vpack.c.bf16 %v607_v55, %v595_v12 }
 0x55c   : > { %v4217_v32 = vmax.f32 %v4076_v50, 0.0 }
 0x55f   : > { %v3908_v30 = vpop.f32.mrf.mxu2  ;;  %v3573_v33 = vpop.f32.mrf.mxu0 }
 0x560   : > { %v4077_v22 = vpop.f32.mrf.mxu3  ;;  %v3909_v7 = vadd.f32 %v3908_v30, %v3740_v4  ;;  %v3742_v36 = vpop.f32.mrf.mxu1  ;;  %v3574_v11 = vadd.f32 %v3573_v33, %v6128_v56  ;;  %v1173_v30 = vpack.c.bf16 %v609_v58, %v597_v15 }
 0x562   : > { %v4078_v35 = vadd.f32 %v4077_v22, %v3909_v7  ;;  %3612 = vmatmul.bf16.gmra.mxu0 %v1158_v60  ;;  %v3743_v20 = vadd.f32 %v3742_v36, %v3574_v11 }
 0x563   : > { %3781 = vmatmul.bf16.gmra.mxu1 %v1159_v25 }
 0x564   : > { %v4218_v34 = vmax.f32 %v4078_v35, 0.0  ;;  %3950 = vmatmul.bf16.gmra.mxu2 %v1160_v45 }
 0x565   : > { %4892 = vmatmul.msk.bf16.gmra.mxu3 %vm2073_vm2, %v1161_v46 }
 0x566   : > { %v5042_v29 = vpack.c.bf16 %v4218_v34, %v4217_v32  ;;  %v618_v34 = vld [vmem:[%s5562_s17 + $0xd00] sm:$0xff] }
 0x567   : > { %v3911_v44 = vpop.f32.mrf.mxu2  ;;  %v3575_v23 = vpop.f32.mrf.mxu0 }
 0x568   : > { %v4080_v61 = vpop.f32.mrf.mxu3  ;;  %5174 = vst [vmem:[%s6498_s23 + $0x30] sm:$0xff] %v5042_v29   ;;  %v3744_v43 = vpop.f32.mrf.mxu1  ;;  %v3576_v39 = vadd.f32 %v3575_v23, %v6139_v63  ;;  %v3912_v6 = vadd.f32 %v3911_v44, %v3743_v20  ;;  %v1172_v63 = vpack.c.bf16 %v608_v51, %v596_v5  ;;  %v630_v29 = vld [vmem:[%s5562_s17 + $0xd60] sm:$0xff]  ;;  %v619_v44 = vld [vmem:[%s5562_s17 + $0xd08] sm:$0xff]  ;;  %v620_v23 = vld [vmem:[%s5562_s17 + $0xd10] sm:$0xff] }
 0x569   : > { %v621_v20 = vld [vmem:[%s5562_s17 + $0xd18] sm:$0xff] }
 0x56a   : > { %v3745_v26 = vadd.f32 %v3744_v43, %v3576_v39  ;;  %v4081_v1 = vadd.f32 %v4080_v61, %v3912_v6  ;;  %v631_v61 = vld [vmem:[%s5562_s17 + $0xd68] sm:$0xff]  ;;  %v632_v43 = vld [vmem:[%s5562_s17 + $0xd70] sm:$0xff]  ;;  %v633_v39 = vld [vmem:[%s5562_s17 + $0xd78] sm:$0xff]  ;;  %v1182_v6 = vpack.c.bf16 %v630_v29, %v618_v34 }
 0x56b   : > { %v1183_v12 = vpack.c.bf16 %v631_v61, %v619_v44  ;;  %v1185_v58 = vpack.c.bf16 %v633_v39, %v621_v20 }
 0x56c   : > { %v4219_v60 = vmax.f32 %v4081_v1, 0.0 }
 0x56f   : > { %v3913_v56 = vpop.f32.mrf.mxu2  ;;  %v3578_v14 = vpop.f32.mrf.mxu0 }
 0x570   : > { %v4082_v37 = vpop.f32.mrf.mxu3  ;;  %v3914_v53 = vadd.f32 %v3913_v56, %v3745_v26  ;;  %v3747_v4 = vpop.f32.mrf.mxu1  ;;  %v3579_v7 = vadd.f32 %v3578_v14, %v6142_v62 }
 0x572   : > { %v4083_v22 = vadd.f32 %v4082_v37, %v3914_v53  ;;  %3617 = vmatmul.bf16.gmra.mxu0 %v1170_v31  ;;  %v3748_v35 = vadd.f32 %v3747_v4, %v3579_v7  ;;  %v655_v7 = vld [vmem:[%s5562_s17 + $0xe28] sm:$0xff] }
 0x573   : > { %3786 = vmatmul.bf16.gmra.mxu1 %v1171_v13 }
 0x574   : > { %v4220_v25 = vmax.f32 %v4083_v22, 0.0  ;;  %3955 = vmatmul.bf16.gmra.mxu2 %v1172_v63  ;;  %v642_v22 = vld [vmem:[%s5562_s17 + $0xdc0] sm:$0xff] }
 0x575   : > { %4893 = vmatmul.msk.bf16.gmra.mxu3 %vm2073_vm2, %v1173_v30 }
 0x576   : > { %v5047_v50 = vpack.c.bf16 %v4220_v25, %v4219_v60  ;;  %v654_v60 = vld [vmem:[%s5562_s17 + $0xe20] sm:$0xff] }
 0x577   : > { %v3916_v33 = vpop.f32.mrf.mxu2  ;;  %v3580_v45 = vpop.f32.mrf.mxu0  ;;  %v1194_v34 = vpack.c.bf16 %v654_v60, %v642_v22 }
 0x578   : > { %v4085_v36 = vpop.f32.mrf.mxu3  ;;  %5175 = vst [vmem:[%s6498_s23 + $0x38] sm:$0xff] %v5047_v50   ;;  %v3749_v46 = vpop.f32.mrf.mxu1  ;;  %v3581_v32 = vadd.f32 %v3580_v45, %v6153_v57  ;;  %v3917_v11 = vadd.f32 %v3916_v33, %v3748_v35  ;;  %v1184_v57 = vpack.c.bf16 %v632_v43, %v620_v23  ;;  %v643_v50 = vld [vmem:[%s5562_s17 + $0xdc8] sm:$0xff]  ;;  %v644_v33 = vld [vmem:[%s5562_s17 + $0xdd0] sm:$0xff]  ;;  %v645_v45 = vld [vmem:[%s5562_s17 + $0xdd8] sm:$0xff] }
 0x579   : > { %v1195_v29 = vpack.c.bf16 %v655_v7, %v643_v50 }
 0x57a   : > { %v3750_v8 = vadd.f32 %v3749_v46, %v3581_v32  ;;  %v4086_v55 = vadd.f32 %v4085_v36, %v3917_v11  ;;  %v656_v36 = vld [vmem:[%s5562_s17 + $0xe30] sm:$0xff]  ;;  %v657_v46 = vld [vmem:[%s5562_s17 + $0xe38] sm:$0xff] }
 0x57b   : > { %v1197_v43 = vpack.c.bf16 %v657_v46, %v645_v45 }
 0x57c   : > { %v4221_v56 = vmax.f32 %v4086_v55, 0.0 }
 0x57f   : > { %v3918_v62 = vpop.f32.mrf.mxu2  ;;  %v3583_v51 = vpop.f32.mrf.mxu0 }
 0x580   : > { %v4087_v17 = vpop.f32.mrf.mxu3  ;;  %v3919_v5 = vadd.f32 %v3918_v62, %v3750_v8  ;;  %v3752_v15 = vpop.f32.mrf.mxu1  ;;  %v3584_v13 = vadd.f32 %v3583_v51, %v6156_v47 }
 0x582   : > { %v4088_v26 = vadd.f32 %v4087_v17, %v3919_v5  ;;  %3622 = vmatmul.bf16.gmra.mxu0 %v1182_v6  ;;  %v3753_v63 = vadd.f32 %v3752_v15, %v3584_v13  ;;  %v680_v13 = vld [vmem:[%s5562_s17 + $0xef0] sm:$0xff] }
 0x583   : > { %3791 = vmatmul.bf16.gmra.mxu1 %v1183_v12 }
 0x584   : > { %v4222_v37 = vmax.f32 %v4088_v26, 0.0  ;;  %3960 = vmatmul.bf16.gmra.mxu2 %v1184_v57  ;;  %v666_v57 = vld [vmem:[%s5562_s17 + $0xe80] sm:$0xff] }
 0x585   : > { %4894 = vmatmul.msk.bf16.gmra.mxu3 %vm2073_vm2, %v1185_v58  ;;  %v678_v58 = vld [vmem:[%s5562_s17 + $0xee0] sm:$0xff] }
 0x586   : > { %v5052_v31 = vpack.c.bf16 %v4222_v37, %v4221_v56  ;;  %v667_v56 = vld [vmem:[%s5562_s17 + $0xe88] sm:$0xff] }
 0x587   : > { %v3921_v1 = vpop.f32.mrf.mxu2  ;;  %v3585_v14 = vpop.f32.mrf.mxu0  ;;  %v679_v37 = vld [vmem:[%s5562_s17 + $0xee8] sm:$0xff] }
 0x588   : > { %v4090_v53 = vpop.f32.mrf.mxu3  ;;  %5176 = vst [vmem:[%s6498_s23 + $0x40] sm:$0xff] %v5052_v31   ;;  %v3754_v4 = vpop.f32.mrf.mxu1  ;;  %v3586_v30 = vadd.f32 %v3585_v14, %v6167_v52  ;;  %v3922_v25 = vadd.f32 %v3921_v1, %v3753_v63  ;;  %v1196_v52 = vpack.c.bf16 %v656_v36, %v644_v33  ;;  %v668_v31 = vld [vmem:[%s5562_s17 + $0xe90] sm:$0xff]  ;;  %v669_v1 = vld [vmem:[%s5562_s17 + $0xe98] sm:$0xff]  ;;  %v1206_v63 = vpack.c.bf16 %v678_v58, %v666_v57 }
 0x58a   : > { %v3755_v35 = vadd.f32 %v3754_v4, %v3586_v30  ;;  %v4091_v11 = vadd.f32 %v4090_v53, %v3922_v25  ;;  %v681_v53 = vld [vmem:[%s5562_s17 + $0xef8] sm:$0xff]  ;;  %v1207_v30 = vpack.c.bf16 %v679_v37, %v667_v56 }
 0x58b   : > { %v1209_v7 = vpack.c.bf16 %v681_v53, %v669_v1 }
 0x58c   : > { %v4223_v39 = vmax.f32 %v4091_v11, 0.0 }
 0x58f   : > { %v3923_v47 = vpop.f32.mrf.mxu2  ;;  %v3588_v61 = vpop.f32.mrf.mxu0 }
 0x590   : > { %v4092_v32 = vpop.f32.mrf.mxu3  ;;  %v3924_v44 = vadd.f32 %v3923_v47, %v3755_v35  ;;  %v3757_v23 = vpop.f32.mrf.mxu1  ;;  %v3589_v17 = vadd.f32 %v3588_v61, %v6170_v16  ;;  %v690_v61 = vld [vmem:[%s5562_s17 + $0xf40] sm:$0xff] }
 0x592   : > { %v4093_v20 = vadd.f32 %v4092_v32, %v3924_v44  ;;  %3627 = vmatmul.bf16.gmra.mxu0 %v1194_v34  ;;  %v3758_v51 = vadd.f32 %v3757_v23, %v3589_v17  ;;  %v702_v23 = vld [vmem:[%s5562_s17 + $0xfa0] sm:$0xff]  ;;  %v705_v17 = vld [vmem:[%s5562_s17 + $0xfb8] sm:$0xff] }
 0x593   : > { %3796 = vmatmul.bf16.gmra.mxu1 %v1195_v29 }
 0x594   : > { %v4224_v8 = vmax.f32 %v4093_v20, 0.0  ;;  %3965 = vmatmul.bf16.gmra.mxu2 %v1196_v52  ;;  %v703_v20 = vld [vmem:[%s5562_s17 + $0xfa8] sm:$0xff] }
 0x595   : > { %4895 = vmatmul.msk.bf16.gmra.mxu3 %vm2073_vm2, %v1197_v43  ;;  %v691_v43 = vld [vmem:[%s5562_s17 + $0xf48] sm:$0xff] }
 0x596   : > { %v5057_v62 = vpack.c.bf16 %v4224_v8, %v4223_v39  ;;  %v692_v39 = vld [vmem:[%s5562_s17 + $0xf50] sm:$0xff] }
 0x597   : > { %v3926_v6 = vpop.f32.mrf.mxu2  ;;  %v3590_v55 = vpop.f32.mrf.mxu0  ;;  %v704_v8 = vld [vmem:[%s5562_s17 + $0xfb0] sm:$0xff] }
 0x598   : > { %v4095_v12 = vpop.f32.mrf.mxu3  ;;  %5177 = vst [vmem:[%s6498_s23 + $0x48] sm:$0xff] %v5057_v62   ;;  %v3759_v5 = vpop.f32.mrf.mxu1  ;;  %v3591_v15 = vadd.f32 %v3590_v55, %v6181_v18  ;;  %v3927_v26 = vadd.f32 %v3926_v6, %v3758_v51  ;;  %v1208_v18 = vpack.c.bf16 %v680_v13, %v668_v31  ;;  %v693_v62 = vld [vmem:[%s5562_s17 + $0xf58] sm:$0xff]  ;;  %v1218_v55 = vpack.c.bf16 %v702_v23, %v690_v61 }
 0x59a   : > { %v3760_v14 = vadd.f32 %v3759_v5, %v3591_v15  ;;  %v4096_v22 = vadd.f32 %v4095_v12, %v3927_v26  ;;  %v1219_v5 = vpack.c.bf16 %v703_v20, %v691_v43  ;;  %v1221_v26 = vpack.c.bf16 %v705_v17, %v693_v62 }
 0x59c   : > { %v4225_v36 = vmax.f32 %v4096_v22, 0.0  ;;  %v714_v22 = vld [vmem:[%s5562_s17 + $0x1000] sm:$0xff] }
 0x59f   : > { %v3928_v16 = vpop.f32.mrf.mxu2  ;;  %v3593_v25 = vpop.f32.mrf.mxu0 }
 0x5a0   : > { %v4097_v4 = vpop.f32.mrf.mxu3  ;;  %v3929_v60 = vadd.f32 %v3928_v16, %v3760_v14  ;;  %v3762_v50 = vpop.f32.mrf.mxu1  ;;  %v3594_v35 = vadd.f32 %v3593_v25, %v6184_v48 }
 0x5a2   : > { %v4098_v33 = vadd.f32 %v4097_v4, %v3929_v60  ;;  %3632 = vmatmul.bf16.gmra.mxu0 %v1206_v63  ;;  %v3763_v11 = vadd.f32 %v3762_v50, %v3594_v35  ;;  %v726_v60 = vld [vmem:[%s5562_s17 + $0x1060] sm:$0xff]  ;;  %v715_v50 = vld [vmem:[%s5562_s17 + $0x1008] sm:$0xff] }
 0x5a3   : > { %3801 = vmatmul.bf16.gmra.mxu1 %v1207_v30 }
 0x5a4   : > { %v4226_v45 = vmax.f32 %v4098_v33, 0.0  ;;  %3970 = vmatmul.bf16.gmra.mxu2 %v1208_v18  ;;  %v727_v18 = vld [vmem:[%s5562_s17 + $0x1068] sm:$0xff]  ;;  %v728_v33 = vld [vmem:[%s5562_s17 + $0x1070] sm:$0xff] }
 0x5a5   : > { %4896 = vmatmul.msk.bf16.gmra.mxu3 %vm2073_vm2, %v1209_v7  ;;  %v716_v7 = vld [vmem:[%s5562_s17 + $0x1010] sm:$0xff] }
 0x5a6   : > { %v5062_v46 = vpack.c.bf16 %v4226_v45, %v4225_v36  ;;  %v717_v36 = vld [vmem:[%s5562_s17 + $0x1018] sm:$0xff] }
 0x5a7   : > { %v3931_v47 = vpop.f32.mrf.mxu2  ;;  %v3595_v34 = vpop.f32.mrf.mxu0  ;;  %v729_v45 = vld [vmem:[%s5562_s17 + $0x1078] sm:$0xff] }
 0x5a8   : > { %v4100_v32 = vpop.f32.mrf.mxu3  ;;  %5178 = vst [vmem:[%s6498_s23 + $0x50] sm:$0xff] %v5062_v46   ;;  %v3764_v29 = vpop.f32.mrf.mxu1  ;;  %v3596_v44 = vadd.f32 %v3595_v34, %v6195_v10  ;;  %v3932_v52 = vadd.f32 %v3931_v47, %v3763_v11  ;;  %v1220_v10 = vpack.c.bf16 %v704_v8, %v692_v39  ;;  %v1230_v47 = vpack.c.bf16 %v726_v60, %v714_v22 }
 0x5a9   : > { %v1233_v61 = vpack.c.bf16 %v729_v45, %v717_v36 }
 0x5aa   : > { %v3765_v6 = vadd.f32 %v3764_v29, %v3596_v44  ;;  %v4101_v51 = vadd.f32 %v4100_v32, %v3932_v52  ;;  %v1231_v32 = vpack.c.bf16 %v727_v18, %v715_v50 }
 0x5ac   : > { %v4227_v37 = vmax.f32 %v4101_v51, 0.0 }
 0x5af   : > { %v3933_v48 = vpop.f32.mrf.mxu2  ;;  %v3598_v57 = vpop.f32.mrf.mxu0 }
 0x5b0   : > { %v4102_v12 = vpop.f32.mrf.mxu3  ;;  %v3934_v15 = vadd.f32 %v3933_v48, %v3765_v6  ;;  %v3767_v58 = vpop.f32.mrf.mxu1  ;;  %v3599_v1 = vadd.f32 %v3598_v57, %v6198_v49  ;;  %v751_v57 = vld [vmem:[%s5562_s17 + $0x1128] sm:$0xff] }
 0x5b2   : > { %v4103_v56 = vadd.f32 %v4102_v12, %v3934_v15  ;;  %3637 = vmatmul.bf16.gmra.mxu0 %v1218_v55  ;;  %v3768_v63 = vadd.f32 %v3767_v58, %v3599_v1  ;;  %v738_v55 = vld [vmem:[%s5562_s17 + $0x10c0] sm:$0xff]  ;;  %v739_v15 = vld [vmem:[%s5562_s17 + $0x10c8] sm:$0xff]  ;;  %v740_v58 = vld [vmem:[%s5562_s17 + $0x10d0] sm:$0xff] }
 0x5b3   : > { %3806 = vmatmul.bf16.gmra.mxu1 %v1219_v5  ;;  %v750_v5 = vld [vmem:[%s5562_s17 + $0x1120] sm:$0xff]  ;;  %v1243_v1 = vpack.c.bf16 %v751_v57, %v739_v15 }
 0x5b4   : > { %v4228_v31 = vmax.f32 %v4103_v56, 0.0  ;;  %3975 = vmatmul.bf16.gmra.mxu2 %v1220_v10  ;;  %v752_v10 = vld [vmem:[%s5562_s17 + $0x1130] sm:$0xff]  ;;  %v753_v56 = vld [vmem:[%s5562_s17 + $0x1138] sm:$0xff] }
 0x5b5   : > { %4897 = vmatmul.msk.bf16.gmra.mxu3 %vm2073_vm2, %v1221_v26  ;;  %v741_v26 = vld [vmem:[%s5562_s17 + $0x10d8] sm:$0xff] }
 0x5b6   : > { %v5067_v13 = vpack.c.bf16 %v4228_v31, %v4227_v37 }
 0x5b7   : > { %v3936_v53 = vpop.f32.mrf.mxu2  ;;  %v3600_v16 = vpop.f32.mrf.mxu0 }
 0x5b8   : > { %v4105_v14 = vpop.f32.mrf.mxu3  ;;  %5179 = vst [vmem:[%s6498_s23 + $0x58] sm:$0xff] %v5067_v13   ;;  %v3769_v4 = vpop.f32.mrf.mxu1  ;;  %v3601_v30 = vadd.f32 %v3600_v16, %v6209_v9  ;;  %v3937_v25 = vadd.f32 %v3936_v53, %v3768_v63  ;;  %v1232_v9 = vpack.c.bf16 %v728_v33, %v716_v7  ;;  %v1242_v13 = vpack.c.bf16 %v750_v5, %v738_v55 }
 0x5b9   : > { %v1245_v63 = vpack.c.bf16 %v753_v56, %v741_v26  ;;  %v786_v56 = vld [vmem:[%s5562_s17 + $0x1240] sm:$0xff] }
 0x5ba   : > { %v3770_v46 = vadd.f32 %v3769_v4, %v3601_v30  ;;  %v4106_v34 = vadd.f32 %v4105_v14, %v3937_v25 }
 0x5bc   : > { %v4229_v52 = vmax.f32 %v4106_v34, 0.0  ;;  %v775_v34 = vld [vmem:[%s5562_s17 + $0x11e8] sm:$0xff] }
 0x5bf   : > { %v3938_v49 = vpop.f32.mrf.mxu2  ;;  %v3603_v11 = vpop.f32.mrf.mxu0 }
 0x5c0   : > { %v4107_v35 = vpop.f32.mrf.mxu3  ;;  %v3939_v29 = vadd.f32 %v3938_v49, %v3770_v46  ;;  %v3772_v44 = vpop.f32.mrf.mxu1  ;;  %v3604_v39 = vadd.f32 %v3603_v11, %v6212_v19  ;;  %v762_v49 = vld [vmem:[%s5562_s17 + $0x1180] sm:$0xff]  ;;  %v776_v11 = vld [vmem:[%s5562_s17 + $0x11f0] sm:$0xff] }
 0x5c2   : > { %v4108_v23 = vadd.f32 %v4107_v35, %v3939_v29  ;;  %3642 = vmatmul.bf16.gmra.mxu0 %v1230_v47  ;;  %v3773_v48 = vadd.f32 %v3772_v44, %v3604_v39  ;;  %v774_v35 = vld [vmem:[%s5562_s17 + $0x11e0] sm:$0xff]  ;;  %v764_v29 = vld [vmem:[%s5562_s17 + $0x1190] sm:$0xff]  ;;  %v765_v44 = vld [vmem:[%s5562_s17 + $0x1198] sm:$0xff] }
 0x5c3   : > { %3811 = vmatmul.bf16.gmra.mxu1 %v1231_v32  ;;  %v763_v32 = vld [vmem:[%s5562_s17 + $0x1188] sm:$0xff] }
 0x5c4   : > { %v4230_v43 = vmax.f32 %v4108_v23, 0.0  ;;  %3980 = vmatmul.bf16.gmra.mxu2 %v1232_v9  ;;  %v777_v9 = vld [vmem:[%s5562_s17 + $0x11f8] sm:$0xff] }
 0x5c5   : > { %4898 = vmatmul.msk.bf16.gmra.mxu3 %vm2073_vm2, %v1233_v61 }
 0x5c6   : > { %v5072_v20 = vpack.c.bf16 %v4230_v43, %v4229_v52  ;;  %v1254_v52 = vpack.c.bf16 %v774_v35, %v762_v49  ;;  %v1255_v43 = vpack.c.bf16 %v775_v34, %v763_v32 }
 0x5c7   : > { %v3941_v8 = vpop.f32.mrf.mxu2  ;;  %v3605_v17 = vpop.f32.mrf.mxu0 }
 0x5c8   : > { %v4110_v62 = vpop.f32.mrf.mxu3  ;;  %5180 = vst [vmem:[%s6498_s23 + $0x60] sm:$0xff] %v5072_v20   ;;  %v3774_v6 = vpop.f32.mrf.mxu1  ;;  %v3606_v12 = vadd.f32 %v3605_v17, %v6223_v38  ;;  %v3942_v51 = vadd.f32 %v3941_v8, %v3773_v48  ;;  %v1244_v38 = vpack.c.bf16 %v752_v10, %v740_v58  ;;  %v1257_v17 = vpack.c.bf16 %v777_v9, %v765_v44  ;;  %v822_v44 = vld [vmem:[%s5562_s17 + $0x1360] sm:$0xff] }
 0x5ca   : > { %v3775_v37 = vadd.f32 %v3774_v6, %v3606_v12  ;;  %v4111_v53 = vadd.f32 %v4110_v62, %v3942_v51 }
 0x5cc   : > { %v4231_v22 = vmax.f32 %v4111_v53, 0.0  ;;  %v800_v53 = vld [vmem:[%s5562_s17 + $0x12b0] sm:$0xff] }
 0x5cf   : > { %v3943_v19 = vpop.f32.mrf.mxu2  ;;  %v3608_v16 = vpop.f32.mrf.mxu0 }
 0x5d0   : > { %v4112_v31 = vpop.f32.mrf.mxu3  ;;  %v3944_v14 = vadd.f32 %v3943_v19, %v3775_v37  ;;  %v3777_v4 = vpop.f32.mrf.mxu1  ;;  %v3609_v50 = vadd.f32 %v3608_v16, %v6226_v28  ;;  %v798_v37 = vld [vmem:[%s5562_s17 + $0x12a0] sm:$0xff]  ;;  %v801_v16 = vld [vmem:[%s5562_s17 + $0x12b8] sm:$0xff] }
 0x5d2   : > { %v4113_v30 = vadd.f32 %v4112_v31, %v3944_v14  ;;  %3647 = vmatmul.bf16.gmra.mxu0 %v1242_v13  ;;  %v3778_v45 = vadd.f32 %v3777_v4, %v3609_v50  ;;  %v787_v31 = vld [vmem:[%s5562_s17 + $0x1248] sm:$0xff]  ;;  %v789_v14 = vld [vmem:[%s5562_s17 + $0x1258] sm:$0xff] }
 0x5d3   : > { %3816 = vmatmul.bf16.gmra.mxu1 %v1243_v1  ;;  %v799_v13 = vld [vmem:[%s5562_s17 + $0x12a8] sm:$0xff]  ;;  %v788_v1 = vld [vmem:[%s5562_s17 + $0x1250] sm:$0xff] }
 0x5d4   : > { %v4232_v60 = vmax.f32 %v4113_v30, 0.0  ;;  %3985 = vmatmul.bf16.gmra.mxu2 %v1244_v38  ;;  %v1267_v30 = vpack.c.bf16 %v799_v13, %v787_v31  ;;  %v834_v13 = vld [vmem:[%s5562_s17 + $0x13c0] sm:$0xff] }
 0x5d5   : > { %4899 = vmatmul.msk.bf16.gmra.mxu3 %vm2073_vm2, %v1245_v63  ;;  %v1266_v63 = vpack.c.bf16 %v798_v37, %v786_v56 }
 0x5d6   : > { %v5077_v25 = vpack.c.bf16 %v4232_v60, %v4231_v22 }
 0x5d7   : > { %v3946_v18 = vpop.f32.mrf.mxu2  ;;  %v3610_v33 = vpop.f32.mrf.mxu0 }
 0x5d8   : > { %v4115_v7 = vpop.f32.mrf.mxu3  ;;  %5181 = vst [vmem:[%s6498_s23 + $0x68] sm:$0xff] %v5077_v25   ;;  %v3779_v36 = vpop.f32.mrf.mxu1  ;;  %v3611_v46 = vadd.f32 %v3610_v33, %v6237_v54  ;;  %v3947_v47 = vadd.f32 %v3946_v18, %v3778_v45  ;;  %v1256_v54 = vpack.c.bf16 %v776_v11, %v764_v29  ;;  %v1269_v18 = vpack.c.bf16 %v801_v16, %v789_v14  ;;  %v810_v11 = vld [vmem:[%s5562_s17 + $0x1300] sm:$0xff]  ;;  %v835_v14 = vld [vmem:[%s5562_s17 + $0x13c8] sm:$0xff] }
 0x5d9   : > { %v847_v16 = vld [vmem:[%s5562_s17 + $0x1428] sm:$0xff] }
 0x5da   : > { %v3780_v61 = vadd.f32 %v3779_v36, %v3611_v46  ;;  %v4116_v20 = vadd.f32 %v4115_v7, %v3947_v47 }
 0x5dc   : > { %v4233_v48 = vmax.f32 %v4116_v20, 0.0  ;;  %v825_v20 = vld [vmem:[%s5562_s17 + $0x1378] sm:$0xff] }
 0x5df   : > { %v3948_v28 = vpop.f32.mrf.mxu2  ;;  %v3613_v8 = vpop.f32.mrf.mxu0 }
 0x5e0   : > { %v4117_v23 = vpop.f32.mrf.mxu3  ;;  %v3949_v39 = vadd.f32 %v3948_v28, %v3780_v61  ;;  %v3782_v62 = vpop.f32.mrf.mxu1  ;;  %v3614_v5 = vadd.f32 %v3613_v8, %v6240_v59  ;;  %v811_v61 = vld [vmem:[%s5562_s17 + $0x1308] sm:$0xff] }
 0x5e1   : > { %v823_v28 = vld [vmem:[%s5562_s17 + $0x1368] sm:$0xff] }
 0x5e2   : > { %v4118_v6 = vadd.f32 %v4117_v23, %v3949_v39  ;;  %3652 = vmatmul.bf16.gmra.mxu0 %v1254_v52  ;;  %v3783_v10 = vadd.f32 %v3782_v62, %v3614_v5  ;;  %v812_v23 = vld [vmem:[%s5562_s17 + $0x1310] sm:$0xff]  ;;  %v1278_v62 = vpack.c.bf16 %v822_v44, %v810_v11 }
 0x5e3   : > { %3821 = vmatmul.bf16.gmra.mxu1 %v1255_v43  ;;  %v824_v52 = vld [vmem:[%s5562_s17 + $0x1370] sm:$0xff]  ;;  %v813_v43 = vld [vmem:[%s5562_s17 + $0x1318] sm:$0xff] }
 0x5e4   : > { %v4234_v12 = vmax.f32 %v4118_v6, 0.0  ;;  %3990 = vmatmul.bf16.gmra.mxu2 %v1256_v54  ;;  %v1279_v54 = vpack.c.bf16 %v823_v28, %v811_v61  ;;  %v870_v61 = vld [vmem:[%s5562_s17 + $0x14e0] sm:$0xff] }
 0x5e5   : > { %4900 = vmatmul.msk.bf16.gmra.mxu3 %vm2073_vm2, %v1257_v17 }
 0x5e6   : > { %v5082_v55 = vpack.c.bf16 %v4234_v12, %v4233_v48 }
 0x5e7   : > { %v3951_v51 = vpop.f32.mrf.mxu2  ;;  %v3615_v57 = vpop.f32.mrf.mxu0 }
 0x5e8   : > { %v4120_v15 = vpop.f32.mrf.mxu3  ;;  %5182 = vst [vmem:[%s6498_s23 + $0x70] sm:$0xff] %v5082_v55   ;;  %v3784_v58 = vpop.f32.mrf.mxu1  ;;  %v3616_v26 = vadd.f32 %v3615_v57, %v6251_v40  ;;  %v3952_v19 = vadd.f32 %v3951_v51, %v3783_v10  ;;  %v1268_v40 = vpack.c.bf16 %v800_v53, %v788_v1  ;;  %v1281_v55 = vpack.c.bf16 %v825_v20, %v813_v43  ;;  %v846_v1 = vld [vmem:[%s5562_s17 + $0x1420] sm:$0xff]  ;;  %v860_v43 = vld [vmem:[%s5562_s17 + $0x1490] sm:$0xff] }
 0x5e9   : > { %v872_v20 = vld [vmem:[%s5562_s17 + $0x14f0] sm:$0xff] }
 0x5ea   : > { %v3785_v4 = vadd.f32 %v3784_v58, %v3616_v26  ;;  %v4121_v22 = vadd.f32 %v4120_v15, %v3952_v19 }
 0x5ec   : > { %v4235_v33 = vmax.f32 %v4121_v22, 0.0 }
 0x5ef   : > { %v3953_v59 = vpop.f32.mrf.mxu2  ;;  %v3618_v25 = vpop.f32.mrf.mxu0 }
 0x5f0   : > { %v4122_v38 = vpop.f32.mrf.mxu3  ;;  %v3954_v60 = vadd.f32 %v3953_v59, %v3785_v4  ;;  %v3787_v50 = vpop.f32.mrf.mxu1  ;;  %v3619_v46 = vadd.f32 %v3618_v25, %v6254_v2  ;;  %v836_v4 = vld [vmem:[%s5562_s17 + $0x13d0] sm:$0xff]  ;;  %v1291_v25 = vpack.c.bf16 %v847_v16, %v835_v14  ;;  %v894_v14 = vld [vmem:[%s5562_s17 + $0x15a0] sm:$0xff] }
 0x5f1   : > { %v848_v59 = vld [vmem:[%s5562_s17 + $0x1430] sm:$0xff] }
 0x5f2   : > { %v4123_v7 = vadd.f32 %v4122_v38, %v3954_v60  ;;  %3657 = vmatmul.bf16.gmra.mxu0 %v1266_v63  ;;  %v3788_v34 = vadd.f32 %v3787_v50, %v3619_v46  ;;  %v837_v38 = vld [vmem:[%s5562_s17 + $0x13d8] sm:$0xff]  ;;  %v1290_v60 = vpack.c.bf16 %v846_v1, %v834_v13  ;;  %v6936_v13 = vld [vmem:[#allocation11_spill] sm:$0xff] }
 0x5f3   : > { %3826 = vmatmul.bf16.gmra.mxu1 %v1267_v30  ;;  %v849_v63 = vld [vmem:[%s5562_s17 + $0x1438] sm:$0xff] }
 0x5f4   : > { %v4236_v36 = vmax.f32 %v4123_v7, 0.0  ;;  %3995 = vmatmul.bf16.gmra.mxu2 %v1268_v40 }
 0x5f5   : > { %4901 = vmatmul.msk.bf16.gmra.mxu3 %vm2073_vm2, %v1269_v18 }
 0x5f6   : > { %v5087_v45 = vpack.c.bf16 %v4236_v36, %v4235_v33  ;;  %v1293_v33 = vpack.c.bf16 %v849_v63, %v837_v38  ;;  %v884_v38 = vld [vmem:[%s5562_s17 + $0x1550] sm:$0xff] }
 0x5f7   : > { %v3956_v49 = vpop.f32.mrf.mxu2  ;;  %v3620_v47 = vpop.f32.mrf.mxu0  ;;  %v896_v63 = vld [vmem:[%s5562_s17 + $0x15b0] sm:$0xff] }
 0x5f8   : > { %v4125_v35 = vpop.f32.mrf.mxu3  ;;  %5183 = vst [vmem:[%s6498_s23 + $0x78] sm:$0xff] %v5087_v45   ;;  %v3789_v32 = vpop.f32.mrf.mxu1  ;;  %v3621_v29 = vadd.f32 %v3620_v47, %v6265_v24  ;;  %v3957_v9 = vadd.f32 %v3956_v49, %v3788_v34  ;;  %v1280_v24 = vpack.c.bf16 %v824_v52, %v812_v23  ;;  %v859_v23 = vld [vmem:[%s5562_s17 + $0x1488] sm:$0xff] }
 0x5f9   : > { %v871_v52 = vld [vmem:[%s5562_s17 + $0x14e8] sm:$0xff] }
 0x5fa   : > { %v3790_v39 = vadd.f32 %v3789_v32, %v3621_v29  ;;  %v4126_v17 = vadd.f32 %v4125_v35, %v3957_v9  ;;  %v858_v9 = vld [vmem:[%s5562_s17 + $0x1480] sm:$0xff] }
 0x5fc   : > { %v4237_v51 = vmax.f32 %v4126_v17, 0.0  ;;  %v1303_v17 = vpack.c.bf16 %v871_v52, %v859_v23  ;;  %v906_v23 = vld [vmem:[%s5562_s17 + $0x1600] sm:$0xff] }
 0x5fd   : > { %v918_v52 = vld [vmem:[%s5562_s17 + $0x1660] sm:$0xff] }
 0x5ff   : > { %v3958_v2 = vpop.f32.mrf.mxu2  ;;  %v3623_v48 = vpop.f32.mrf.mxu0 }
 0x600   : > { %v4127_v8 = vpop.f32.mrf.mxu3  ;;  %v3959_v6 = vadd.f32 %v3958_v2, %v3790_v39  ;;  %v3792_v12 = vpop.f32.mrf.mxu1  ;;  %v3624_v58 = vadd.f32 %v3623_v48, %v6268_v41  ;;  %v861_v39 = vld [vmem:[%s5562_s17 + $0x1498] sm:$0xff] }
 0x601   : > { %v873_v2 = vld [vmem:[%s5562_s17 + $0x14f8] sm:$0xff] }
 0x602   : > { %v4128_v5 = vadd.f32 %v4127_v8, %v3959_v6  ;;  %3662 = vmatmul.bf16.gmra.mxu0 %v1278_v62  ;;  %v3793_v19 = vadd.f32 %v3792_v12, %v3624_v58  ;;  %v6935_v58 = vld [vmem:[#allocation33_spill] sm:$0xff] }
 0x603   : > { %3831 = vmatmul.bf16.gmra.mxu1 %v1279_v54  ;;  %v1302_v54 = vpack.c.bf16 %v870_v61, %v858_v9  ;;  %v6937_v61 = vld [vmem:[#allocation12_spill] sm:$0xff] }
 0x604   : > { %v4238_v15 = vmax.f32 %v4128_v5, 0.0  ;;  %4000 = vmatmul.bf16.gmra.mxu2 %v1280_v24 }
 0x605   : > { %4902 = vmatmul.msk.bf16.gmra.mxu3 %vm2073_vm2, %v1281_v55  ;;  %v1305_v55 = vpack.c.bf16 %v873_v2, %v861_v39  ;;  %v919_v39 = vld [vmem:[%s5562_s17 + $0x1668] sm:$0xff]  ;;  %v908_v2 = vld [vmem:[%s5562_s17 + $0x1610] sm:$0xff] }
 0x606   : > { %v5092_v57 = vpack.c.bf16 %v4238_v15, %v4237_v51 }
 0x607   : > { %v3961_v10 = vpop.f32.mrf.mxu2  ;;  %v3625_v56 = vpop.f32.mrf.mxu0 }
 0x608   : > { %v4130_v26 = vpop.f32.mrf.mxu3  ;;  %5184 = vst [vmem:[%s6498_s23 + $0x80] sm:$0xff] %v5092_v57   ;;  %v3794_v37 = vpop.f32.mrf.mxu1  ;;  %v3626_v31 = vadd.f32 %v3625_v56, %v6279_v27  ;;  %v3962_v53 = vadd.f32 %v3961_v10, %v3793_v19  ;;  %v1292_v27 = vpack.c.bf16 %v848_v59, %v836_v4  ;;  %v883_v4 = vld [vmem:[%s5562_s17 + $0x1548] sm:$0xff] }
 0x609   : > { %v895_v59 = vld [vmem:[%s5562_s17 + $0x15a8] sm:$0xff] }
 0x60a   : > { %v3795_v30 = vadd.f32 %v3794_v37, %v3626_v31  ;;  %v4131_v50 = vadd.f32 %v4130_v26, %v3962_v53  ;;  %v882_v53 = vld [vmem:[%s5562_s17 + $0x1540] sm:$0xff] }
 0x60c   : > { %v4239_v45 = vmax.f32 %v4131_v50, 0.0  ;;  %v1314_v50 = vpack.c.bf16 %v894_v14, %v882_v53  ;;  %v6939_v53 = vld [vmem:[#allocation14_spill] sm:$0xff] }
 0x60f   : > { %v3963_v41 = vpop.f32.mrf.mxu2  ;;  %v3628_v18 = vpop.f32.mrf.mxu0 }
 0x610   : > { %v4132_v22 = vpop.f32.mrf.mxu3  ;;  %v3964_v40 = vadd.f32 %v3963_v41, %v3795_v30  ;;  %v3797_v7 = vpop.f32.mrf.mxu1  ;;  %v3629_v35 = vadd.f32 %v3628_v18, %v6282_v3  ;;  %v885_v30 = vld [vmem:[%s5562_s17 + $0x1558] sm:$0xff] }
 0x611   : > { %v897_v41 = vld [vmem:[%s5562_s17 + $0x15b8] sm:$0xff] }
 0x612   : > { %v4133_v36 = vadd.f32 %v4132_v22, %v3964_v40  ;;  %3667 = vmatmul.bf16.gmra.mxu0 %v1290_v60  ;;  %v3798_v11 = vadd.f32 %v3797_v7, %v3629_v35  ;;  %v1315_v40 = vpack.c.bf16 %v895_v59, %v883_v4  ;;  %v942_v4 = vld [vmem:[%s5562_s17 + $0x1720] sm:$0xff] }
 0x613   : > { %3836 = vmatmul.bf16.gmra.mxu1 %v1291_v25 }
 0x614   : > { %v4240_v46 = vmax.f32 %v4133_v36, 0.0  ;;  %4005 = vmatmul.bf16.gmra.mxu2 %v1292_v27  ;;  %v1316_v36 = vpack.c.bf16 %v896_v63, %v884_v38  ;;  %v931_v38 = vld [vmem:[%s5562_s17 + $0x16c8] sm:$0xff] }
 0x615   : > { %4903 = vmatmul.msk.bf16.gmra.mxu3 %vm2073_vm2, %v1293_v33  ;;  %v943_v63 = vld [vmem:[%s5562_s17 + $0x1728] sm:$0xff] }
 0x616   : > { %v5097_v49 = vpack.c.bf16 %v4240_v46, %v4239_v45  ;;  %v1317_v45 = vpack.c.bf16 %v897_v41, %v885_v30  ;;  %v932_v30 = vld [vmem:[%s5562_s17 + $0x16d0] sm:$0xff] }
 0x617   : > { %v3966_v47 = vpop.f32.mrf.mxu2  ;;  %v3630_v34 = vpop.f32.mrf.mxu0  ;;  %v944_v41 = vld [vmem:[%s5562_s17 + $0x1730] sm:$0xff] }
 0x618   : > { %v4135_v32 = vpop.f32.mrf.mxu3  ;;  %5185 = vst [vmem:[%s6498_s23 + $0x88] sm:$0xff] %v5097_v49   ;;  %v3799_v29 = vpop.f32.mrf.mxu1  ;;  %v3631_v44 = vadd.f32 %v3630_v34, %v6293_v21  ;;  %v3967_v28 = vadd.f32 %v3966_v47, %v3798_v11  ;;  %v1304_v21 = vpack.c.bf16 %v872_v20, %v860_v43  ;;  %v907_v20 = vld [vmem:[%s5562_s17 + $0x1608] sm:$0xff] }
 0x61a   : > { %v3800_v8 = vadd.f32 %v3799_v29, %v3631_v44  ;;  %v4136_v6 = vadd.f32 %v4135_v32, %v3967_v28 }
 0x61c   : > { %v4241_v51 = vmax.f32 %v4136_v6, 0.0  ;;  %v1326_v6 = vpack.c.bf16 %v918_v52, %v906_v23  ;;  %v6941_v52 = vld [vmem:[#allocation16_spill] sm:$0xff] }
 0x61f   : > { %v3968_v3 = vpop.f32.mrf.mxu2  ;;  %v3633_v12 = vpop.f32.mrf.mxu0 }
 0x620   : > { %v4137_v62 = vpop.f32.mrf.mxu3  ;;  %v3969_v48 = vadd.f32 %v3968_v3, %v3800_v8  ;;  %v3802_v24 = vpop.f32.mrf.mxu1  ;;  %v3634_v10 = vadd.f32 %v3633_v12, %v6935_v58  ;;  %v920_v8 = vld [vmem:[%s5562_s17 + $0x1670] sm:$0xff]  ;;  %v909_v3 = vld [vmem:[%s5562_s17 + $0x1618] sm:$0xff] }
 0x622   : > { %v4138_v5 = vadd.f32 %v4137_v62, %v3969_v48  ;;  %3672 = vmatmul.bf16.gmra.mxu0 %v1302_v54  ;;  %v3803_v31 = vadd.f32 %v3802_v24, %v3634_v10  ;;  %v921_v62 = vld [vmem:[%s5562_s17 + $0x1678] sm:$0xff]  ;;  %v1327_v48 = vpack.c.bf16 %v919_v39, %v907_v20  ;;  %v954_v20 = vld [vmem:[%s5562_s17 + $0x1780] sm:$0xff] }
 0x623   : > { %3841 = vmatmul.bf16.gmra.mxu1 %v1303_v17  ;;  %v966_v39 = vld [vmem:[%s5562_s17 + $0x17e0] sm:$0xff] }
 0x624   : > { %v4242_v15 = vmax.f32 %v4138_v5, 0.0  ;;  %4010 = vmatmul.bf16.gmra.mxu2 %v1304_v21  ;;  %v1328_v5 = vpack.c.bf16 %v920_v8, %v908_v2  ;;  %v955_v8 = vld [vmem:[%s5562_s17 + $0x1788] sm:$0xff] }
 0x625   : > { %4904 = vmatmul.msk.bf16.gmra.mxu3 %vm2073_vm2, %v1305_v55 }
 0x626   : > { %v5102_v57 = vpack.c.bf16 %v4242_v15, %v4241_v51  ;;  %v1329_v51 = vpack.c.bf16 %v921_v62, %v909_v3  ;;  %v967_v3 = vld [vmem:[%s5562_s17 + $0x17e8] sm:$0xff]  ;;  %v956_v62 = vld [vmem:[%s5562_s17 + $0x1790] sm:$0xff] }
 0x627   : > { %v3971_v26 = vpop.f32.mrf.mxu2  ;;  %v3635_v37 = vpop.f32.mrf.mxu0 }
 0x628   : > { %v4140_v56 = vpop.f32.mrf.mxu3  ;;  %5186 = vst [vmem:[%s6498_s23 + $0x90] sm:$0xff] %v5102_v57   ;;  %v3804_v19 = vpop.f32.mrf.mxu1  ;;  %v3636_v1 = vadd.f32 %v3635_v37, %v6936_v13  ;;  %v3972_v16 = vadd.f32 %v3971_v26, %v3803_v31  ;;  %v6938_v26 = vld [vmem:[#allocation13_spill] sm:$0xff] }
 0x62a   : > { %v3805_v22 = vadd.f32 %v3804_v19, %v3636_v1  ;;  %v4141_v18 = vadd.f32 %v4140_v56, %v3972_v16  ;;  %v930_v16 = vld [vmem:[%s5562_s17 + $0x16c0] sm:$0xff] }
 0x62c   : > { %v4243_v49 = vmax.f32 %v4141_v18, 0.0  ;;  %v1338_v18 = vpack.c.bf16 %v942_v4, %v930_v16  ;;  %v6943_v4 = vld [vmem:[#allocation18_spill] sm:$0xff] }
 0x62f   : > { %v3973_v60 = vpop.f32.mrf.mxu2  ;;  %v3638_v27 = vpop.f32.mrf.mxu0 }
 0x630   : > { %v4142_v25 = vpop.f32.mrf.mxu3  ;;  %v3974_v7 = vadd.f32 %v3973_v60, %v3805_v22  ;;  %v3807_v33 = vpop.f32.mrf.mxu1  ;;  %v3639_v32 = vadd.f32 %v3638_v27, %v6310_v0  ;;  %v933_v22 = vld [vmem:[%s5562_s17 + $0x16d8] sm:$0xff] }
 0x631   : > { %v945_v60 = vld [vmem:[%s5562_s17 + $0x1738] sm:$0xff] }
 0x632   : > { %v4143_v46 = vadd.f32 %v4142_v25, %v3974_v7  ;;  %3677 = vmatmul.bf16.gmra.mxu0 %v1314_v50  ;;  %v3808_v9 = vadd.f32 %v3807_v33, %v3639_v32  ;;  %v1339_v7 = vpack.c.bf16 %v943_v63, %v931_v38 }
 0x633   : > { %3846 = vmatmul.bf16.gmra.mxu1 %v1315_v40 }
 0x634   : > { %v4244_v35 = vmax.f32 %v4143_v46, 0.0  ;;  %4015 = vmatmul.bf16.gmra.mxu2 %v1316_v36  ;;  %v1340_v46 = vpack.c.bf16 %v944_v41, %v932_v30 }
 0x635   : > { %4905 = vmatmul.msk.bf16.gmra.mxu3 %vm2073_vm2, %v1317_v45 }
 0x636   : > { %v5107_v47 = vpack.c.bf16 %v4244_v35, %v4243_v49  ;;  %v1341_v49 = vpack.c.bf16 %v945_v60, %v933_v22 }
 0x637   : > { %v3976_v34 = vpop.f32.mrf.mxu2  ;;  %v3640_v11 = vpop.f32.mrf.mxu0 }
 0x638   : > { %v4145_v29 = vpop.f32.mrf.mxu3  ;;  %5187 = vst [vmem:[%s6498_s23 + $0x98] sm:$0xff] %v5107_v47   ;;  %v3809_v44 = vpop.f32.mrf.mxu1  ;;  %v3641_v28 = vadd.f32 %v3640_v11, %v6937_v61  ;;  %v3977_v43 = vadd.f32 %v3976_v34, %v3808_v9 }
 0x63a   : > { %v3810_v54 = vadd.f32 %v3809_v44, %v3641_v28  ;;  %v4146_v12 = vadd.f32 %v4145_v29, %v3977_v43  ;;  %v6940_v29 = vld [vmem:[#allocation15_spill] sm:$0xff] }
 0x63c   : > { %v4245_v57 = vmax.f32 %v4146_v12, 0.0 }
 0x63f   : > { %v3978_v0 = vpop.f32.mrf.mxu2  ;;  %v3643_v21 = vpop.f32.mrf.mxu0 }
 0x640   : > { %v4147_v17 = vpop.f32.mrf.mxu3  ;;  %v3979_v24 = vadd.f32 %v3978_v0, %v3810_v54  ;;  %v3812_v55 = vpop.f32.mrf.mxu1  ;;  %v3644_v56 = vadd.f32 %v3643_v21, %v6938_v26  ;;  %v968_v54 = vld [vmem:[%s5562_s17 + $0x17f0] sm:$0xff]  ;;  %v957_v0 = vld [vmem:[%s5562_s17 + $0x1798] sm:$0xff]  ;;  %v1351_v21 = vpack.c.bf16 %v967_v3, %v955_v8  ;;  %v6946_v8 = vld [vmem:[#allocation21_spill] sm:$0xff] }
 0x642   : > { %v4148_v15 = vadd.f32 %v4147_v17, %v3979_v24  ;;  %3682 = vmatmul.bf16.gmra.mxu0 %v1326_v6  ;;  %v3813_v1 = vadd.f32 %v3812_v55, %v3644_v56  ;;  %v969_v17 = vld [vmem:[%s5562_s17 + $0x17f8] sm:$0xff]  ;;  %v1350_v24 = vpack.c.bf16 %v966_v39, %v954_v20 }
 0x643   : > { %3851 = vmatmul.bf16.gmra.mxu1 %v1327_v48 }
 0x644   : > { %v4246_v58 = vmax.f32 %v4148_v15, 0.0  ;;  %4020 = vmatmul.bf16.gmra.mxu2 %v1328_v5 }
 0x645   : > { %4906 = vmatmul.msk.bf16.gmra.mxu3 %vm2073_vm2, %v1329_v51 }
 0x646   : > { %v5112_v10 = vpack.c.bf16 %v4246_v58, %v4245_v57  ;;  %v1352_v57 = vpack.c.bf16 %v968_v54, %v956_v62  ;;  %v1353_v58 = vpack.c.bf16 %v969_v17, %v957_v0 }
 0x647   : > { %v3981_v37 = vpop.f32.mrf.mxu2  ;;  %v3645_v31 = vpop.f32.mrf.mxu0 }
 0x648   : > { %v4150_v19 = vpop.f32.mrf.mxu3  ;;  %5188 = vst [vmem:[%s6498_s23 + $0xa0] sm:$0xff] %v5112_v10   ;;  %v3814_v13 = vpop.f32.mrf.mxu1  ;;  %v3646_v14 = vadd.f32 %v3645_v31, %v6939_v53  ;;  %v3982_v59 = vadd.f32 %v3981_v37, %v3813_v1 }
 0x64a   : > { %v3815_v25 = vadd.f32 %v3814_v13, %v3646_v14  ;;  %v4151_v27 = vadd.f32 %v4150_v19, %v3982_v59  ;;  %v6942_v19 = vld [vmem:[#allocation17_spill] sm:$0xff] }
 0x64c   : > { %v4247_v47 = vmax.f32 %v4151_v27, 0.0 }
 0x64f   : > { %v3983_v50 = vpop.f32.mrf.mxu2  ;;  %v3648_v36 = vpop.f32.mrf.mxu0 }
 0x650   : > { %v4152_v40 = vpop.f32.mrf.mxu3  ;;  %v3984_v33 = vadd.f32 %v3983_v50, %v3815_v25  ;;  %v3817_v45 = vpop.f32.mrf.mxu1  ;;  %v3649_v11 = vadd.f32 %v3648_v36, %v6940_v29 }
 0x652   : > { %v4153_v35 = vadd.f32 %v4152_v40, %v3984_v33  ;;  %3687 = vmatmul.bf16.gmra.mxu0 %v1338_v18  ;;  %v3818_v23 = vadd.f32 %v3817_v45, %v3649_v11  ;;  %v6944_v33 = vld [vmem:[#allocation19_spill] sm:$0xff] }
 0x653   : > { %3856 = vmatmul.bf16.gmra.mxu1 %v1339_v7 }
 0x654   : > { %v4248_v32 = vmax.f32 %v4153_v35, 0.0  ;;  %4025 = vmatmul.bf16.gmra.mxu2 %v1340_v46 }
 0x655   : > { %4907 = vmatmul.msk.bf16.gmra.mxu3 %vm2073_vm2, %v1341_v49 }
 0x656   : > { %v5117_v34 = vpack.c.bf16 %v4248_v32, %v4247_v47  ;;  %v6945_v32 = vld [vmem:[#allocation20_spill] sm:$0xff] }
 0x657   : > { %v3986_v44 = vpop.f32.mrf.mxu2  ;;  %v3650_v61 = vpop.f32.mrf.mxu0 }
 0x658   : > { %v4155_v9 = vpop.f32.mrf.mxu3  ;;  %5189 = vst [vmem:[%s6498_s23 + $0xa8] sm:$0xff] %v5117_v34   ;;  %v3819_v28 = vpop.f32.mrf.mxu1  ;;  %v3651_v43 = vadd.f32 %v3650_v61, %v6941_v52  ;;  %v3987_v2 = vadd.f32 %v3986_v44, %v3818_v23 }
 0x65a   : > { %v3820_v6 = vadd.f32 %v3819_v28, %v3651_v43  ;;  %v4156_v55 = vadd.f32 %v4155_v9, %v3987_v2 }
 0x65c   : > { %v4249_v26 = vmax.f32 %v4156_v55, 0.0 }
 0x65f   : > { %v3988_v48 = vpop.f32.mrf.mxu2  ;;  %v3653_v51 = vpop.f32.mrf.mxu0 }
 0x660   : > { %v4157_v12 = vpop.f32.mrf.mxu3  ;;  %v3989_v5 = vadd.f32 %v3988_v48, %v3820_v6  ;;  %v3822_v15 = vpop.f32.mrf.mxu1  ;;  %v3654_v31 = vadd.f32 %v3653_v51, %v6942_v19  ;;  %v6947_v48 = vld [vmem:[#allocation22_spill] sm:$0xff]  ;;  %v6948_v19 = vld [vmem:[#allocation23_spill] sm:$0xff] }
 0x662   : > { %v4158_v10 = vadd.f32 %v4157_v12, %v3989_v5  ;;  %3692 = vmatmul.bf16.gmra.mxu0 %v1350_v24  ;;  %v3823_v16 = vadd.f32 %v3822_v15, %v3654_v31 }
 0x663   : > { %3861 = vmatmul.bf16.gmra.mxu1 %v1351_v21 }
 0x664   : > { %v4250_v56 = vmax.f32 %v4158_v10, 0.0  ;;  %4030 = vmatmul.bf16.gmra.mxu2 %v1352_v57 }
 0x665   : > { %4908 = vmatmul.msk.bf16.gmra.mxu3 %vm2073_vm2, %v1353_v58 }
 0x666   : > { %v5122_v37 = vpack.c.bf16 %v4250_v56, %v4249_v26 }
 0x667   : > { %v3991_v13 = vpop.f32.mrf.mxu2  ;;  %v3655_v53 = vpop.f32.mrf.mxu0 }
 0x668   : > { %v4160_v1 = vpop.f32.mrf.mxu3  ;;  %5190 = vst [vmem:[%s6498_s23 + $0xb0] sm:$0xff] %v5122_v37   ;;  %v3824_v14 = vpop.f32.mrf.mxu1  ;;  %v3656_v59 = vadd.f32 %v3655_v53, %v6943_v4  ;;  %v3992_v38 = vadd.f32 %v3991_v13, %v3823_v16  ;;  %v6949_v4 = vld [vmem:[#allocation24_spill] sm:$0xff] }
 0x66a   : > { %v3825_v63 = vadd.f32 %v3824_v14, %v3656_v59  ;;  %v4161_v22 = vadd.f32 %v4160_v1, %v3992_v38 }
 0x66c   : > { %v4251_v18 = vmax.f32 %v4161_v22, 0.0 }
 0x66f   : > { %v3993_v30 = vpop.f32.mrf.mxu2  ;;  %v3658_v25 = vpop.f32.mrf.mxu0 }
 0x670   : > { %v4162_v41 = vpop.f32.mrf.mxu3  ;;  %v3994_v60 = vadd.f32 %v3993_v30, %v3825_v63  ;;  %v3827_v50 = vpop.f32.mrf.mxu1  ;;  %v3659_v36 = vadd.f32 %v3658_v25, %v6944_v33  ;;  %v6950_v33 = vld [vmem:[#allocation25_spill] sm:$0xff] }
 0x672   : > { %v4163_v40 = vadd.f32 %v4162_v41, %v3994_v60  ;;  %v3828_v47 = vadd.f32 %v3827_v50, %v3659_v36 }
 0x674   : > { %v4252_v7 = vmax.f32 %v4163_v40, 0.0 }
 0x676   : > { %v5127_v27 = vpack.c.bf16 %v4252_v7, %v4251_v18 }
 0x677   : > { %v3996_v45 = vpop.f32.mrf.mxu2  ;;  %v3660_v49 = vpop.f32.mrf.mxu0 }
 0x678   : > { %v4165_v46 = vpop.f32.mrf.mxu3  ;;  %5191 = vst [vmem:[%s6498_s23 + $0xb8] sm:$0xff] %v5127_v27   ;;  %v3829_v35 = vpop.f32.mrf.mxu1  ;;  %v3661_v34 = vadd.f32 %v3660_v49, %v6945_v32  ;;  %v3997_v29 = vadd.f32 %v3996_v45, %v3828_v47  ;;  %v6951_v32 = vld [vmem:[#allocation26_spill] sm:$0xff] }
 0x67a   : > { %v3830_v11 = vadd.f32 %v3829_v35, %v3661_v34  ;;  %v4166_v61 = vadd.f32 %v4165_v46, %v3997_v29 }
 0x67c   : > { %v4253_v20 = vmax.f32 %v4166_v61, 0.0 }
 0x67f   : > { %v3998_v44 = vpop.f32.mrf.mxu2  ;;  %v3663_v23 = vpop.f32.mrf.mxu0 }
 0x680   : > { %v4167_v9 = vpop.f32.mrf.mxu3  ;;  %v3999_v28 = vadd.f32 %v3998_v44, %v3830_v11  ;;  %v3832_v52 = vpop.f32.mrf.mxu1  ;;  %v3664_v3 = vadd.f32 %v3663_v23, %v6946_v8  ;;  %v6952_v8 = vld [vmem:[#allocation27_spill] sm:$0xff] }
 0x682   : > { %v4168_v43 = vadd.f32 %v4167_v9, %v3999_v28  ;;  %v3833_v6 = vadd.f32 %v3832_v52, %v3664_v3 }
 0x684   : > { %v4254_v39 = vmax.f32 %v4168_v43, 0.0 }
 0x686   : > { %v5132_v2 = vpack.c.bf16 %v4254_v39, %v4253_v20 }
 0x687   : > { %v4001_v62 = vpop.f32.mrf.mxu2  ;;  %v3665_v0 = vpop.f32.mrf.mxu0 }
 0x688   : > { %v4170_v54 = vpop.f32.mrf.mxu3  ;;  %5192 = vst [vmem:[%s6498_s23 + $0xc0] sm:$0xff] %v5132_v2   ;;  %v3834_v17 = vpop.f32.mrf.mxu1  ;;  %v3666_v12 = vadd.f32 %v3665_v0, %v6947_v48  ;;  %v4002_v24 = vadd.f32 %v4001_v62, %v3833_v6  ;;  %v6953_v48 = vld [vmem:[#allocation28_spill] sm:$0xff] }
 0x68a   : > { %v3835_v21 = vadd.f32 %v3834_v17, %v3666_v12  ;;  %v4171_v51 = vadd.f32 %v4170_v54, %v4002_v24 }
 0x68c   : > { %v4255_v26 = vmax.f32 %v4171_v51, 0.0 }
 0x68f   : > { %v4003_v55 = vpop.f32.mrf.mxu2  ;;  %v3668_v57 = vpop.f32.mrf.mxu0 }
 0x690   : > { %v4172_v5 = vpop.f32.mrf.mxu3  ;;  %v4004_v15 = vadd.f32 %v4003_v55, %v3835_v21  ;;  %v3837_v58 = vpop.f32.mrf.mxu1  ;;  %v3669_v31 = vadd.f32 %v3668_v57, %v6948_v19  ;;  %v6954_v19 = vld [vmem:[#allocation29_spill] sm:$0xff] }
 0x692   : > { %v4173_v10 = vadd.f32 %v4172_v5, %v4004_v15  ;;  %v3838_v16 = vadd.f32 %v3837_v58, %v3669_v31 }
 0x694   : > { %v4256_v56 = vmax.f32 %v4173_v10, 0.0 }
 0x696   : > { %v5137_v37 = vpack.c.bf16 %v4256_v56, %v4255_v26 }
 0x697   : > { %v4006_v13 = vpop.f32.mrf.mxu2  ;;  %v3670_v53 = vpop.f32.mrf.mxu0 }
 0x698   : > { %v4175_v1 = vpop.f32.mrf.mxu3  ;;  %5193 = vst [vmem:[%s6498_s23 + $0xc8] sm:$0xff] %v5137_v37   ;;  %v3839_v14 = vpop.f32.mrf.mxu1  ;;  %v3671_v59 = vadd.f32 %v3670_v53, %v6949_v4  ;;  %v4007_v38 = vadd.f32 %v4006_v13, %v3838_v16  ;;  %v6955_v4 = vld [vmem:[#allocation30_spill] sm:$0xff] }
 0x69a   : > { %v3840_v63 = vadd.f32 %v3839_v14, %v3671_v59  ;;  %v4176_v22 = vadd.f32 %v4175_v1, %v4007_v38 }
 0x69c   : > { %v4257_v18 = vmax.f32 %v4176_v22, 0.0 }
 0x69f   : > { %v4008_v30 = vpop.f32.mrf.mxu2  ;;  %v3673_v25 = vpop.f32.mrf.mxu0 }
 0x6a0   : > { %v4177_v41 = vpop.f32.mrf.mxu3  ;;  %v4009_v60 = vadd.f32 %v4008_v30, %v3840_v63  ;;  %v3842_v50 = vpop.f32.mrf.mxu1  ;;  %v3674_v36 = vadd.f32 %v3673_v25, %v6950_v33 }
 0x6a2   : > { %v4178_v40 = vadd.f32 %v4177_v41, %v4009_v60  ;;  %v3843_v47 = vadd.f32 %v3842_v50, %v3674_v36 }
 0x6a4   : > { %v4258_v7 = vmax.f32 %v4178_v40, 0.0 }
 0x6a6   : > { %v5142_v27 = vpack.c.bf16 %v4258_v7, %v4257_v18 }
 0x6a7   : > { %v4011_v45 = vpop.f32.mrf.mxu2  ;;  %v3675_v49 = vpop.f32.mrf.mxu0 }
 0x6a8   : > { %v4180_v46 = vpop.f32.mrf.mxu3  ;;  %5194 = vst [vmem:[%s6498_s23 + $0xd0] sm:$0xff] %v5142_v27   ;;  %v3844_v35 = vpop.f32.mrf.mxu1  ;;  %v3676_v34 = vadd.f32 %v3675_v49, %v6951_v32  ;;  %v4012_v29 = vadd.f32 %v4011_v45, %v3843_v47  ;;  %v6956_v47 = vld [vmem:[#allocation31_spill] sm:$0xff] }
 0x6aa   : > { %v3845_v11 = vadd.f32 %v3844_v35, %v3676_v34  ;;  %v4181_v61 = vadd.f32 %v4180_v46, %v4012_v29 }
 0x6ac   : > { %v4259_v20 = vmax.f32 %v4181_v61, 0.0 }
 0x6af   : > { %v4013_v44 = vpop.f32.mrf.mxu2  ;;  %v3678_v23 = vpop.f32.mrf.mxu0 }
 0x6b0   : > { %v4182_v9 = vpop.f32.mrf.mxu3  ;;  %v4014_v28 = vadd.f32 %v4013_v44, %v3845_v11  ;;  %v3847_v52 = vpop.f32.mrf.mxu1  ;;  %v3679_v3 = vadd.f32 %v3678_v23, %v6952_v8 }
 0x6b2   : > { %v4183_v43 = vadd.f32 %v4182_v9, %v4014_v28  ;;  %v3848_v6 = vadd.f32 %v3847_v52, %v3679_v3 }
 0x6b4   : > { %v4260_v39 = vmax.f32 %v4183_v43, 0.0 }
 0x6b6   : > { %v5147_v2 = vpack.c.bf16 %v4260_v39, %v4259_v20  ;;  %v6957_v39 = vld [vmem:[#allocation32_spill] sm:$0xff] }
 0x6b7   : > { %v4016_v62 = vpop.f32.mrf.mxu2  ;;  %v3680_v0 = vpop.f32.mrf.mxu0 }
 0x6b8   : > { %v4185_v54 = vpop.f32.mrf.mxu3  ;;  %5195 = vst [vmem:[%s6498_s23 + $0xd8] sm:$0xff] %v5147_v2   ;;  %v3849_v17 = vpop.f32.mrf.mxu1  ;;  %v3681_v12 = vadd.f32 %v3680_v0, %v6953_v48  ;;  %v4017_v24 = vadd.f32 %v4016_v62, %v3848_v6  ;;  %v6958_v0 = vld [vmem:[#allocation34_spill] sm:$0xff] }
 0x6ba   : > { %v3850_v21 = vadd.f32 %v3849_v17, %v3681_v12  ;;  %v4186_v51 = vadd.f32 %v4185_v54, %v4017_v24 }
 0x6bc   : > { %v4261_v26 = vmax.f32 %v4186_v51, 0.0 }
 0x6bf   : > { %v4018_v55 = vpop.f32.mrf.mxu2  ;;  %v3683_v57 = vpop.f32.mrf.mxu0 }
 0x6c0   : > { %v4187_v5 = vpop.f32.mrf.mxu3  ;;  %v4019_v15 = vadd.f32 %v4018_v55, %v3850_v21  ;;  %v3852_v58 = vpop.f32.mrf.mxu1  ;;  %v3684_v31 = vadd.f32 %v3683_v57, %v6954_v19 }
 0x6c2   : > { %v4188_v10 = vadd.f32 %v4187_v5, %v4019_v15  ;;  %v3853_v16 = vadd.f32 %v3852_v58, %v3684_v31 }
 0x6c4   : > { %v4262_v56 = vmax.f32 %v4188_v10, 0.0 }
 0x6c6   : > { %v5152_v37 = vpack.c.bf16 %v4262_v56, %v4261_v26 }
 0x6c7   : > { %v4021_v13 = vpop.f32.mrf.mxu2  ;;  %v3685_v53 = vpop.f32.mrf.mxu0 }
 0x6c8   : > { %v4190_v1 = vpop.f32.mrf.mxu3  ;;  %5196 = vst [vmem:[%s6498_s23 + $0xe0] sm:$0xff] %v5152_v37   ;;  %v3854_v14 = vpop.f32.mrf.mxu1  ;;  %v3686_v59 = vadd.f32 %v3685_v53, %v6955_v4  ;;  %v4022_v38 = vadd.f32 %v4021_v13, %v3853_v16 }
 0x6ca   : > { %v3855_v63 = vadd.f32 %v3854_v14, %v3686_v59  ;;  %v4191_v22 = vadd.f32 %v4190_v1, %v4022_v38 }
 0x6cc   : > { %v4263_v18 = vmax.f32 %v4191_v22, 0.0 }
 0x6cf   : > { %v4023_v30 = vpop.f32.mrf.mxu2  ;;  %v3688_v25 = vpop.f32.mrf.mxu0 }
 0x6d0   : > { %v4192_v41 = vpop.f32.mrf.mxu3  ;;  %v4024_v60 = vadd.f32 %v4023_v30, %v3855_v63  ;;  %v3857_v50 = vpop.f32.mrf.mxu1  ;;  %v3689_v33 = vadd.f32 %v3688_v25, %v6457_v42 }
 0x6d2   : > { %v4193_v40 = vadd.f32 %v4192_v41, %v4024_v60  ;;  %v3858_v35 = vadd.f32 %v3857_v50, %v3689_v33 }
 0x6d4   : > { %v4264_v7 = vmax.f32 %v4193_v40, 0.0 }
 0x6d6   : > { %v5157_v27 = vpack.c.bf16 %v4264_v7, %v4263_v18 }
 0x6d7   : > { %v4026_v36 = vpop.f32.mrf.mxu2  ;;  %v3690_v46 = vpop.f32.mrf.mxu0 }
 0x6d8   : > { %v4195_v45 = vpop.f32.mrf.mxu3  ;;  %5197 = vst [vmem:[%s6498_s23 + $0xe8] sm:$0xff] %v5157_v27   ;;  %v3859_v49 = vpop.f32.mrf.mxu1  ;;  %v3691_v32 = vadd.f32 %v3690_v46, %v6956_v47  ;;  %v4027_v34 = vadd.f32 %v4026_v36, %v3858_v35 }
 0x6da   : > { %v3860_v29 = vadd.f32 %v3859_v49, %v3691_v32  ;;  %v4196_v9 = vadd.f32 %v4195_v45, %v4027_v34 }
 0x6dc   : > { %v4265_v43 = vmax.f32 %v4196_v9, 0.0 }
 0x6df   : > { %v4028_v11 = vpop.f32.mrf.mxu2  ;;  %v3693_v28 = vpop.f32.mrf.mxu0 }
 0x6e0   : > { %v4197_v44 = vpop.f32.mrf.mxu3  ;;  %v4029_v61 = vadd.f32 %v4028_v11, %v3860_v29  ;;  %v3862_v52 = vpop.f32.mrf.mxu1  ;;  %v3694_v2 = vadd.f32 %v3693_v28, %v6957_v39 }
 0x6e2   : > { %v4198_v23 = vadd.f32 %v4197_v44, %v4029_v61  ;;  %v3863_v54 = vadd.f32 %v3862_v52, %v3694_v2 }
 0x6e4   : > { %v4266_v42 = vmax.f32 %v4198_v23, 0.0 }
 0x6e6   : > { %v5162_v20 = vpack.c.bf16 %v4266_v42, %v4265_v43 }
 0x6e7   : > { %v4031_v8 = vpop.f32.mrf.mxu2  ;;  %v3695_v62 = vpop.f32.mrf.mxu0 }
 0x6e8   : > { %v4200_v3 = vpop.f32.mrf.mxu3  ;;  %5198 = vst [vmem:[%s6498_s23 + $0xf0] sm:$0xff] %v5162_v20   ;;  %v3696_v17 = vadd.f32 %v3695_v62, %v6958_v0  ;;  %v4032_v6 = vadd.f32 %v4031_v8, %v3863_v54  ;;  %v3864_v48 = vpop.f32.mrf.mxu1 }
 0x6ea   : > { %v3865_v12 = vadd.f32 %v3864_v48, %v3696_v17  ;;  %v4201_v21 = vadd.f32 %v4200_v3, %v4032_v6 }
 0x6ec   : > { %v4267_v15 = vmax.f32 %v4201_v21, 0.0 }
 0x6ef   : > { %v4033_v24 = vpop.f32.mrf.mxu2 }
 0x6f0   : > { %v4034_v55 = vadd.f32 %v4033_v24, %v3865_v12  ;;  %v4202_v5 = vpop.f32.mrf.mxu3 }
 0x6f2   : > { %v4203_v51 = vadd.f32 %v4202_v5, %v4034_v55 }
 0x6f4   : > { %v4268_v57 = vmax.f32 %v4203_v51, 0.0  ;;  %4404 = sbr.rel (!%p5489_p11) target bundleno = 1816 (0x718), region = 40 }
 0x6f6   : > { %v5167_v58 = vpack.c.bf16 %v4268_v57, %v4267_v15 }
 0x6f8   : > { %5199 = vst [vmem:[%s6498_s23 + $0xf8] sm:$0xff] %v5167_v58  }
 0x6f9   : > { %s6971_s25 = smov (!%p4407_p6, %s4406_s25), 64 }
 0x6fa   : > { %s4911_s26 = sshll.u32 %s6971_s25, 2 }
 0x6fb   : > { %s4410_s30 = ssub.s32 256, %s4911_s26 }
 0x6fc   : > { %s4411_s24 = sshll.u32 %s4410_s30, 4 }
 0x6fd   : > { %4412 = vsyncadd %s4398_s16, %s4411_s24  ;;  %p6800_p13 = scmp.ne.s32.totalorder %s4911_s26, 0  ;;  %s5008_s27 = sshll.u32 %s5458_s13, 8 }
 0x6fe   : > { %s4415_s4 = scalar_lea.hbm %s6856_s2, %s5008_s27  ;;  %s4417_s5 = sshll.u32 %s6498_s23, 4  ;;  %s6809_s5 = int_to_ptr.vmem [resolvable:$true] %s4417_s5 }
 0x6ff   : > { %s4419_s3 = sshll.u32 %s4415_s4, 4  ;;  %s4915_s6 = sshll.u32 %s6971_s25, 6  ;;  %s6811_s3 = int_to_ptr.hbm [resolvable:$true] %s4419_s3 }
 0x700   : > { %s5329_s8 = sshra.s32 %s6809_s5, 4  ;;  %s5331_s14 = sshrl.u32 %s4915_s6, 4  ;;  %s5330_s8 = int_to_ptr.vmem [resolvable:$true] %s5329_s8 }
 0x701   : > { %s5336_s17 = scalar_lea.vmem %s5330_s8, %s5331_s14  ;;  %s5419_s13 = smov [#allocation7]  }
 0x702   : > { %p5337_p11 = scmp.ne.s32.totalorder %s5330_s8, %s5336_s17  ;;  %s5340_s20 = scalar_lea.vmem %s5419_s13, 512 }
 0x703   : > { %p5342_p10 = scmp.lt.s32.totalorder %s5340_s20, %s5336_s17 }
 0x704   : > { %p5338_p2 = pnand %p5337_p11, %p6800_p13 }
 0x706   : > { %p5339_p7 = pneg %p5338_p2 }
 0x708   : > { %p5344_p1 = pnand %p5342_p10, %p5339_p7 }
 0x70a   : > { %5347 = shalt.err (!%p5344_p1)
}
 0x70b   : > { %s5348_s23 = sshra.s32 %s6811_s3, 4  ;;  %s5359_s24 = scalar_lea.hbm %s6856_s2, 352  ;;  %s5349_s23 = int_to_ptr.hbm [resolvable:$true] %s5348_s23 }
 0x70c   : > { %s5355_s19 = scalar_lea.hbm %s5349_s23, %s5331_s14  ;;  %p5360_p8 = scmp.lt.s32.totalorder %s5349_s23, %s6856_s2 }
 0x70d   : > { %p5356_p0 = scmp.ne.s32.totalorder %s5349_s23, %s5355_s19  ;;  %p5361_p9 = scmp.lt.s32.totalorder %s5359_s24, %s5355_s19 }
 0x70f   : > { %p5357_p3 = pnand %p5356_p0, %p6800_p13  ;;  %p5362_p4 = por %p5361_p9, %p5360_p8 }
 0x711   : > { %p5358_p5 = pneg %p5357_p3 }
 0x713   : > { %p5363_p12 = pnand %p5362_p4, %p5358_p5 }
 0x715   : > { %5366 = shalt.err (!%p5363_p12)
}
 0x716   : > { %s5420_s29 = smov 64   ;;  %s5421_s4 = smov 4  }
 0x717   : > { %4425 = dma.vmem_to_hbm [thread:$0]  (%p6800_p13), %s6809_s5, %s4915_s6, %s6811_s3, %s4398_s16, %s5420_s29, %s5420_s29, %s5421_s4  }
 0x718 PF: > { %s4434_s8 = sand.u32 1, %s5398_s9   ;;  %p6960_p6 = scmp.ne.s32.totalorder %s6862_s22, 0 }
 0x719   : > { %p6961_p11 = scmp.ge.s32.totalorder %s5410_s12, 2  ;;  %s4435_s14 = scalar_lea.sflag [#allocation4], %s4434_s8 }
 0x71b   : > { %p5214_p2 = pnand %p6961_p11, %p6960_p6 }
 0x71d   : > { %p5215_p7 = pneg %p5214_p2 }
 0x71f   : > { %5393 = dma.done.wait (%p5215_p7), %s4435_s14, 4096  }
 0x720   : > { %5395 = vsyncadd (%p5215_p7), %s4435_s14, 4294963200  ;;  %p16_p10 = scmp.ge.s32.totalorder %s5462_s15, 4   ;;  %s6962_s9 = smov %s5402_s10 }
 0x721   : > { %s6963_s10 = smov %s5406_s11  ;;  %s6964_s11 = smov %s5474_s18 }
 0x722   : > { %s6965_s12 = smov %s5462_s15  ;;  %18 = sbr.rel (!%p16_p10) target bundleno = 6 (0x6), region = 77 }
 0x727   :  { %4441 = vsyncpa [#allocation3], 1 }
 0x728   :  { %4443 = vsyncpa [#allocation3 + $0x1], 1 }
 0x729   :  { %4444 = vsyncpa [#allocation6], 1 }
 0x72a   :  { %4445 = vsyncpa [#allocation4], 1 }
 0x72b   :  { %4447 = vsyncpa [#allocation4 + $0x1], 1 }

</bundles_post_ra>
